<compile_context>
chip_gen: v6e
topology: v6e:2x2x1
jax: 0.10.0
libtpu: 0.0.40
codegen_flags: <defaults>
</compile_context>

<pallas_src>
import functools

import jax
import jax.numpy as jnp
from jax import lax
from jax.experimental import pallas as pl
from jax.experimental.pallas import tpu as pltpu

_EPS = 1e-5


def _num_cores_per_chip():
    """Best-effort TensorCore count (v7x megacore sharding hint)."""
    try:
        return max(1, int(getattr(jax.devices()[0], "num_cores", 1)))
    except Exception:  # pragma: no cover - never fatal
        return 1


def _choose_tb(bn, c, slab_bytes):
    """Slabs (B*N elements) per grid step.

    * rows = tb*C capped near 128 so the block-diagonal (rows x rows) score
      matmul stays cheap while filling the MXU lane dimension.
    * block rows kept sublane-aligned (multiple of 8) unless the block covers
      the whole array.
    * double-buffered in+out block bytes kept under a conservative budget.
    * single-TC chips (v5e/v6e) prefer ONE grid step; 2-TC chips (v7x) prefer
      an even >=2 step count so both cores get balanced work.
    """
    max_rows = max(128, c)
    budget = 8 * 1024 * 1024
    cands = [d for d in range(1, bn + 1)
             if bn % d == 0
             and d * c <= max_rows
             and ((d * c) % 8 == 0 or d == bn)
             and 4 * d * slab_bytes <= budget]
    if not cands:
        return 1 if (c % 8 == 0) else bn
    if _num_cores_per_chip() >= 2:
        even = [d for d in cands if (bn // d) >= 2 and (bn // d) % 2 == 0]
        if even:
            return max(even)
    return max(cands)


def _block_mask(tb, c):
    """(rows, rows) additive mask: 0 inside each slab's CxC block, -1e30 off."""
    r = jnp.arange(tb * c) // c
    return jnp.where(r[:, None] == r[None, :], 0.0, -1e30).astype(jnp.float32)


def asi_kernel(x_ref, mask_ref, wmat_ref, bvec_ref, cvec_ref, fmat_ref,
               out_ref, *, tb, c, f, fast):
    l = 2 * f
    rows = tb * c
    cd = wmat_ref.dtype                       # bf16 on the fast path, else f32

    x = x_ref[...]                            # (rows, L) interleaved streams
    s_mask = mask_ref[...]                    # (rows, rows) additive block mask

    # Packed row constants (one (8, L) operand).
    lntg = cvec_ref[0:1, :]
    lntb = cvec_ref[1:2, :]
    linw_e = cvec_ref[2:3, :]
    linw_o = cvec_ref[3:4, :]
    hb_t = cvec_ref[4:5, :]
    hb_i = cvec_ref[5:6, :]
    lin_b = cvec_ref[6:7, :]

    # Even / odd lane masks generated in-register (no extra operand / DMA).
    lane = lax.broadcasted_iota(jnp.int32, (1, l), 1)
    em = ((lane & 1) == 0).astype(jnp.float32)
    om = 1.0 - em

    def softmax(s):
        s = s + s_mask                        # confine attention to each slab
        s = s - jnp.max(s, axis=-1, keepdims=True)
        e = jnp.exp(s)
        den = jnp.sum(e, axis=-1, keepdims=True)
        if fast:
            return e * pl.reciprocal(den, approx=True)   # EUP slot
        return e / den

    def phase(xin, p):
        # One fused projection for both attentions of the phase.
        # Columns: [q1 | k1 | q2 | k2 | v1 | v2]; 1/kd pre-folded into q,
        # collapsed head weight pre-folded into v; the folded (even/odd)
        # row/column scatters keep everything in the interleaved layout.
        proj = (jnp.dot(xin.astype(cd), wmat_ref[p],
                        preferred_element_type=jnp.float32)
                + bvec_ref[p:p + 1, :])
        q1 = proj[:, 0 * f:1 * f].astype(cd)
        k1 = proj[:, 1 * f:2 * f].astype(cd)
        q2 = proj[:, 2 * f:3 * f].astype(cd)
        k2 = proj[:, 3 * f:4 * f].astype(cd)
        v1 = proj[:, 4 * f:4 * f + l].astype(cd)
        v2 = proj[:, 4 * f + l:].astype(cd)
        # Block-diagonal attention as single lane-dense matmuls.
        s1 = lax.dot_general(q1, k1, (((1,), (1,)), ((), ())),
                             preferred_element_type=jnp.float32)
        s2 = lax.dot_general(q2, k2, (((1,), (1,)), ((), ())),
                             preferred_element_type=jnp.float32)
        p1 = softmax(s1).astype(cd)
        p2 = softmax(s2).astype(cd)
        # v1 writes only even output lanes, v2 only odd -> the sums interleave.
        return (jnp.dot(p1, v1, preferred_element_type=jnp.float32)
                + jnp.dot(p2, v2, preferred_element_type=jnp.float32))

    # ---- Time_att_1 / Time_att_2 + residual + per-row LayerNorm over F ----
    t = x + phase(x, 0) + hb_t
    inv_f = 1.0 / f
    mu = (jnp.sum(t * em, -1, keepdims=True) * em
          + jnp.sum(t * om, -1, keepdims=True) * om) * inv_f
    d = t - mu
    de = d * em
    do = d * om
    var = (jnp.sum(de * de, -1, keepdims=True) * em
           + jnp.sum(do * do, -1, keepdims=True) * om) * inv_f
    xt = d * lax.rsqrt(var + _EPS) * lntg + lntb

    # ---- Interaction_att_1 / Interaction_att_2 + Linear(F->1) residual ----
    i_att = phase(xt, 1) + hb_i
    r1 = jnp.sum(i_att * linw_e, -1, keepdims=True)
    r2 = jnp.sum(i_att * linw_o, -1, keepdims=True)
    # (rows, L) -> (tb, C, L): leading-dim split, layout-preserving.
    y = (i_att + r1 * em + r2 * om + lin_b).reshape(tb, c, l)

    # ---- Final LayerNorm over (C, F), per slab and per stream ----
    em3 = em[None]
    om3 = om[None]
    inv_cf = 1.0 / (c * f)
    se = jnp.sum(jnp.sum(y * em3, -1, keepdims=True), 1, keepdims=True)
    so = jnp.sum(jnp.sum(y * om3, -1, keepdims=True), 1, keepdims=True)
    mu2 = (se * em3 + so * om3) * inv_cf
    dy = y - mu2
    dye = dy * em3
    dyo = dy * om3
    ve = jnp.sum(jnp.sum(dye * dye, -1, keepdims=True), 1, keepdims=True)
    vo = jnp.sum(jnp.sum(dyo * dyo, -1, keepdims=True), 1, keepdims=True)
    var2 = (ve * em3 + vo * om3) * inv_cf
    out = dy * lax.rsqrt(var2 + _EPS) * fmat_ref[0][None] + fmat_ref[1][None]
    out_ref[...] = out.reshape(rows, l)       # interleaved (even=x11, odd=x22)


def prepare_kernel_params(p, C, L, num_head, precision="f32"):
    """Fold the even/odd (de-)interleave, 1/kd, and the collapsed head weight
    into two fused per-phase projection matrices, and pack the small constants.
    bf16 operands are safe on all generations (v5e MXU is bf16-native too);
    accumulation / softmax / LayerNorm stay f32 either way."""
    F = L // 2
    cd = jnp.bfloat16 if precision == "bf16" else jnp.float32
    W, b = p["W"], p["b"]
    ev = slice(0, L, 2)
    od = slice(1, L, 2)
    inv_kd = 1.0 / jnp.sqrt(jnp.asarray(C, jnp.float32) / num_head)
    head_a = jnp.sum(p["hw"], axis=-1)        # collapsed Linear(num_head -> 1)

    def qk(idx, even_in, scale=None):         # (L, F): rows scattered per stream
        w = W[idx] if scale is None else W[idx] * scale
        return jnp.zeros((L, F), jnp.float32).at[ev if even_in else od, :].set(w)

    def vv(idx, even, scale):                 # (L, L): rows + output cols scattered
        sl = ev if even else od
        return jnp.zeros((L, L), jnp.float32).at[sl, sl].set(W[idx] * scale)

    def spread(vec, even):                    # (L,)
        return jnp.zeros((L,), jnp.float32).at[ev if even else od].set(vec)

    def inter(v1, v2):                        # interleave stream params on last axis
        out = jnp.zeros(v1.shape[:-1] + (L,), jnp.float32)
        return out.at[..., ev].set(v1).at[..., od].set(v2)

    # W layout: [0..2]=Time1 q,k,v  [3..5]=Time2  [6..8]=Inter1  [9..11]=Inter2
    w_t = jnp.concatenate([qk(0, True, inv_kd), qk(1, True),       # Time1
                           qk(3, False, inv_kd), qk(4, False),     # Time2
                           vv(2, True, head_a[0]),
                           vv(5, False, head_a[1])], axis=1)
    w_i = jnp.concatenate([qk(6, False, inv_kd), qk(7, True),      # Inter1: q<-x2t
                           qk(9, True, inv_kd), qk(10, False),     # Inter2: q<-x1t
                           vv(8, True, head_a[2]),
                           vv(11, False, head_a[3])], axis=1)
    wmat = jnp.stack([w_t, w_i]).astype(cd)                        # (2, L, 4F+2L)

    b_t = jnp.concatenate([b[0] * inv_kd, b[1], b[3] * inv_kd, b[4],
                           spread(b[2] * head_a[0], True),
                           spread(b[5] * head_a[1], False)])
    b_i = jnp.concatenate([b[6] * inv_kd, b[7], b[9] * inv_kd, b[10],
                           spread(b[8] * head_a[2], True),
                           spread(b[11] * head_a[3], False)])
    bvec = jnp.stack([b_t, b_i])                                   # (2, 4F+2L) f32

    lane = jnp.arange(L)
    em = (lane % 2 == 0).astype(jnp.float32)
    om = 1.0 - em
    hb = p["hb"]
    cvec = jnp.stack([
        inter(p["ln_t_g"][0], p["ln_t_g"][1]),      # 0: per-row LN gamma
        inter(p["ln_t_b"][0], p["ln_t_b"][1]),      # 1: per-row LN beta
        spread(p["lin_w"][0], True),                # 2: Linear(F->1) w, stream 1
        spread(p["lin_w"][1], False),               # 3: Linear(F->1) w, stream 2
        hb[0] * em + hb[1] * om,                    # 4: Time head biases
        hb[2] * em + hb[3] * om,                    # 5: Interaction head biases
        p["lin_b"][0] * em + p["lin_b"][1] * om,    # 6: Linear(F->1) biases
        jnp.zeros((L,), jnp.float32),               # 7: pad to a full sublane tile
    ])                                                             # (8, L)

    fmat = jnp.stack([inter(p["ln_f_g"][0], p["ln_f_g"][1]),
                      inter(p["ln_f_b"][0], p["ln_f_b"][1])])      # (2, C, L)

    return dict(wmat=wmat, bvec=bvec, cvec=cvec, fmat=fmat,
                fast=(precision == "bf16"))


def asi_block_att(x, kp):
    """x: (B, N, C, L) float32 (IF_Chanel=False path). Returns (B, N, C, L//2, 2)."""
    B, N, C, L = x.shape
    F = L // 2
    BN = B * N
    tb = _choose_tb(BN, C, C * L * 4)
    rows = tb * C

    xf = x.reshape(BN * C, L)                 # contiguous -> free reshape
    smask = _block_mask(tb, C)                # (rows, rows) additive block mask

    def full(arr):
        return pl.BlockSpec(arr.shape, lambda i, n=arr.ndim: (0,) * n)

    blk = pl.BlockSpec((rows, L), lambda i: (i, 0))
    kernel = functools.partial(asi_kernel, tb=tb, c=C, f=F, fast=kp["fast"])

    out = pl.pallas_call(
        kernel,
        out_shape=jax.ShapeDtypeStruct((BN * C, L), jnp.float32),
        grid=(BN // tb,),
        in_specs=[
            blk,
            full(smask), full(kp["wmat"]), full(kp["bvec"]),
            full(kp["cvec"]), full(kp["fmat"]),
        ],
        out_specs=blk,
        compiler_params=pltpu.CompilerParams(
            dimension_semantics=("parallel",),
            vmem_limit_bytes=32 * 1024 * 1024,   # ample headroom on all gens
        ),
    )(xf, smask, kp["wmat"], kp["bvec"], kp["cvec"], kp["fmat"])

    # (BN*C, L) -> (B, N, C, F, 2): free reshape; [..., 0]=x_11, [..., 1]=x_22
    return out.reshape(B, N, C, F, 2)


def init_params(key, C, F, num_head):
    ks = jax.random.split(key, 10)
    return dict(
        W=0.2 * jax.random.normal(ks[0], (12, F, F), jnp.float32),
        b=0.1 * jax.random.normal(ks[1], (12, F), jnp.float32),
        hw=0.3 * jax.random.normal(ks[2], (4, num_head), jnp.float32),
        hb=0.1 * jax.random.normal(ks[3], (4,), jnp.float32),
        ln_t_g=1.0 + 0.1 * jax.random.normal(ks[4], (2, F), jnp.float32),
        ln_t_b=0.1 * jax.random.normal(ks[5], (2, F), jnp.float32),
        lin_w=0.2 * jax.random.normal(ks[6], (2, F), jnp.float32),
        lin_b=0.1 * jax.random.normal(ks[7], (2,), jnp.float32),
        ln_f_g=1.0 + 0.1 * jax.random.normal(ks[8], (2, C, F), jnp.float32),
        ln_f_b=0.1 * jax.random.normal(ks[9], (2, C, F), jnp.float32),
    )


def reference(x, p, num_head):
    """Pure-JAX mirror of the PyTorch forward (eval mode) for validation."""
    B, N, C, L = x.shape
    x1 = x[..., 0::2]
    x2 = x[..., 1::2]
    kd = jnp.sqrt(jnp.asarray(C, jnp.float32) / num_head)
    W, b = p["W"], p["b"]

    def softmax(s):
        s = s - jnp.max(s, -1, keepdims=True)
        e = jnp.exp(s)
        return e / jnp.sum(e, -1, keepdims=True)

    def attn(q_in, kv_in, base, hw, hb):
        q = q_in @ W[base] + b[base]
        k = kv_in @ W[base + 1] + b[base + 1]
        v = kv_in @ W[base + 2] + b[base + 2]
        s = jnp.einsum("...ij,...kj->...ik", q, k) / kd
        line = softmax(s) @ v
        heads = jnp.stack([line] * num_head, axis=-1)       # identical heads
        return jnp.einsum("...h,h->...", heads, hw) + hb    # Linear(num_head -> 1)

    def ln(y, g, bb, axes):
        mu = jnp.mean(y, axes, keepdims=True)
        var = jnp.mean((y - mu) ** 2, axes, keepdims=True)
        return (y - mu) / jnp.sqrt(var + 1e-5) * g + bb

    x1t = ln(x1 + attn(x1, x1, 0, p["hw"][0], p["hb"][0]), p["ln_t_g"][0], p["ln_t_b"][0], (-1,))
    x2t = ln(x2 + attn(x2, x2, 3, p["hw"][1], p["hb"][1]), p["ln_t_g"][1], p["ln_t_b"][1], (-1,))
    x11 = attn(x2t, x1t, 6, p["hw"][2], p["hb"][2])
    x22 = attn(x1t, x2t, 9, p["hw"][3], p["hb"][3])
    x11 = x11 + (jnp.sum(x11 * p["lin_w"][0], -1, keepdims=True) + p["lin_b"][0])
    x22 = x22 + (jnp.sum(x22 * p["lin_w"][1], -1, keepdims=True) + p["lin_b"][1])
    x11 = ln(x11, p["ln_f_g"][0], p["ln_f_b"][0], (-2, -1))
    x22 = ln(x22, p["ln_f_g"][1], p["ln_f_b"][1], (-2, -1))
    return jnp.stack([x11, x22], axis=-1)


if __name__ == "__main__":
    # Module config: Input_len=16 -> final_len=8, num_id=N=4, num_hi=C=16,
    # num_head=2, dropout=0.1 (identity at inference), IF_Chanel=False.
    B, N, C, L, num_head = 2, 4, 16, 16, 2
    key = jax.random.PRNGKey(0)
    kx, kparam = jax.random.split(key)
    x = jax.random.normal(kx, (B, N, C, L), jnp.float32)
    params = init_params(kparam, C, L // 2, num_head)

    ref = jax.block_until_ready(reference(x, params, num_head))

    # Exact path: f32 MXU operands, exact softmax divide (validation anchor).
    kp32 = prepare_kernel_params(params, C, L, num_head, "f32")
    out32 = jax.block_until_ready(asi_block_att(x, kp32))
    assert out32.shape == (B, N, C, L // 2, 2), out32.shape
    err32 = float(jnp.max(jnp.abs(out32 - ref)))
    if not jnp.allclose(out32, ref, atol=5e-4, rtol=5e-4):
        raise AssertionError(f"f32 kernel/reference mismatch, max abs err = {err32}")

    # Fast path: bf16 MXU operands + approx-reciprocal softmax (all gens).
    kpbf = prepare_kernel_params(params, C, L, num_head, "bf16")
    outbf = jax.block_until_ready(asi_block_att(x, kpbf))
    errbf = float(jnp.max(jnp.abs(outbf - ref)))
    if not (errbf == errbf and errbf < 0.5):      # f32 path is the anchor; bf16 monitored
        raise AssertionError(f"bf16 kernel/reference mismatch, max abs err = {errbf}")

    print("KERNEL_OK")
</pallas_src>

<mosaic_0001>
module attributes {stable_mosaic.version = 11 : i64} {
  func.func @asi_kernel(%arg0: i32, %arg1: memref<128x16xf32, #tpu.memory_space<vmem>>, %arg2: memref<128x128xf32, #tpu.memory_space<vmem>>, %arg3: memref<2x16x64xf32, #tpu.memory_space<vmem>>, %arg4: memref<2x64xf32, #tpu.memory_space<vmem>>, %arg5: memref<8x16xf32, #tpu.memory_space<vmem>>, %arg6: memref<2x16x16xf32, #tpu.memory_space<vmem>>, %arg7: memref<128x16xf32, #tpu.memory_space<vmem>>) attributes {dimension_semantics = [#tpu.dimension_semantics<parallel>], iteration_bounds = array<i64: 1>, scalar_prefetch = 0 : i64, scratch_operands = 0 : i64, tpu.core_type = #tpu.core_type<tc>, window_params = [{transform_indices = @transform_0, window_bounds = array<i64: 128, 16>}, {pipeline_mode = #tpu.pipeline_mode<synchronous>, transform_indices = @transform_1, window_bounds = array<i64: 128, 128>}, {pipeline_mode = #tpu.pipeline_mode<synchronous>, transform_indices = @transform_2, window_bounds = array<i64: 2, 16, 64>}, {pipeline_mode = #tpu.pipeline_mode<synchronous>, transform_indices = @transform_3, window_bounds = array<i64: 2, 64>}, {pipeline_mode = #tpu.pipeline_mode<synchronous>, transform_indices = @transform_4, window_bounds = array<i64: 8, 16>}, {pipeline_mode = #tpu.pipeline_mode<synchronous>, transform_indices = @transform_5, window_bounds = array<i64: 2, 16, 16>}, {transform_indices = @transform_6, window_bounds = array<i64: 128, 16>}]} {
    %c0 = arith.constant 0 : index
    %c0_0 = arith.constant 0 : index
    %0 = vector.load %arg1[%c0, %c0_0] : memref<128x16xf32, #tpu.memory_space<vmem>>, vector<128x16xf32>
    %c0_1 = arith.constant 0 : index
    %c0_2 = arith.constant 0 : index
    %1 = vector.load %arg2[%c0_1, %c0_2] : memref<128x128xf32, #tpu.memory_space<vmem>>, vector<128x128xf32>
    %c0_3 = arith.constant 0 : index
    %c0_4 = arith.constant 0 : index
    %2 = vector.load %arg5[%c0_3, %c0_4] : memref<8x16xf32, #tpu.memory_space<vmem>>, vector<1x16xf32>
    %c1 = arith.constant 1 : index
    %c0_5 = arith.constant 0 : index
    %3 = vector.load %arg5[%c1, %c0_5] : memref<8x16xf32, #tpu.memory_space<vmem>>, vector<1x16xf32>
    %c2 = arith.constant 2 : index
    %c0_6 = arith.constant 0 : index
    %4 = vector.load %arg5[%c2, %c0_6] : memref<8x16xf32, #tpu.memory_space<vmem>>, vector<1x16xf32>
    %c3 = arith.constant 3 : index
    %c0_7 = arith.constant 0 : index
    %5 = vector.load %arg5[%c3, %c0_7] : memref<8x16xf32, #tpu.memory_space<vmem>>, vector<1x16xf32>
    %c4 = arith.constant 4 : index
    %c0_8 = arith.constant 0 : index
    %6 = vector.load %arg5[%c4, %c0_8] : memref<8x16xf32, #tpu.memory_space<vmem>>, vector<1x16xf32>
    %c5 = arith.constant 5 : index
    %c0_9 = arith.constant 0 : index
    %7 = vector.load %arg5[%c5, %c0_9] : memref<8x16xf32, #tpu.memory_space<vmem>>, vector<1x16xf32>
    %c6 = arith.constant 6 : index
    %c0_10 = arith.constant 0 : index
    %8 = vector.load %arg5[%c6, %c0_10] : memref<8x16xf32, #tpu.memory_space<vmem>>, vector<1x16xf32>
    %9 = tpu.iota {dimensions = array<i32: 1>} : vector<1x16xi32>
    %c1_i32 = arith.constant 1 : i32
    %10 = vector.broadcast %c1_i32 : i32 to vector<1x16xi32>
    %11 = arith.andi %9, %10 : vector<1x16xi32>
    %c0_i32 = arith.constant 0 : i32
    %12 = vector.broadcast %c0_i32 : i32 to vector<1x16xi32>
    %13 = arith.cmpi eq, %11, %12 : vector<1x16xi32>
    %14 = arith.extui %13 : vector<1x16xi1> to vector<1x16xi32>
    %15 = arith.sitofp %14 : vector<1x16xi32> to vector<1x16xf32>
    %cst = arith.constant 1.000000e+00 : f32
    %16 = vector.broadcast %cst : f32 to vector<1x16xf32>
    %17 = arith.subf %16, %15 : vector<1x16xf32>
    %c0_11 = arith.constant 0 : index
    %c0_12 = arith.constant 0 : index
    %c0_13 = arith.constant 0 : index
    %18 = vector.load %arg3[%c0_11, %c0_12, %c0_13] : memref<2x16x64xf32, #tpu.memory_space<vmem>>, vector<1x16x64xf32>
    %19 = vector.shape_cast %18 : vector<1x16x64xf32> to vector<16x64xf32>
    %cst_14 = arith.constant dense<0.000000e+00> : vector<128x64xf32>
    %20 = tpu.matmul %0, %19, %cst_14 {dimension_numbers = #tpu.dot_dimension_numbers<[1], [0], [0], [1], [0, 0, 1, 1], [], []>} : vector<128x16xf32>, vector<16x64xf32>, vector<128x64xf32> -> vector<128x64xf32>
    %c0_15 = arith.constant 0 : index
    %c0_16 = arith.constant 0 : index
    %21 = vector.load %arg4[%c0_15, %c0_16] : memref<2x64xf32, #tpu.memory_space<vmem>>, vector<1x64xf32>
    %22 = vector.broadcast %21 : vector<1x64xf32> to vector<128x64xf32>
    %23 = arith.addf %20, %22 : vector<128x64xf32>
    %24 = vector.extract_strided_slice %23 {offsets = [0, 0], sizes = [128, 8], strides = [1, 1]} : vector<128x64xf32> to vector<128x8xf32>
    %25 = vector.extract_strided_slice %23 {offsets = [0, 8], sizes = [128, 8], strides = [1, 1]} : vector<128x64xf32> to vector<128x8xf32>
    %26 = vector.extract_strided_slice %23 {offsets = [0, 16], sizes = [128, 8], strides = [1, 1]} : vector<128x64xf32> to vector<128x8xf32>
    %27 = vector.extract_strided_slice %23 {offsets = [0, 24], sizes = [128, 8], strides = [1, 1]} : vector<128x64xf32> to vector<128x8xf32>
    %28 = vector.extract_strided_slice %23 {offsets = [0, 32], sizes = [128, 16], strides = [1, 1]} : vector<128x64xf32> to vector<128x16xf32>
    %29 = vector.extract_strided_slice %23 {offsets = [0, 48], sizes = [128, 16], strides = [1, 1]} : vector<128x64xf32> to vector<128x16xf32>
    %cst_17 = arith.constant dense<0.000000e+00> : vector<128x128xf32>
    %30 = tpu.matmul %24, %25, %cst_17 {dimension_numbers = #tpu.dot_dimension_numbers<[1], [1], [0], [0], [0, 0, 1, 0], [], []>} : vector<128x8xf32>, vector<128x8xf32>, vector<128x128xf32> -> vector<128x128xf32>
    %cst_18 = arith.constant dense<0.000000e+00> : vector<128x128xf32>
    %31 = tpu.matmul %26, %27, %cst_18 {dimension_numbers = #tpu.dot_dimension_numbers<[1], [1], [0], [0], [0, 0, 1, 0], [], []>} : vector<128x8xf32>, vector<128x8xf32>, vector<128x128xf32> -> vector<128x128xf32>
    %32 = arith.addf %30, %1 : vector<128x128xf32>
    %cst_19 = arith.constant dense<0xFF800000> : vector<128xf32>
    %33 = vector.multi_reduction <maximumf>, %32, %cst_19 [1] : vector<128x128xf32> to vector<128xf32>
    %34 = vector.shape_cast %33 : vector<128xf32> to vector<128x1xf32>
    %35 = vector.broadcast %34 : vector<128x1xf32> to vector<128x128xf32>
    %36 = arith.subf %32, %35 : vector<128x128xf32>
    %37 = math.exp %36 : vector<128x128xf32>
    %cst_20 = arith.constant dense<0.000000e+00> : vector<128xf32>
    %38 = vector.multi_reduction <add>, %37, %cst_20 [1] : vector<128x128xf32> to vector<128xf32>
    %39 = vector.shape_cast %38 : vector<128xf32> to vector<128x1xf32>
    %40 = vector.broadcast %39 : vector<128x1xf32> to vector<128x128xf32>
    %41 = arith.divf %37, %40 : vector<128x128xf32>
    %42 = arith.addf %31, %1 : vector<128x128xf32>
    %cst_21 = arith.constant dense<0xFF800000> : vector<128xf32>
    %43 = vector.multi_reduction <maximumf>, %42, %cst_21 [1] : vector<128x128xf32> to vector<128xf32>
    %44 = vector.shape_cast %43 : vector<128xf32> to vector<128x1xf32>
    %45 = vector.broadcast %44 : vector<128x1xf32> to vector<128x128xf32>
    %46 = arith.subf %42, %45 : vector<128x128xf32>
    %47 = math.exp %46 : vector<128x128xf32>
    %cst_22 = arith.constant dense<0.000000e+00> : vector<128xf32>
    %48 = vector.multi_reduction <add>, %47, %cst_22 [1] : vector<128x128xf32> to vector<128xf32>
    %49 = vector.shape_cast %48 : vector<128xf32> to vector<128x1xf32>
    %50 = vector.broadcast %49 : vector<128x1xf32> to vector<128x128xf32>
    %51 = arith.divf %47, %50 : vector<128x128xf32>
    %cst_23 = arith.constant dense<0.000000e+00> : vector<128x16xf32>
    %52 = tpu.matmul %41, %28, %cst_23 {dimension_numbers = #tpu.dot_dimension_numbers<[1], [0], [0], [1], [0, 0, 1, 1], [], []>} : vector<128x128xf32>, vector<128x16xf32>, vector<128x16xf32> -> vector<128x16xf32>
    %cst_24 = arith.constant dense<0.000000e+00> : vector<128x16xf32>
    %53 = tpu.matmul %51, %29, %cst_24 {dimension_numbers = #tpu.dot_dimension_numbers<[1], [0], [0], [1], [0, 0, 1, 1], [], []>} : vector<128x128xf32>, vector<128x16xf32>, vector<128x16xf32> -> vector<128x16xf32>
    %54 = arith.addf %52, %53 : vector<128x16xf32>
    %55 = arith.addf %0, %54 : vector<128x16xf32>
    %56 = vector.broadcast %6 : vector<1x16xf32> to vector<128x16xf32>
    %57 = arith.addf %55, %56 : vector<128x16xf32>
    %58 = vector.broadcast %15 : vector<1x16xf32> to vector<128x16xf32>
    %59 = arith.mulf %57, %58 : vector<128x16xf32>
    %cst_25 = arith.constant dense<0.000000e+00> : vector<128xf32>
    %60 = vector.multi_reduction <add>, %59, %cst_25 [1] : vector<128x16xf32> to vector<128xf32>
    %61 = vector.shape_cast %60 : vector<128xf32> to vector<128x1xf32>
    %62 = vector.broadcast %61 : vector<128x1xf32> to vector<128x16xf32>
    %63 = vector.broadcast %15 : vector<1x16xf32> to vector<128x16xf32>
    %64 = arith.mulf %62, %63 : vector<128x16xf32>
    %65 = vector.broadcast %17 : vector<1x16xf32> to vector<128x16xf32>
    %66 = arith.mulf %57, %65 : vector<128x16xf32>
    %cst_26 = arith.constant dense<0.000000e+00> : vector<128xf32>
    %67 = vector.multi_reduction <add>, %66, %cst_26 [1] : vector<128x16xf32> to vector<128xf32>
    %68 = vector.shape_cast %67 : vector<128xf32> to vector<128x1xf32>
    %69 = vector.broadcast %68 : vector<128x1xf32> to vector<128x16xf32>
    %70 = vector.broadcast %17 : vector<1x16xf32> to vector<128x16xf32>
    %71 = arith.mulf %69, %70 : vector<128x16xf32>
    %72 = arith.addf %64, %71 : vector<128x16xf32>
    %cst_27 = arith.constant 1.250000e-01 : f32
    %73 = vector.broadcast %cst_27 : f32 to vector<128x16xf32>
    %74 = arith.mulf %72, %73 : vector<128x16xf32>
    %75 = arith.subf %57, %74 : vector<128x16xf32>
    %76 = vector.broadcast %15 : vector<1x16xf32> to vector<128x16xf32>
    %77 = arith.mulf %75, %76 : vector<128x16xf32>
    %78 = vector.broadcast %17 : vector<1x16xf32> to vector<128x16xf32>
    %79 = arith.mulf %75, %78 : vector<128x16xf32>
    %80 = arith.mulf %77, %77 : vector<128x16xf32>
    %cst_28 = arith.constant dense<0.000000e+00> : vector<128xf32>
    %81 = vector.multi_reduction <add>, %80, %cst_28 [1] : vector<128x16xf32> to vector<128xf32>
    %82 = vector.shape_cast %81 : vector<128xf32> to vector<128x1xf32>
    %83 = vector.broadcast %82 : vector<128x1xf32> to vector<128x16xf32>
    %84 = vector.broadcast %15 : vector<1x16xf32> to vector<128x16xf32>
    %85 = arith.mulf %83, %84 : vector<128x16xf32>
    %86 = arith.mulf %79, %79 : vector<128x16xf32>
    %cst_29 = arith.constant dense<0.000000e+00> : vector<128xf32>
    %87 = vector.multi_reduction <add>, %86, %cst_29 [1] : vector<128x16xf32> to vector<128xf32>
    %88 = vector.shape_cast %87 : vector<128xf32> to vector<128x1xf32>
    %89 = vector.broadcast %88 : vector<128x1xf32> to vector<128x16xf32>
    %90 = vector.broadcast %17 : vector<1x16xf32> to vector<128x16xf32>
    %91 = arith.mulf %89, %90 : vector<128x16xf32>
    %92 = arith.addf %85, %91 : vector<128x16xf32>
    %cst_30 = arith.constant 1.250000e-01 : f32
    %93 = vector.broadcast %cst_30 : f32 to vector<128x16xf32>
    %94 = arith.mulf %92, %93 : vector<128x16xf32>
    %cst_31 = arith.constant 9.99999974E-6 : f32
    %95 = vector.broadcast %cst_31 : f32 to vector<128x16xf32>
    %96 = arith.addf %94, %95 : vector<128x16xf32>
    %97 = math.rsqrt %96 : vector<128x16xf32>
    %98 = arith.mulf %75, %97 : vector<128x16xf32>
    %99 = vector.broadcast %2 : vector<1x16xf32> to vector<128x16xf32>
    %100 = arith.mulf %98, %99 : vector<128x16xf32>
    %101 = vector.broadcast %3 : vector<1x16xf32> to vector<128x16xf32>
    %102 = arith.addf %100, %101 : vector<128x16xf32>
    %c1_32 = arith.constant 1 : index
    %c0_33 = arith.constant 0 : index
    %c0_34 = arith.constant 0 : index
    %103 = vector.load %arg3[%c1_32, %c0_33, %c0_34] : memref<2x16x64xf32, #tpu.memory_space<vmem>>, vector<1x16x64xf32>
    %104 = vector.shape_cast %103 : vector<1x16x64xf32> to vector<16x64xf32>
    %cst_35 = arith.constant dense<0.000000e+00> : vector<128x64xf32>
    %105 = tpu.matmul %102, %104, %cst_35 {dimension_numbers = #tpu.dot_dimension_numbers<[1], [0], [0], [1], [0, 0, 1, 1], [], []>} : vector<128x16xf32>, vector<16x64xf32>, vector<128x64xf32> -> vector<128x64xf32>
    %c1_36 = arith.constant 1 : index
    %c0_37 = arith.constant 0 : index
    %106 = vector.load %arg4[%c1_36, %c0_37] : memref<2x64xf32, #tpu.memory_space<vmem>>, vector<1x64xf32>
    %107 = vector.broadcast %106 : vector<1x64xf32> to vector<128x64xf32>
    %108 = arith.addf %105, %107 : vector<128x64xf32>
    %109 = vector.extract_strided_slice %108 {offsets = [0, 0], sizes = [128, 8], strides = [1, 1]} : vector<128x64xf32> to vector<128x8xf32>
    %110 = vector.extract_strided_slice %108 {offsets = [0, 8], sizes = [128, 8], strides = [1, 1]} : vector<128x64xf32> to vector<128x8xf32>
    %111 = vector.extract_strided_slice %108 {offsets = [0, 16], sizes = [128, 8], strides = [1, 1]} : vector<128x64xf32> to vector<128x8xf32>
    %112 = vector.extract_strided_slice %108 {offsets = [0, 24], sizes = [128, 8], strides = [1, 1]} : vector<128x64xf32> to vector<128x8xf32>
    %113 = vector.extract_strided_slice %108 {offsets = [0, 32], sizes = [128, 16], strides = [1, 1]} : vector<128x64xf32> to vector<128x16xf32>
    %114 = vector.extract_strided_slice %108 {offsets = [0, 48], sizes = [128, 16], strides = [1, 1]} : vector<128x64xf32> to vector<128x16xf32>
    %cst_38 = arith.constant dense<0.000000e+00> : vector<128x128xf32>
    %115 = tpu.matmul %109, %110, %cst_38 {dimension_numbers = #tpu.dot_dimension_numbers<[1], [1], [0], [0], [0, 0, 1, 0], [], []>} : vector<128x8xf32>, vector<128x8xf32>, vector<128x128xf32> -> vector<128x128xf32>
    %cst_39 = arith.constant dense<0.000000e+00> : vector<128x128xf32>
    %116 = tpu.matmul %111, %112, %cst_39 {dimension_numbers = #tpu.dot_dimension_numbers<[1], [1], [0], [0], [0, 0, 1, 0], [], []>} : vector<128x8xf32>, vector<128x8xf32>, vector<128x128xf32> -> vector<128x128xf32>
    %117 = arith.addf %115, %1 : vector<128x128xf32>
    %cst_40 = arith.constant dense<0xFF800000> : vector<128xf32>
    %118 = vector.multi_reduction <maximumf>, %117, %cst_40 [1] : vector<128x128xf32> to vector<128xf32>
    %119 = vector.shape_cast %118 : vector<128xf32> to vector<128x1xf32>
    %120 = vector.broadcast %119 : vector<128x1xf32> to vector<128x128xf32>
    %121 = arith.subf %117, %120 : vector<128x128xf32>
    %122 = math.exp %121 : vector<128x128xf32>
    %cst_41 = arith.constant dense<0.000000e+00> : vector<128xf32>
    %123 = vector.multi_reduction <add>, %122, %cst_41 [1] : vector<128x128xf32> to vector<128xf32>
    %124 = vector.shape_cast %123 : vector<128xf32> to vector<128x1xf32>
    %125 = vector.broadcast %124 : vector<128x1xf32> to vector<128x128xf32>
    %126 = arith.divf %122, %125 : vector<128x128xf32>
    %127 = arith.addf %116, %1 : vector<128x128xf32>
    %cst_42 = arith.constant dense<0xFF800000> : vector<128xf32>
    %128 = vector.multi_reduction <maximumf>, %127, %cst_42 [1] : vector<128x128xf32> to vector<128xf32>
    %129 = vector.shape_cast %128 : vector<128xf32> to vector<128x1xf32>
    %130 = vector.broadcast %129 : vector<128x1xf32> to vector<128x128xf32>
    %131 = arith.subf %127, %130 : vector<128x128xf32>
    %132 = math.exp %131 : vector<128x128xf32>
    %cst_43 = arith.constant dense<0.000000e+00> : vector<128xf32>
    %133 = vector.multi_reduction <add>, %132, %cst_43 [1] : vector<128x128xf32> to vector<128xf32>
    %134 = vector.shape_cast %133 : vector<128xf32> to vector<128x1xf32>
    %135 = vector.broadcast %134 : vector<128x1xf32> to vector<128x128xf32>
    %136 = arith.divf %132, %135 : vector<128x128xf32>
    %cst_44 = arith.constant dense<0.000000e+00> : vector<128x16xf32>
    %137 = tpu.matmul %126, %113, %cst_44 {dimension_numbers = #tpu.dot_dimension_numbers<[1], [0], [0], [1], [0, 0, 1, 1], [], []>} : vector<128x128xf32>, vector<128x16xf32>, vector<128x16xf32> -> vector<128x16xf32>
    %cst_45 = arith.constant dense<0.000000e+00> : vector<128x16xf32>
    %138 = tpu.matmul %136, %114, %cst_45 {dimension_numbers = #tpu.dot_dimension_numbers<[1], [0], [0], [1], [0, 0, 1, 1], [], []>} : vector<128x128xf32>, vector<128x16xf32>, vector<128x16xf32> -> vector<128x16xf32>
    %139 = arith.addf %137, %138 : vector<128x16xf32>
    %140 = vector.broadcast %7 : vector<1x16xf32> to vector<128x16xf32>
    %141 = arith.addf %139, %140 : vector<128x16xf32>
    %142 = vector.broadcast %4 : vector<1x16xf32> to vector<128x16xf32>
    %143 = arith.mulf %141, %142 : vector<128x16xf32>
    %cst_46 = arith.constant dense<0.000000e+00> : vector<128xf32>
    %144 = vector.multi_reduction <add>, %143, %cst_46 [1] : vector<128x16xf32> to vector<128xf32>
    %145 = vector.shape_cast %144 : vector<128xf32> to vector<128x1xf32>
    %146 = vector.broadcast %5 : vector<1x16xf32> to vector<128x16xf32>
    %147 = arith.mulf %141, %146 : vector<128x16xf32>
    %cst_47 = arith.constant dense<0.000000e+00> : vector<128xf32>
    %148 = vector.multi_reduction <add>, %147, %cst_47 [1] : vector<128x16xf32> to vector<128xf32>
    %149 = vector.shape_cast %148 : vector<128xf32> to vector<128x1xf32>
    %150 = vector.broadcast %145 : vector<128x1xf32> to vector<128x16xf32>
    %151 = vector.broadcast %15 : vector<1x16xf32> to vector<128x16xf32>
    %152 = arith.mulf %150, %151 : vector<128x16xf32>
    %153 = arith.addf %141, %152 : vector<128x16xf32>
    %154 = vector.broadcast %149 : vector<128x1xf32> to vector<128x16xf32>
    %155 = vector.broadcast %17 : vector<1x16xf32> to vector<128x16xf32>
    %156 = arith.mulf %154, %155 : vector<128x16xf32>
    %157 = arith.addf %153, %156 : vector<128x16xf32>
    %158 = vector.broadcast %8 : vector<1x16xf32> to vector<128x16xf32>
    %159 = arith.addf %157, %158 : vector<128x16xf32>
    %160 = vector.shape_cast %159 : vector<128x16xf32> to vector<8x16x16xf32>
    %161 = vector.shape_cast %15 : vector<1x16xf32> to vector<1x1x16xf32>
    %162 = vector.shape_cast %17 : vector<1x16xf32> to vector<1x1x16xf32>
    %163 = vector.broadcast %161 : vector<1x1x16xf32> to vector<8x16x16xf32>
    %164 = arith.mulf %160, %163 : vector<8x16x16xf32>
    %cst_48 = arith.constant dense<0.000000e+00> : vector<8x16xf32>
    %165 = vector.multi_reduction <add>, %164, %cst_48 [2] : vector<8x16x16xf32> to vector<8x16xf32>
    %166 = vector.shape_cast %165 : vector<8x16xf32> to vector<8x16x1xf32>
    %cst_49 = arith.constant dense<0.000000e+00> : vector<8x1xf32>
    %167 = vector.multi_reduction <add>, %166, %cst_49 [1] : vector<8x16x1xf32> to vector<8x1xf32>
    %168 = vector.shape_cast %167 : vector<8x1xf32> to vector<8x1x1xf32>
    %169 = vector.broadcast %162 : vector<1x1x16xf32> to vector<8x16x16xf32>
    %170 = arith.mulf %160, %169 : vector<8x16x16xf32>
    %cst_50 = arith.constant dense<0.000000e+00> : vector<8x16xf32>
    %171 = vector.multi_reduction <add>, %170, %cst_50 [2] : vector<8x16x16xf32> to vector<8x16xf32>
    %172 = vector.shape_cast %171 : vector<8x16xf32> to vector<8x16x1xf32>
    %cst_51 = arith.constant dense<0.000000e+00> : vector<8x1xf32>
    %173 = vector.multi_reduction <add>, %172, %cst_51 [1] : vector<8x16x1xf32> to vector<8x1xf32>
    %174 = vector.shape_cast %173 : vector<8x1xf32> to vector<8x1x1xf32>
    %175 = vector.broadcast %168 : vector<8x1x1xf32> to vector<8x1x16xf32>
    %176 = vector.broadcast %161 : vector<1x1x16xf32> to vector<8x1x16xf32>
    %177 = arith.mulf %175, %176 : vector<8x1x16xf32>
    %178 = vector.broadcast %174 : vector<8x1x1xf32> to vector<8x1x16xf32>
    %179 = vector.broadcast %162 : vector<1x1x16xf32> to vector<8x1x16xf32>
    %180 = arith.mulf %178, %179 : vector<8x1x16xf32>
    %181 = arith.addf %177, %180 : vector<8x1x16xf32>
    %cst_52 = arith.constant 7.812500e-03 : f32
    %182 = vector.broadcast %cst_52 : f32 to vector<8x1x16xf32>
    %183 = arith.mulf %181, %182 : vector<8x1x16xf32>
    %184 = vector.broadcast %183 : vector<8x1x16xf32> to vector<8x16x16xf32>
    %185 = arith.subf %160, %184 : vector<8x16x16xf32>
    %186 = vector.broadcast %161 : vector<1x1x16xf32> to vector<8x16x16xf32>
    %187 = arith.mulf %185, %186 : vector<8x16x16xf32>
    %188 = vector.broadcast %162 : vector<1x1x16xf32> to vector<8x16x16xf32>
    %189 = arith.mulf %185, %188 : vector<8x16x16xf32>
    %190 = arith.mulf %187, %187 : vector<8x16x16xf32>
    %cst_53 = arith.constant dense<0.000000e+00> : vector<8x16xf32>
    %191 = vector.multi_reduction <add>, %190, %cst_53 [2] : vector<8x16x16xf32> to vector<8x16xf32>
    %192 = vector.shape_cast %191 : vector<8x16xf32> to vector<8x16x1xf32>
    %cst_54 = arith.constant dense<0.000000e+00> : vector<8x1xf32>
    %193 = vector.multi_reduction <add>, %192, %cst_54 [1] : vector<8x16x1xf32> to vector<8x1xf32>
    %194 = vector.shape_cast %193 : vector<8x1xf32> to vector<8x1x1xf32>
    %195 = arith.mulf %189, %189 : vector<8x16x16xf32>
    %cst_55 = arith.constant dense<0.000000e+00> : vector<8x16xf32>
    %196 = vector.multi_reduction <add>, %195, %cst_55 [2] : vector<8x16x16xf32> to vector<8x16xf32>
    %197 = vector.shape_cast %196 : vector<8x16xf32> to vector<8x16x1xf32>
    %cst_56 = arith.constant dense<0.000000e+00> : vector<8x1xf32>
    %198 = vector.multi_reduction <add>, %197, %cst_56 [1] : vector<8x16x1xf32> to vector<8x1xf32>
    %199 = vector.shape_cast %198 : vector<8x1xf32> to vector<8x1x1xf32>
    %200 = vector.broadcast %194 : vector<8x1x1xf32> to vector<8x1x16xf32>
    %201 = vector.broadcast %161 : vector<1x1x16xf32> to vector<8x1x16xf32>
    %202 = arith.mulf %200, %201 : vector<8x1x16xf32>
    %203 = vector.broadcast %199 : vector<8x1x1xf32> to vector<8x1x16xf32>
    %204 = vector.broadcast %162 : vector<1x1x16xf32> to vector<8x1x16xf32>
    %205 = arith.mulf %203, %204 : vector<8x1x16xf32>
    %206 = arith.addf %202, %205 : vector<8x1x16xf32>
    %cst_57 = arith.constant 7.812500e-03 : f32
    %207 = vector.broadcast %cst_57 : f32 to vector<8x1x16xf32>
    %208 = arith.mulf %206, %207 : vector<8x1x16xf32>
    %cst_58 = arith.constant 9.99999974E-6 : f32
    %209 = vector.broadcast %cst_58 : f32 to vector<8x1x16xf32>
    %210 = arith.addf %208, %209 : vector<8x1x16xf32>
    %211 = math.rsqrt %210 : vector<8x1x16xf32>
    %212 = vector.broadcast %211 : vector<8x1x16xf32> to vector<8x16x16xf32>
    %213 = arith.mulf %185, %212 : vector<8x16x16xf32>
    %c0_59 = arith.constant 0 : index
    %c0_60 = arith.constant 0 : index
    %c0_61 = arith.constant 0 : index
    %214 = vector.load %arg6[%c0_59, %c0_60, %c0_61] : memref<2x16x16xf32, #tpu.memory_space<vmem>>, vector<1x16x16xf32>
    %215 = vector.shape_cast %214 : vector<1x16x16xf32> to vector<16x16xf32>
    %216 = vector.shape_cast %215 : vector<16x16xf32> to vector<1x16x16xf32>
    %217 = vector.broadcast %216 : vector<1x16x16xf32> to vector<8x16x16xf32>
    %218 = arith.mulf %213, %217 : vector<8x16x16xf32>
    %c1_62 = arith.constant 1 : index
    %c0_63 = arith.constant 0 : index
    %c0_64 = arith.constant 0 : index
    %219 = vector.load %arg6[%c1_62, %c0_63, %c0_64] : memref<2x16x16xf32, #tpu.memory_space<vmem>>, vector<1x16x16xf32>
    %220 = vector.shape_cast %219 : vector<1x16x16xf32> to vector<16x16xf32>
    %221 = vector.shape_cast %220 : vector<16x16xf32> to vector<1x16x16xf32>
    %222 = vector.broadcast %221 : vector<1x16x16xf32> to vector<8x16x16xf32>
    %223 = arith.addf %218, %222 : vector<8x16x16xf32>
    %224 = vector.shape_cast %223 : vector<8x16x16xf32> to vector<128x16xf32>
    %c0_65 = arith.constant 0 : index
    %c0_66 = arith.constant 0 : index
    %225 = vector.load %arg7[%c0_65, %c0_66] : memref<128x16xf32, #tpu.memory_space<vmem>>, vector<128x16xf32>
    tpu.vector_store %arg7[%c0_65, %c0_66], %224 {strides = array<i32>} : memref<128x16xf32, #tpu.memory_space<vmem>>, vector<128x16xf32>,
    return
  }
  func.func @transform_0(%arg0: i32) -> (i32, i32) {
    %c0_i32 = arith.constant 0 : i32
    %c0_i32_0 = arith.constant 0 : i32
    return %arg0, %c0_i32 : i32, i32
  }
  func.func @transform_1(%arg0: i32) -> (i32, i32) {
    %c0_i32 = arith.constant 0 : i32
    %c0_i32_0 = arith.constant 0 : i32
    %c0_i32_1 = arith.constant 0 : i32
    return %c0_i32, %c0_i32_0 : i32, i32
  }
  func.func @transform_2(%arg0: i32) -> (i32, i32, i32) {
    %c0_i32 = arith.constant 0 : i32
    %c0_i32_0 = arith.constant 0 : i32
    %c0_i32_1 = arith.constant 0 : i32
    %c0_i32_2 = arith.constant 0 : i32
    return %c0_i32, %c0_i32_0, %c0_i32_1 : i32, i32, i32
  }
  func.func @transform_3(%arg0: i32) -> (i32, i32) {
    %c0_i32 = arith.constant 0 : i32
    %c0_i32_0 = arith.constant 0 : i32
    %c0_i32_1 = arith.constant 0 : i32
    return %c0_i32, %c0_i32_0 : i32, i32
  }
  func.func @transform_4(%arg0: i32) -> (i32, i32) {
    %c0_i32 = arith.constant 0 : i32
    %c0_i32_0 = arith.constant 0 : i32
    %c0_i32_1 = arith.constant 0 : i32
    return %c0_i32, %c0_i32_0 : i32, i32
  }
  func.func @transform_5(%arg0: i32) -> (i32, i32, i32) {
    %c0_i32 = arith.constant 0 : i32
    %c0_i32_0 = arith.constant 0 : i32
    %c0_i32_1 = arith.constant 0 : i32
    %c0_i32_2 = arith.constant 0 : i32
    return %c0_i32, %c0_i32_0, %c0_i32_1 : i32, i32, i32
  }
  func.func @transform_6(%arg0: i32) -> (i32, i32) {
    %c0_i32 = arith.constant 0 : i32
    %c0_i32_0 = arith.constant 0 : i32
    return %arg0, %c0_i32 : i32, i32
  }
}

</mosaic_0001>

<bundles_post_ra>
// kernel: tpu_custom_call.1
= control target key start
LH: loop header
LB: loop body
LE: loop exit
PB: predicated region body
PF: predicated region fallthrough
CT: control target
= control target key end

     0   :  { %11 = vsyncpa [#allocation3], 0  ;;  %s8398_s0 = inlined_call_operand.vmem [shape: f32[128,16], index: 0, kind: input, shape index: {}]   ;;  %s8399_s1 = inlined_call_operand.vmem [shape: f32[128,128], index: 1, kind: input, shape index: {}]   ;;  %s8400_s2 = inlined_call_operand.hbm [shape: f32[2,16,64], index: 2, kind: input, shape index: {}]   ;;  %s8401_s3 = inlined_call_operand.vmem [shape: f32[2,64], index: 3, kind: input, shape index: {}]   ;;  %s8402_s4 = inlined_call_operand.vmem [shape: f32[8,16], index: 4, kind: input, shape index: {}]   ;;  %s8403_s5 = inlined_call_operand.hbm [shape: f32[2,16,16], index: 5, kind: input, shape index: {}]   ;;  %s8404_s6 = inlined_call_operand.vmem [shape: f32[128,16], index: 6, kind: output, shape index: {}]  }
   0x1   :  { %12 = vsyncpa [#allocation5], 0  ;;  %s5775_s21 = smov [#allocation2]  }
   0x2   :  { %s22_s22 = sshll.u32 %s5775_s21, 4  ;;  %s23_s22 = int_to_ptr.vmem [resolvable:$true] %s22_s22 }
   0x3   :  { %s5739_s23 = scalar_lea.vmem %s23_s22, 512  ;;  %p5744_p1 = scmp.lt.s32.totalorder %s23_s22, %s23_s22 }
   0x4   :  { %p5740_p0 = scmp.ne.s32.totalorder %s23_s22, %s5739_s23  ;;  %p5745_p2 = scmp.lt.s32.totalorder %s5739_s23, %s5739_s23 }
   0x6   :  { %p5746_p3 = por %p5745_p2, %p5744_p1 }
   0x8   :  { %p5747_p4 = pnand %p5746_p3, %p5740_p0 }
   0xa   :  { %5750 = shalt.err (!%p5747_p4)
}
   0xb   :  { %s5776_s24 = smov 128   ;;  %s5777_s25 = smov 8  }
   0xc   :  { %28 = dma.hbm_to_vmem [thread:$0]  %s8400_s2, 512, %s23_s22, [#allocation3], %s5776_s24, %s5776_s24, %s5777_s25  }
   0xd   :  { %s5778_s28 = smov [#allocation4]  }
   0xe   :  { %s38_s29 = sshll.u32 %s5778_s28, 4  ;;  %s39_s29 = int_to_ptr.vmem [resolvable:$true] %s38_s29 }
   0xf   :  { %s5759_s30 = scalar_lea.vmem %s39_s29, 512  ;;  %p5764_p6 = scmp.lt.s32.totalorder %s39_s29, %s39_s29 }
  0x10   :  { %p5760_p5 = scmp.ne.s32.totalorder %s39_s29, %s5759_s30  ;;  %p5765_p7 = scmp.lt.s32.totalorder %s5759_s30, %s5759_s30 }
  0x12   :  { %p5766_p8 = por %p5765_p7, %p5764_p6 }
  0x14   :  { %p5767_p9 = pnand %p5766_p8, %p5760_p5 }
  0x16   :  { %5770 = shalt.err (!%p5767_p9)
}
  0x17   :  { %44 = dma.hbm_to_vmem [thread:$0]  %s8403_s5, 512, %s39_s29, [#allocation5], %s5776_s24, %s5776_s24, %s5777_s25  }
  0x18   :  { %5771 = dma.done.wait [#allocation3], 512  }
  0x19   :  { %5772 = vsyncadd [#allocation3], 4294966784 }
  0x1a   :  { %5773 = dma.done.wait [#allocation5], 512  }
  0x1b   :  { %5774 = vsyncadd [#allocation5], 4294966784  ;;  %vm104_vm0 = vcmask 130048   ;;  %v98_v0 = vld [vmem:[#allocation2 + $0x8] sm:$0xff]  ;;  %v97_v1 = vld [vmem:[#allocation2] sm:$0xff]  ;;  %vm346_vm1 = vcmask 64512  }
  0x1c   :  { %v51_v2 = vld [vmem:[%s8398_s0] sm:$0xff]  ;;  %4849 = vmatprep.subr.mxu0 %v98_v0  ;;  %v52_v3 = vld [vmem:[%s8398_s0 + $0x8] sm:$0xff]  ;;  %v53_v4 = vld [vmem:[%s8398_s0 + $0x10] sm:$0xff]  ;;  %s5779_s15 = smov 120   ;;  %s5780_s16 = smov 104  }
  0x1d   :  { %4853 = vmatprep.mubr.msk.f32.mxu0 %vm104_vm0, %v51_v2  ;;  %4850 = vmatpush3.msra.mxu0 %v98_v0  ;;  %v54_v5 = vld [vmem:[%s8398_s0 + $0x18] sm:$0xff]  ;;  %v55_v6 = vld [vmem:[%s8398_s0 + $0x20] sm:$0xff]  ;;  %v56_v7 = vld [vmem:[%s8398_s0 + $0x28] sm:$0xff]  ;;  %s5781_s17 = smov 112   ;;  %s5782_s18 = smov 96  }
  0x1e   :  { %4851 = vmatprep.subr.mxu0 %v97_v1  ;;  %v57_v8 = vld [vmem:[%s8398_s0 + $0x30] sm:$0xff]  ;;  %v58_v9 = vld [vmem:[%s8398_s0 + $0x38] sm:$0xff]  ;;  %v59_v10 = vld [vmem:[%s8398_s0 + $0x40] sm:$0xff]  ;;  %s5783_s19 = smov 80  }
  0x1f   :  { %4852 = vmatpush3.msra.mxu0 %v97_v1  ;;  %v60_v11 = vld [vmem:[%s8398_s0 + $0x48] sm:$0xff]  ;;  %v61_v12 = vld [vmem:[%s8398_s0 + $0x50] sm:$0xff]  ;;  %v62_v13 = vld [vmem:[%s8398_s0 + $0x58] sm:$0xff] }
  0x20   :  { %4854 = vmatmul.mubr.msk.f32.vlgmr.msra.gmra.mxu0 %vm104_vm0, %v52_v3  ;;  %v63_v14 = vld [vmem:[%s8398_s0 + $0x60] sm:$0xff]  ;;  %v64_v15 = vld [vmem:[%s8398_s0 + $0x68] sm:$0xff]  ;;  %v65_v16 = vld [vmem:[%s8398_s0 + $0x70] sm:$0xff] }
  0x21   :  { %4856 = vmatprep.mubr.msk.f32.mxu0 %vm104_vm0, %v53_v4  ;;  %v66_v17 = vld [vmem:[%s8398_s0 + $0x78] sm:$0xff]  ;;  %v4388_v18 = vld [vmem:[%s8401_s3] ss:$0 sm:$0xff] }
  0x24   :  { %4857 = vmatmul.mubr.msk.f32.gmra.mxu0 %vm104_vm0, %v54_v5 }
  0x25   :  { %4859 = vmatprep.mubr.msk.f32.mxu0 %vm104_vm0, %v55_v6 }
  0x28   :  { %4860 = vmatmul.mubr.msk.f32.gmra.mxu0 %vm104_vm0, %v56_v7 }
  0x29   :  { %4862 = vmatprep.mubr.msk.f32.mxu0 %vm104_vm0, %v57_v8 }
  0x2c   :  { %4863 = vmatmul.mubr.msk.f32.gmra.mxu0 %vm104_vm0, %v58_v9 }
  0x2d   :  { %4865 = vmatprep.mubr.msk.f32.mxu0 %vm104_vm0, %v59_v10 }
  0x30   :  { %4866 = vmatmul.mubr.msk.f32.gmra.mxu0 %vm104_vm0, %v60_v11 }
  0x31   :  { %4868 = vmatprep.mubr.msk.f32.mxu0 %vm104_vm0, %v61_v12 }
  0x34   :  { %4869 = vmatmul.mubr.msk.f32.gmra.mxu0 %vm104_vm0, %v62_v13 }
  0x35   :  { %4871 = vmatprep.mubr.msk.f32.mxu0 %vm104_vm0, %v63_v14 }
  0x38   :  { %4872 = vmatmul.mubr.msk.f32.gmra.mxu0 %vm104_vm0, %v64_v15 }
  0x39   :  { %4874 = vmatprep.mubr.msk.f32.mxu0 %vm104_vm0, %v65_v16 }
  0x3c   :  { %4875 = vmatmul.mubr.msk.f32.gmra.mxu0 %vm104_vm0, %v66_v17 }
  0xe0   :  { %v4855_v19 = vpop.f32.mrf.mxu0 }
  0xe1   :  { %v5893_v20 = vadd.f32 %v4855_v19, %v4388_v18 }
  0xe2   :  { %v219_v21 = vpop.f32.mrf.mxu0 }
  0xe3   :  { %v5895_v22 = vadd.f32 %v4388_v18, %v219_v21 }
  0xe4   :  { %v4858_v23 = vpop.f32.mrf.mxu0 }
  0xe5   :  { %v5897_v24 = vadd.f32 %v4858_v23, %v4388_v18  ;;  %4909 = vmatprep.mubr.msk.f32.mxu1 %vm346_vm1, %v5895_v22 }
  0xe6   :  { %v229_v25 = vpop.f32.mrf.mxu0 }
  0xe7   :  { %v5901_v26 = vadd.f32 %v4388_v18, %v229_v25 }
  0xe8   :  { %v4861_v27 = vpop.f32.mrf.mxu0 }
  0xe9   :  { %v5961_v49 = vadd.f32 %v4861_v27, %v4388_v18 }
  0xea   :  { %v239_v28 = vpop.f32.mrf.mxu0 }
  0xeb   :  { %v5967_v50 = vadd.f32 %v4388_v18, %v239_v28 }
  0xec   :  { %v4864_v29 = vpop.f32.mrf.mxu0 }
  0xed   :  { %v5949_v47 = vadd.f32 %v4864_v29, %v4388_v18 }
  0xee   :  { %v249_v30 = vpop.f32.mrf.mxu0 }
  0xef   :  { %v5955_v48 = vadd.f32 %v4388_v18, %v249_v30 }
  0xf0   :  { %v4867_v31 = vpop.f32.mrf.mxu0 }
  0xf1   :  { %v5937_v45 = vadd.f32 %v4867_v31, %v4388_v18 }
  0xf2   :  { %v259_v32 = vpop.f32.mrf.mxu0 }
  0xf3   :  { %v5943_v46 = vadd.f32 %v4388_v18, %v259_v32 }
  0xf4   :  { %v4870_v33 = vpop.f32.mrf.mxu0 }
  0xf5   :  { %v5925_v43 = vadd.f32 %v4870_v33, %v4388_v18 }
  0xf6   :  { %v269_v34 = vpop.f32.mrf.mxu0 }
  0xf7   :  { %v5931_v44 = vadd.f32 %v4388_v18, %v269_v34 }
  0xf8   :  { %v4873_v35 = vpop.f32.mrf.mxu0 }
  0xf9   :  { %v5913_v41 = vadd.f32 %v4873_v35, %v4388_v18 }
  0xfa   :  { %v279_v36 = vpop.f32.mrf.mxu0 }
  0xfb   :  { %v5919_v42 = vadd.f32 %v4388_v18, %v279_v36 }
  0xfc   :  { %v4876_v37 = vpop.f32.mrf.mxu0 }
  0xfd   :  { %v5903_v38 = vadd.f32 %v4876_v37, %v4388_v18 }
  0xfe   :  { %v289_v39 = vpop.f32.mrf.mxu0 }
  0xff   :  { %v5905_v40 = vadd.f32 %v4388_v18, %v289_v39  ;;  %344 = vrot.lane.b32.xlu0 %v5903_v38, %s5779_s15 }
 0x101   :  { %342 = vrot.lane.b32.xlu1 %v5905_v40, %s5779_s15 }
 0x103   :  { %762 = vrot.lane.b32.xlu0 %v5903_v38, %s5780_s16 }
 0x105   :  { %760 = vrot.lane.b32.xlu1 %v5905_v40, %s5780_s16 }
 0x107   :  { %340 = vrot.lane.b32.xlu0 %v5913_v41, %s5779_s15 }
 0x109   :  { %758 = vrot.lane.b32.xlu1 %v5913_v41, %s5780_s16 }
 0x10b   :  { %338 = vrot.lane.b32.xlu0 %v5919_v42, %s5779_s15 }
 0x10d   :  { %756 = vrot.lane.b32.xlu1 %v5919_v42, %s5780_s16 }
 0x10f   :  { %336 = vrot.lane.b32.xlu0 %v5925_v43, %s5779_s15 }
 0x111   :  { %754 = vrot.lane.b32.xlu1 %v5925_v43, %s5780_s16 }
 0x113   :  { %334 = vrot.lane.b32.xlu0 %v5931_v44, %s5779_s15 }
 0x115   :  { %752 = vrot.lane.b32.xlu1 %v5931_v44, %s5780_s16 }
 0x117   :  { %332 = vrot.lane.b32.xlu0 %v5937_v45, %s5779_s15 }
 0x119   :  { %750 = vrot.lane.b32.xlu1 %v5937_v45, %s5780_s16 }
 0x11b   :  { %330 = vrot.lane.b32.xlu0 %v5943_v46, %s5779_s15 }
 0x11d   :  { %748 = vrot.lane.b32.xlu1 %v5943_v46, %s5780_s16 }
 0x11f   :  { %328 = vrot.lane.b32.xlu0 %v5949_v47, %s5779_s15 }
 0x121   :  { %746 = vrot.lane.b32.xlu1 %v5949_v47, %s5780_s16 }
 0x123   :  { %326 = vrot.lane.b32.xlu0 %v5955_v48, %s5779_s15 }
 0x125   :  { %744 = vrot.lane.b32.xlu1 %v5955_v48, %s5780_s16 }
 0x127   :  { %324 = vrot.lane.b32.xlu0 %v5961_v49, %s5779_s15 }
 0x129   :  { %742 = vrot.lane.b32.xlu1 %v5961_v49, %s5780_s16 }
 0x12b   :  { %322 = vrot.lane.b32.xlu0 %v5967_v50, %s5779_s15 }
 0x12d   :  { %740 = vrot.lane.b32.xlu1 %v5967_v50, %s5780_s16 }
 0x12f   :  { %320 = vrot.lane.b32.xlu0 %v5897_v24, %s5779_s15 }
 0x131   :  { %738 = vrot.lane.b32.xlu1 %v5897_v24, %s5780_s16 }
 0x133   :  { %318 = vrot.lane.b32.xlu0 %v5901_v26, %s5779_s15 }
 0x135   :  { %736 = vrot.lane.b32.xlu1 %v5901_v26, %s5780_s16 }
 0x137   :  { %316 = vrot.lane.b32.xlu0 %v5893_v20, %s5779_s15 }
 0x139   :  { %734 = vrot.lane.b32.xlu1 %v5893_v20, %s5780_s16 }
 0x13b   :  { %314 = vrot.lane.b32.xlu0 %v5895_v22, %s5779_s15 }
 0x13d   :  { %732 = vrot.lane.b32.xlu1 %v5895_v22, %s5780_s16 }
 0x13f   :  { %700 = vrot.lane.b32.xlu0 %v5895_v22, %s5781_s17 }
 0x141   :  { %702 = vrot.lane.b32.xlu1 %v5893_v20, %s5781_s17 }
 0x143   :  { %704 = vrot.lane.b32.xlu0 %v5901_v26, %s5781_s17 }
 0x145   :  { %706 = vrot.lane.b32.xlu1 %v5897_v24, %s5781_s17 }
 0x147   :  { %708 = vrot.lane.b32.xlu0 %v5967_v50, %s5781_s17 }
 0x149   :  { %710 = vrot.lane.b32.xlu1 %v5961_v49, %s5781_s17 }
 0x14b   :  { %712 = vrot.lane.b32.xlu0 %v5955_v48, %s5781_s17 }
 0x14d   :  { %714 = vrot.lane.b32.xlu1 %v5949_v47, %s5781_s17 }
 0x14f   :  { %716 = vrot.lane.b32.xlu0 %v5943_v46, %s5781_s17 }
 0x151   :  { %718 = vrot.lane.b32.xlu1 %v5937_v45, %s5781_s17 }
 0x153   :  { %720 = vrot.lane.b32.xlu0 %v5931_v44, %s5781_s17 }
 0x155   :  { %722 = vrot.lane.b32.xlu1 %v5925_v43, %s5781_s17 }
 0x157   :  { %724 = vrot.lane.b32.xlu0 %v5919_v42, %s5781_s17 }
 0x159   :  { %726 = vrot.lane.b32.xlu1 %v5913_v41, %s5781_s17 }
 0x15b   :  { %728 = vrot.lane.b32.xlu0 %v5905_v40, %s5781_s17 }
 0x15d   :  { %730 = vrot.lane.b32.xlu1 %v5903_v38, %s5781_s17 }
 0x15f   :  { %1340 = vrot.lane.b32.xlu0 %v5903_v38, %s5782_s18 }
 0x161   :  { %1147 = vrot.lane.b32.xlu1 %v5903_v38, %s5783_s19 }
 0x163   :  { %1336 = vrot.lane.b32.xlu0 %v5913_v41, %s5782_s18 }
 0x165   :  { %1143 = vrot.lane.b32.xlu1 %v5913_v41, %s5783_s19 }
 0x167   :  { %1332 = vrot.lane.b32.xlu0 %v5925_v43, %s5782_s18 }
 0x169   :  { %1141 = vrot.lane.b32.xlu1 %v5919_v42, %s5783_s19 }
 0x16b   :  { %1328 = vrot.lane.b32.xlu0 %v5937_v45, %s5782_s18 }
 0x16d   :  { %1334 = vrot.lane.b32.xlu1 %v5919_v42, %s5782_s18 }
 0x16f   :  { %1324 = vrot.lane.b32.xlu0 %v5949_v47, %s5782_s18 }
 0x171   :  { %v345_v51 = vpop.permute.xlu0 %344  ;;  %1139 = vrot.lane.b32.xlu1 %v5925_v43, %s5783_s19 }
 0x172   :  { %4877 = vmatprep.subr.msk.mxu1 %vm346_vm1, %v345_v51 }
 0x173   :  { %4878 = vmatpush3.xpose.msk.msra.mxu1 %vm346_vm1, %v345_v51  ;;  %v343_v52 = vpop.permute.xlu1 %342  ;;  %1320 = vrot.lane.b32.xlu0 %v5961_v49, %s5782_s18 }
 0x174   :  { %4879 = vmatprep.subr.msk.mxu1 %vm346_vm1, %v343_v52 }
 0x175   :  { %v763_v53 = vpop.permute.xlu0 %762  ;;  %1137 = vrot.lane.b32.xlu1 %v5931_v44, %s5783_s19 }
 0x176   :  { %4933 = vmatprep.subr.msk.mxu0 %vm346_vm1, %v763_v53 }
 0x177   :  { %4880 = vmatpush3.xpose.msk.msra.mxu1 %vm346_vm1, %v343_v52  ;;  %4934 = vmatpush3.xpose.msk.msra.mxu0 %vm346_vm1, %v763_v53  ;;  %v761_v54 = vpop.permute.xlu1 %760 }
 0x178   :  { %1316 = vrot.lane.b32.xlu0 %v5897_v24, %s5782_s18  ;;  %4935 = vmatprep.subr.msk.mxu0 %vm346_vm1, %v761_v54 }
 0x179   :  { %v341_v55 = vpop.permute.xlu0 %340  ;;  %1330 = vrot.lane.b32.xlu1 %v5931_v44, %s5782_s18 }
 0x17a   :  { %4881 = vmatprep.subr.msk.mxu1 %vm346_vm1, %v341_v55 }
 0x17b   :  { %4882 = vmatpush3.xpose.msk.msra.mxu1 %vm346_vm1, %v341_v55  ;;  %4936 = vmatpush3.xpose.msk.msra.mxu0 %vm346_vm1, %v761_v54  ;;  %v759_v56 = vpop.permute.xlu1 %758 }
 0x17c   :  { %4937 = vmatprep.subr.msk.mxu0 %vm346_vm1, %v759_v56 }
 0x17d   :  { %v339_v57 = vpop.permute.xlu0 %338  ;;  %1135 = vrot.lane.b32.xlu1 %v5937_v45, %s5783_s19 }
 0x17e   :  { %4883 = vmatprep.subr.msk.mxu1 %vm346_vm1, %v339_v57 }
 0x17f   :  { %4938 = vmatpush3.xpose.msk.msra.mxu0 %vm346_vm1, %v759_v56  ;;  %v757_v58 = vpop.permute.xlu1 %756  ;;  %4884 = vmatpush3.xpose.msk.msra.mxu1 %vm346_vm1, %v339_v57 }
 0x180   :  { %4939 = vmatprep.subr.msk.mxu0 %vm346_vm1, %v757_v58 }
 0x181   :  { %v337_v59 = vpop.permute.xlu0 %336  ;;  %1133 = vrot.lane.b32.xlu1 %v5943_v46, %s5783_s19 }
 0x182   :  { %4885 = vmatprep.subr.msk.mxu1 %vm346_vm1, %v337_v59 }
 0x183   :  { %4940 = vmatpush3.xpose.msk.msra.mxu0 %vm346_vm1, %v757_v58  ;;  %v755_v60 = vpop.permute.xlu1 %754  ;;  %4886 = vmatpush3.xpose.msk.msra.mxu1 %vm346_vm1, %v337_v59 }
 0x184   :  { %4941 = vmatprep.subr.msk.mxu0 %vm346_vm1, %v755_v60 }
 0x185   :  { %v335_v61 = vpop.permute.xlu0 %334  ;;  %1326 = vrot.lane.b32.xlu1 %v5943_v46, %s5782_s18 }
 0x186   :  { %4887 = vmatprep.subr.msk.mxu1 %vm346_vm1, %v335_v61 }
 0x187   :  { %4942 = vmatpush3.xpose.msk.msra.mxu0 %vm346_vm1, %v755_v60  ;;  %v753_v62 = vpop.permute.xlu1 %752  ;;  %4888 = vmatpush3.xpose.msk.msra.mxu1 %vm346_vm1, %v335_v61 }
 0x188   :  { %4943 = vmatprep.subr.msk.mxu0 %vm346_vm1, %v753_v62 }
 0x189   :  { %v333_v63 = vpop.permute.xlu0 %332  ;;  %1131 = vrot.lane.b32.xlu1 %v5949_v47, %s5783_s19 }
 0x18a   :  { %4889 = vmatprep.subr.msk.mxu1 %vm346_vm1, %v333_v63 }
 0x18b   :  { %4944 = vmatpush3.xpose.msk.msra.mxu0 %vm346_vm1, %v753_v62  ;;  %v751_v0 = vpop.permute.xlu1 %750  ;;  %4890 = vmatpush3.xpose.msk.msra.mxu1 %vm346_vm1, %v333_v63 }
 0x18c   :  { %4945 = vmatprep.subr.msk.mxu0 %vm346_vm1, %v751_v0 }
 0x18d   :  { %v331_v1 = vpop.permute.xlu0 %330  ;;  %1129 = vrot.lane.b32.xlu1 %v5955_v48, %s5783_s19 }
 0x18e   :  { %4891 = vmatprep.subr.msk.mxu1 %vm346_vm1, %v331_v1 }
 0x18f   :  { %4946 = vmatpush3.xpose.msk.msra.mxu0 %vm346_vm1, %v751_v0  ;;  %v749_v2 = vpop.permute.xlu1 %748  ;;  %4892 = vmatpush3.xpose.msk.msra.mxu1 %vm346_vm1, %v331_v1  ;;  %v68_v1 = vld [vmem:[%s8399_s1 + $0x8] sm:$0xff] }
 0x190   :  { %4947 = vmatprep.subr.msk.mxu0 %vm346_vm1, %v749_v2 }
 0x191   :  { %v329_v3 = vpop.permute.xlu0 %328  ;;  %1322 = vrot.lane.b32.xlu1 %v5955_v48, %s5782_s18 }
 0x192   :  { %4893 = vmatprep.subr.msk.mxu1 %vm346_vm1, %v329_v3 }
 0x193   :  { %4948 = vmatpush3.xpose.msk.msra.mxu0 %vm346_vm1, %v749_v2  ;;  %v747_v4 = vpop.permute.xlu1 %746  ;;  %4894 = vmatpush3.xpose.msk.msra.mxu1 %vm346_vm1, %v329_v3 }
 0x194   :  { %4949 = vmatprep.subr.msk.mxu0 %vm346_vm1, %v747_v4 }
 0x195   :  { %v327_v5 = vpop.permute.xlu0 %326  ;;  %1127 = vrot.lane.b32.xlu1 %v5961_v49, %s5783_s19 }
 0x196   :  { %4895 = vmatprep.subr.msk.mxu1 %vm346_vm1, %v327_v5 }
 0x197   :  { %4950 = vmatpush3.xpose.msk.msra.mxu0 %vm346_vm1, %v747_v4  ;;  %v745_v6 = vpop.permute.xlu1 %744  ;;  %4896 = vmatpush3.xpose.msk.msra.mxu1 %vm346_vm1, %v327_v5 }
 0x198   :  { %4951 = vmatprep.subr.msk.mxu0 %vm346_vm1, %v745_v6 }
 0x199   :  { %v325_v7 = vpop.permute.xlu0 %324  ;;  %1145 = vrot.lane.b32.xlu1 %v5905_v40, %s5783_s19 }
 0x19a   :  { %4897 = vmatprep.subr.msk.mxu1 %vm346_vm1, %v325_v7 }
 0x19b   :  { %4952 = vmatpush3.xpose.msk.msra.mxu0 %vm346_vm1, %v745_v6  ;;  %v743_v8 = vpop.permute.xlu1 %742  ;;  %4898 = vmatpush3.xpose.msk.msra.mxu1 %vm346_vm1, %v325_v7  ;;  %v67_v7 = vld [vmem:[%s8399_s1] sm:$0xff] }
 0x19c   :  { %4953 = vmatprep.subr.msk.mxu0 %vm346_vm1, %v743_v8 }
 0x19d   :  { %v323_v9 = vpop.permute.xlu0 %322  ;;  %1338 = vrot.lane.b32.xlu1 %v5905_v40, %s5782_s18 }
 0x19e   :  { %4899 = vmatprep.subr.msk.mxu1 %vm346_vm1, %v323_v9 }
 0x19f   :  { %4954 = vmatpush3.xpose.msk.msra.mxu0 %vm346_vm1, %v743_v8  ;;  %v741_v10 = vpop.permute.xlu1 %740  ;;  %4900 = vmatpush3.xpose.msk.msra.mxu1 %vm346_vm1, %v323_v9 }
 0x1a0   :  { %4955 = vmatprep.subr.msk.mxu0 %vm346_vm1, %v741_v10 }
 0x1a1   :  { %v321_v11 = vpop.permute.xlu0 %320  ;;  %1125 = vrot.lane.b32.xlu1 %v5967_v50, %s5783_s19 }
 0x1a2   :  { %4901 = vmatprep.subr.msk.mxu1 %vm346_vm1, %v321_v11 }
 0x1a3   :  { %4956 = vmatpush3.xpose.msk.msra.mxu0 %vm346_vm1, %v741_v10  ;;  %v739_v12 = vpop.permute.xlu1 %738  ;;  %4902 = vmatpush3.xpose.msk.msra.mxu1 %vm346_vm1, %v321_v11  ;;  %v70_v10 = vld [vmem:[%s8399_s1 + $0x18] sm:$0xff] }
 0x1a4   :  { %4957 = vmatprep.subr.msk.mxu0 %vm346_vm1, %v739_v12 }
 0x1a5   :  { %v319_v13 = vpop.permute.xlu0 %318  ;;  %1318 = vrot.lane.b32.xlu1 %v5967_v50, %s5782_s18 }
 0x1a6   :  { %4903 = vmatprep.subr.msk.mxu1 %vm346_vm1, %v319_v13 }
 0x1a7   :  { %4958 = vmatpush3.xpose.msk.msra.mxu0 %vm346_vm1, %v739_v12  ;;  %v737_v14 = vpop.permute.xlu1 %736  ;;  %4904 = vmatpush3.xpose.msk.msra.mxu1 %vm346_vm1, %v319_v13 }
 0x1a8   :  { %4959 = vmatprep.subr.msk.mxu0 %vm346_vm1, %v737_v14 }
 0x1a9   :  { %v317_v15 = vpop.permute.xlu0 %316  ;;  %1123 = vrot.lane.b32.xlu1 %v5897_v24, %s5783_s19 }
 0x1aa   :  { %4905 = vmatprep.subr.msk.mxu1 %vm346_vm1, %v317_v15 }
 0x1ab   :  { %4960 = vmatpush3.xpose.msk.msra.mxu0 %vm346_vm1, %v737_v14  ;;  %v735_v16 = vpop.permute.xlu1 %734  ;;  %4906 = vmatpush3.xpose.msk.msra.mxu1 %vm346_vm1, %v317_v15 }
 0x1ac   :  { %4961 = vmatprep.subr.msk.mxu0 %vm346_vm1, %v735_v16 }
 0x1ad   :  { %1121 = vrot.lane.b32.xlu1 %v5901_v26, %s5783_s19  ;;  %v315_v17 = vpop.permute.xlu0 %314 }
 0x1ae   :  { %4907 = vmatprep.subr.msk.mxu1 %vm346_vm1, %v315_v17 }
 0x1af   :  { %4962 = vmatpush3.xpose.msk.msra.mxu0 %vm346_vm1, %v735_v16  ;;  %v733_v18 = vpop.permute.xlu1 %732  ;;  %4908 = vmatpush3.xpose.msk.msra.mxu1 %vm346_vm1, %v315_v17  ;;  %v69_v16 = vld [vmem:[%s8399_s1 + $0x10] sm:$0xff] }
 0x1b0   :  { %4963 = vmatprep.subr.msk.mxu0 %vm346_vm1, %v733_v18 }
 0x1b1   :  { %1314 = vrot.lane.b32.xlu1 %v5901_v26, %s5782_s18  ;;  %v701_v19 = vpop.permute.xlu0 %700 }
 0x1b2   :  { %4910 = vmatmul.mubr.msk.f32.vlgmr.msra.gmra.mxu1 %vm346_vm1, %v5893_v20  ;;  %4965 = vmatprep.mubr.msk.f32.mxu0 %vm346_vm1, %v701_v19 }
 0x1b3   :  { %4964 = vmatpush3.xpose.msk.msra.mxu0 %vm346_vm1, %v733_v18  ;;  %v703_v21 = vpop.permute.xlu1 %702  ;;  %4912 = vmatprep.mubr.msk.f32.mxu1 %vm346_vm1, %v5901_v26 }
 0x1b5   :  { %v705_v23 = vpop.permute.xlu0 %704 }
 0x1b6   :  { %4913 = vmatmul.mubr.msk.f32.gmra.mxu1 %vm346_vm1, %v5897_v24  ;;  %4966 = vmatmul.mubr.msk.f32.vlgmr.msra.gmra.mxu0 %vm346_vm1, %v703_v21  ;;  %v72_v21 = vld [vmem:[%s8399_s1 + $0x28] sm:$0xff] }
 0x1b7   :  { %v707_v25 = vpop.permute.xlu1 %706  ;;  %4915 = vmatprep.mubr.msk.f32.mxu1 %vm346_vm1, %v5967_v50  ;;  %4968 = vmatprep.mubr.msk.f32.mxu0 %vm346_vm1, %v705_v23 }
 0x1b9   :  { %v709_v27 = vpop.permute.xlu0 %708 }
 0x1ba   :  { %4916 = vmatmul.mubr.msk.f32.gmra.mxu1 %vm346_vm1, %v5961_v49  ;;  %4969 = vmatmul.mubr.msk.f32.gmra.mxu0 %vm346_vm1, %v707_v25 }
 0x1bb   :  { %v711_v28 = vpop.permute.xlu1 %710  ;;  %4918 = vmatprep.mubr.msk.f32.mxu1 %vm346_vm1, %v5955_v48  ;;  %4971 = vmatprep.mubr.msk.f32.mxu0 %vm346_vm1, %v709_v27 }
 0x1bd   :  { %v713_v24 = vpop.permute.xlu0 %712 }
 0x1be   :  { %4919 = vmatmul.mubr.msk.f32.gmra.mxu1 %vm346_vm1, %v5949_v47  ;;  %4972 = vmatmul.mubr.msk.f32.gmra.mxu0 %vm346_vm1, %v711_v28 }
 0x1bf   :  { %v715_v26 = vpop.permute.xlu1 %714  ;;  %4921 = vmatprep.mubr.msk.f32.mxu1 %vm346_vm1, %v5943_v46  ;;  %4974 = vmatprep.mubr.msk.f32.mxu0 %vm346_vm1, %v713_v24 }
 0x1c1   :  { %v717_v29 = vpop.permute.xlu0 %716 }
 0x1c2   :  { %4922 = vmatmul.mubr.msk.f32.gmra.mxu1 %vm346_vm1, %v5937_v45  ;;  %4975 = vmatmul.mubr.msk.f32.gmra.mxu0 %vm346_vm1, %v715_v26  ;;  %v71_v26 = vld [vmem:[%s8399_s1 + $0x20] sm:$0xff] }
 0x1c3   :  { %v719_v30 = vpop.permute.xlu1 %718  ;;  %4924 = vmatprep.mubr.msk.f32.mxu1 %vm346_vm1, %v5931_v44  ;;  %4977 = vmatprep.mubr.msk.f32.mxu0 %vm346_vm1, %v717_v29 }
 0x1c5   :  { %v721_v31 = vpop.permute.xlu0 %720 }
 0x1c6   :  { %4925 = vmatmul.mubr.msk.f32.gmra.mxu1 %vm346_vm1, %v5925_v43  ;;  %4978 = vmatmul.mubr.msk.f32.gmra.mxu0 %vm346_vm1, %v719_v30 }
 0x1c7   :  { %v723_v32 = vpop.permute.xlu1 %722  ;;  %4927 = vmatprep.mubr.msk.f32.mxu1 %vm346_vm1, %v5919_v42  ;;  %4980 = vmatprep.mubr.msk.f32.mxu0 %vm346_vm1, %v721_v31 }
 0x1c9   :  { %v725_v33 = vpop.permute.xlu0 %724 }
 0x1ca   :  { %4928 = vmatmul.mubr.msk.f32.gmra.mxu1 %vm346_vm1, %v5913_v41  ;;  %4981 = vmatmul.mubr.msk.f32.gmra.mxu0 %vm346_vm1, %v723_v32  ;;  %v74_v32 = vld [vmem:[%s8399_s1 + $0x38] sm:$0xff] }
 0x1cb   :  { %v727_v34 = vpop.permute.xlu1 %726  ;;  %4930 = vmatprep.mubr.msk.f32.mxu1 %vm346_vm1, %v5905_v40  ;;  %4983 = vmatprep.mubr.msk.f32.mxu0 %vm346_vm1, %v725_v33 }
 0x1cd   :  { %v729_v35 = vpop.permute.xlu0 %728 }
 0x1ce   :  { %4931 = vmatmul.mubr.msk.f32.gmra.mxu1 %vm346_vm1, %v5903_v38  ;;  %4984 = vmatmul.mubr.msk.f32.gmra.mxu0 %vm346_vm1, %v727_v34 }
 0x1cf   :  { %v731_v36 = vpop.permute.xlu1 %730  ;;  %4986 = vmatprep.mubr.msk.f32.mxu0 %vm346_vm1, %v729_v35 }
 0x1d1   :  { %v1341_v37 = vpop.permute.xlu0 %1340 }
 0x1d2   :  { %4987 = vmatmul.mubr.msk.f32.gmra.mxu0 %vm346_vm1, %v731_v36  ;;  %5045 = vmatprep.subr.mxu0 %v1341_v37 }
 0x1d3   :  { %v1148_v39 = vpop.permute.xlu1 %1147  ;;  %5046 = vmatpush3.msra.mxu0 %v1341_v37 }
 0x1d4   :  { %4989 = vmatprep.subr.mxu1 %v1148_v39 }
 0x1d5   :  { %4990 = vmatpush3.msra.mxu1 %v1148_v39  ;;  %v1337_v51 = vpop.permute.xlu0 %1336  ;;  %v73_v39 = vld [vmem:[%s8399_s1 + $0x30] sm:$0xff] }
 0x1d7   :  { %v1144_v40 = vpop.permute.xlu1 %1143 }
 0x1d9   :  { %v1333_v54 = vpop.permute.xlu0 %1332 }
 0x1db   :  { %v1142_v41 = vpop.permute.xlu1 %1141 }
 0x1dd   :  { %v1329_v56 = vpop.permute.xlu0 %1328 }
 0x1df   :  { %v1335_v42 = vpop.permute.xlu1 %1334 }
 0x1e1   :  { %v1325_v59 = vpop.permute.xlu0 %1324 }
 0x1e3   :  { %v1140_v43 = vpop.permute.xlu1 %1139 }
 0x1e5   :  { %v1321_v61 = vpop.permute.xlu0 %1320 }
 0x1e7   :  { %v1138_v44 = vpop.permute.xlu1 %1137 }
 0x1ea   :  { %v1317_v63 = vpop.permute.xlu0 %1316 }
 0x1eb   :  { %v1331_v45 = vpop.permute.xlu1 %1330 }
 0x1ef   :  { %v1136_v38 = vpop.permute.xlu1 %1135 }
 0x1f3   :  { %v1134_v46 = vpop.permute.xlu1 %1133 }
 0x1f7   :  { %v1327_v47 = vpop.permute.xlu1 %1326 }
 0x1fb   :  { %v1132_v48 = vpop.permute.xlu1 %1131 }
 0x1ff   :  { %v1130_v49 = vpop.permute.xlu1 %1129 }
 0x203   :  { %v1323_v50 = vpop.permute.xlu1 %1322 }
 0x207   :  { %v1128_v52 = vpop.permute.xlu1 %1127 }
 0x20b   :  { %v1146_v53 = vpop.permute.xlu1 %1145 }
 0x20c   :  { %4991 = vmatprep.subr.mxu1 %v1146_v53 }
 0x20d   :  { %4992 = vmatpush3.msra.mxu1 %v1146_v53 }
 0x20e   :  { %4993 = vmatprep.subr.mxu1 %v1144_v40 }
 0x20f   :  { %v1339_v55 = vpop.permute.xlu1 %1338  ;;  %4994 = vmatpush3.msra.mxu1 %v1144_v40 }
 0x210   :  { %4995 = vmatprep.subr.mxu1 %v1142_v41  ;;  %5047 = vmatprep.subr.mxu0 %v1339_v55 }
 0x211   :  { %4996 = vmatpush3.msra.mxu1 %v1142_v41  ;;  %5048 = vmatpush3.msra.mxu0 %v1339_v55 }
 0x212   :  { %4997 = vmatprep.subr.mxu1 %v1140_v43  ;;  %5049 = vmatprep.subr.mxu0 %v1337_v51 }
 0x213   :  { %v1126_v57 = vpop.permute.xlu1 %1125  ;;  %4998 = vmatpush3.msra.mxu1 %v1140_v43  ;;  %5050 = vmatpush3.msra.mxu0 %v1337_v51  ;;  %v76_v43 = vld [vmem:[%s8399_s1 + $0x48] sm:$0xff] }
 0x214   :  { %4999 = vmatprep.subr.mxu1 %v1138_v44  ;;  %5051 = vmatprep.subr.mxu0 %v1335_v42 }
 0x215   :  { %5000 = vmatpush3.msra.mxu1 %v1138_v44  ;;  %5052 = vmatpush3.msra.mxu0 %v1335_v42 }
 0x216   :  { %5001 = vmatprep.subr.mxu1 %v1136_v38  ;;  %5053 = vmatprep.subr.mxu0 %v1333_v54 }
 0x217   :  { %v1319_v58 = vpop.permute.xlu1 %1318  ;;  %5002 = vmatpush3.msra.mxu1 %v1136_v38  ;;  %5054 = vmatpush3.msra.mxu0 %v1333_v54 }
 0x218   :  { %5003 = vmatprep.subr.mxu1 %v1134_v46  ;;  %5055 = vmatprep.subr.mxu0 %v1331_v45 }
 0x219   :  { %5004 = vmatpush3.msra.mxu1 %v1134_v46  ;;  %5056 = vmatpush3.msra.mxu0 %v1331_v45 }
 0x21a   :  { %5005 = vmatprep.subr.mxu1 %v1132_v48  ;;  %5057 = vmatprep.subr.mxu0 %v1329_v56 }
 0x21b   :  { %v1124_v60 = vpop.permute.xlu1 %1123  ;;  %5006 = vmatpush3.msra.mxu1 %v1132_v48  ;;  %5058 = vmatpush3.msra.mxu0 %v1329_v56  ;;  %v75_v48 = vld [vmem:[%s8399_s1 + $0x40] sm:$0xff] }
 0x21c   :  { %5007 = vmatprep.subr.mxu1 %v1130_v49  ;;  %5059 = vmatprep.subr.mxu0 %v1327_v47 }
 0x21d   :  { %5008 = vmatpush3.msra.mxu1 %v1130_v49  ;;  %5060 = vmatpush3.msra.mxu0 %v1327_v47 }
 0x21e   :  { %5009 = vmatprep.subr.mxu1 %v1128_v52  ;;  %5061 = vmatprep.subr.mxu0 %v1325_v59 }
 0x21f   :  { %5010 = vmatpush3.msra.mxu1 %v1128_v52  ;;  %5062 = vmatpush3.msra.mxu0 %v1325_v59  ;;  %v1122_v62 = vpop.permute.xlu1 %1121  ;;  %v78_v52 = vld [vmem:[%s8399_s1 + $0x58] sm:$0xff] }
 0x220   :  { %5011 = vmatprep.subr.mxu1 %v1126_v57  ;;  %5063 = vmatprep.subr.mxu0 %v1323_v50 }
 0x221   :  { %5012 = vmatpush3.msra.mxu1 %v1126_v57  ;;  %5064 = vmatpush3.msra.mxu0 %v1323_v50 }
 0x222   :  { %5013 = vmatprep.subr.mxu1 %v1124_v60  ;;  %5065 = vmatprep.subr.mxu0 %v1321_v61 }
 0x223   :  { %5014 = vmatpush3.msra.mxu1 %v1124_v60  ;;  %5066 = vmatpush3.msra.mxu0 %v1321_v61  ;;  %v1315_v0 = vpop.permute.xlu1 %1314 }
 0x224   :  { %5015 = vmatprep.subr.mxu1 %v1122_v62  ;;  %5067 = vmatprep.subr.mxu0 %v1319_v58 }
 0x225   :  { %5016 = vmatpush3.msra.mxu1 %v1122_v62  ;;  %5068 = vmatpush3.msra.mxu0 %v1319_v58  ;;  %v77_v58 = vld [vmem:[%s8399_s1 + $0x50] sm:$0xff]  ;;  %v80_v62 = vld [vmem:[%s8399_s1 + $0x68] sm:$0xff] }
 0x226   :  { %5069 = vmatprep.subr.mxu0 %v1317_v63 }
 0x227   :  { %5070 = vmatpush3.msra.mxu0 %v1317_v63 }
 0x228   :  { %5071 = vmatprep.subr.mxu0 %v1315_v0 }
 0x229   :  { %5072 = vmatpush3.msra.mxu0 %v1315_v0 }
 0x272   :  { %v4911_v2 = vpop.f32.mrf.mxu1 }
 0x273   :  { %v6192_v3 = vadd.f32 %v4911_v2, %v68_v1 }
 0x274   :  { %v477_v4 = vpop.f32.mrf.mxu1 }
 0x275   :  { %558 = vmax.xlane.f32.xlu0 %v6192_v3  ;;  %v6206_v12 = vadd.f32 %v477_v4, %v67_v7 }
 0x276   :  { %v4967_v5 = vpop.f32.mrf.mxu0  ;;  %v4914_v11 = vpop.f32.mrf.mxu1 }
 0x277   :  { %v6195_v6 = vadd.f32 %v4967_v5, %v68_v1  ;;  %v6209_v14 = vadd.f32 %v4914_v11, %v70_v10  ;;  %v79_v5 = vld [vmem:[%s8399_s1 + $0x60] sm:$0xff]  ;;  %v82_v11 = vld [vmem:[%s8399_s1 + $0x78] sm:$0xff] }
 0x278   :  { %v894_v8 = vpop.f32.mrf.mxu0  ;;  %v487_v15 = vpop.f32.mrf.mxu1 }
 0x279   :  { %v6200_v9 = vadd.f32 %v894_v8, %v67_v7  ;;  %975 = vmax.xlane.f32.xlu0 %v6195_v6  ;;  %v6218_v19 = vadd.f32 %v487_v15, %v69_v16 }
 0x27a   :  { %v4970_v13 = vpop.f32.mrf.mxu0  ;;  %v4917_v23 = vpop.f32.mrf.mxu1 }
 0x27b   :  { %973 = vmax.xlane.f32.xlu1 %v6200_v9  ;;  %v6215_v17 = vadd.f32 %v4970_v13, %v70_v10  ;;  %v6227_v28 = vadd.f32 %v4917_v23, %v72_v21  ;;  %v81_v23 = vld [vmem:[%s8399_s1 + $0x70] sm:$0xff] }
 0x27c   :  { %v904_v18 = vpop.f32.mrf.mxu0  ;;  %v497_v24 = vpop.f32.mrf.mxu1 }
 0x27d   :  { %556 = vmax.xlane.f32.xlu0 %v6206_v12  ;;  %v6224_v25 = vadd.f32 %v904_v18, %v69_v16  ;;  %v6236_v31 = vadd.f32 %v497_v24, %v71_v26 }
 0x27e   :  { %v4973_v27 = vpop.f32.mrf.mxu0  ;;  %v4920_v33 = vpop.f32.mrf.mxu1 }
 0x27f   :  { %562 = vmax.xlane.f32.xlu1 %v6209_v14  ;;  %v6233_v29 = vadd.f32 %v4973_v27, %v72_v21  ;;  %v6245_v36 = vadd.f32 %v4920_v33, %v74_v32 }
 0x280   :  { %v914_v30 = vpop.f32.mrf.mxu0  ;;  %v507_v37 = vpop.f32.mrf.mxu1 }
 0x281   :  { %979 = vmax.xlane.f32.xlu0 %v6215_v17  ;;  %v6242_v34 = vadd.f32 %v914_v30, %v71_v26  ;;  %v6254_v42 = vadd.f32 %v507_v37, %v73_v39 }
 0x282   :  { %v4976_v35 = vpop.f32.mrf.mxu0  ;;  %v4923_v44 = vpop.f32.mrf.mxu1 }
 0x283   :  { %560 = vmax.xlane.f32.xlu1 %v6218_v19  ;;  %v6251_v40 = vadd.f32 %v4976_v35, %v74_v32  ;;  %v6263_v46 = vadd.f32 %v4923_v44, %v76_v43 }
 0x284   :  { %v924_v41 = vpop.f32.mrf.mxu0  ;;  %v517_v47 = vpop.f32.mrf.mxu1 }
 0x285   :  { %977 = vmax.xlane.f32.xlu0 %v6224_v25  ;;  %v6260_v45 = vadd.f32 %v924_v41, %v73_v39  ;;  %v6272_v51 = vadd.f32 %v517_v47, %v75_v48 }
 0x286   :  { %v4979_v38 = vpop.f32.mrf.mxu0  ;;  %v4926_v53 = vpop.f32.mrf.mxu1 }
 0x287   :  { %566 = vmax.xlane.f32.xlu1 %v6227_v28  ;;  %v6269_v49 = vadd.f32 %v4979_v38, %v76_v43  ;;  %v6281_v56 = vadd.f32 %v4926_v53, %v78_v52 }
 0x288   :  { %v934_v50 = vpop.f32.mrf.mxu0  ;;  %v527_v57 = vpop.f32.mrf.mxu1 }
 0x289   :  { %983 = vmax.xlane.f32.xlu0 %v6233_v29  ;;  %v6278_v54 = vadd.f32 %v934_v50, %v75_v48  ;;  %v6290_v61 = vadd.f32 %v527_v57, %v77_v58 }
 0x28a   :  { %v4982_v55 = vpop.f32.mrf.mxu0  ;;  %v4929_v63 = vpop.f32.mrf.mxu1 }
 0x28b   :  { %564 = vmax.xlane.f32.xlu1 %v6236_v31  ;;  %v6287_v59 = vadd.f32 %v4982_v55, %v78_v52  ;;  %v6299_v2 = vadd.f32 %v4929_v63, %v80_v62 }
 0x28c   :  { %v944_v60 = vpop.f32.mrf.mxu0  ;;  %v537_v4 = vpop.f32.mrf.mxu1 }
 0x28d   :  { %981 = vmax.xlane.f32.xlu0 %v6242_v34  ;;  %v6296_v0 = vadd.f32 %v944_v60, %v77_v58  ;;  %v6308_v10 = vadd.f32 %v537_v4, %v79_v5 }
 0x28e   :  { %v4985_v1 = vpop.f32.mrf.mxu0  ;;  %v4932_v13 = vpop.f32.mrf.mxu1 }
 0x28f   :  { %570 = vmax.xlane.f32.xlu1 %v6245_v36  ;;  %v6305_v7 = vadd.f32 %v4985_v1, %v80_v62  ;;  %v6317_v18 = vadd.f32 %v4932_v13, %v82_v11 }
 0x290   :  { %v954_v8 = vpop.f32.mrf.mxu0  ;;  %v547_v21 = vpop.f32.mrf.mxu1 }
 0x291   :  { %987 = vmax.xlane.f32.xlu0 %v6251_v40  ;;  %v6314_v15 = vadd.f32 %v954_v8, %v79_v5  ;;  %v6326_v24 = vadd.f32 %v547_v21, %v81_v23 }
 0x292   :  { %v4988_v16 = vpop.f32.mrf.mxu0 }
 0x293   :  { %568 = vmax.xlane.f32.xlu1 %v6254_v42  ;;  %v6323_v27 = vadd.f32 %v4988_v16, %v82_v11 }
 0x294   :  { %v964_v26 = vpop.f32.mrf.mxu0 }
 0x295   :  { %985 = vmax.xlane.f32.xlu0 %v6260_v45  ;;  %v6338_v30 = vadd.f32 %v964_v26, %v81_v23 }
 0x297   :  { %574 = vmax.xlane.f32.xlu1 %v6263_v46 }
 0x299   :  { %991 = vmax.xlane.f32.xlu0 %v6269_v49 }
 0x29b   :  { %572 = vmax.xlane.f32.xlu1 %v6272_v51 }
 0x29d   :  { %989 = vmax.xlane.f32.xlu0 %v6278_v54 }
 0x29f   :  { %578 = vmax.xlane.f32.xlu1 %v6281_v56 }
 0x2a1   :  { %995 = vmax.xlane.f32.xlu0 %v6287_v59 }
 0x2a3   :  { %576 = vmax.xlane.f32.xlu1 %v6290_v61 }
 0x2a5   :  { %993 = vmax.xlane.f32.xlu0 %v6296_v0 }
 0x2a7   :  { %582 = vmax.xlane.f32.xlu1 %v6299_v2 }
 0x2a9   :  { %999 = vmax.xlane.f32.xlu0 %v6305_v7 }
 0x2ab   :  { %580 = vmax.xlane.f32.xlu1 %v6308_v10 }
 0x2ad   :  { %997 = vmax.xlane.f32.xlu0 %v6314_v15 }
 0x2af   :  { %586 = vmax.xlane.f32.xlu1 %v6317_v18 }
 0x2b1   :  { %1003 = vmax.xlane.f32.xlu0 %v6323_v27 }
 0x2b3   :  { %584 = vmax.xlane.f32.xlu1 %v6326_v24 }
 0x2c4   :  { %1119 = vrot.lane.b32.xlu1 %v5893_v20, %s5783_s19 }
 0x2c7   :  { %1312 = vrot.lane.b32.xlu0 %v5893_v20, %s5782_s18 }
 0x2c8   :  { %1117 = vrot.lane.b32.xlu1 %v5895_v22, %s5783_s19 }
 0x2cc   :  { %1310 = vrot.lane.b32.xlu1 %v5895_v22, %s5782_s18 }
 0x2e6   :  { %1001 = vmax.xlane.f32.xlu0 %v6338_v30 }
 0x2fe   :  { %v559_v32 = vpop.xlane.xlu0 %558 }
 0x2ff   :  { %v589_v33 = vsub.f32 %v6192_v3, %v559_v32 }
 0x301   :  { %v606_v35 = vmul.f32 1.442695, %v589_v33 }
 0x302   :  { %v976_v37 = vpop.xlane.xlu0 %975 }
 0x303   :  { %5395 = vpow2.f32 %v606_v35  ;;  %v1006_v39 = vsub.f32 %v6195_v6, %v976_v37 }
 0x304   :  { %v974_v20 = vpop.xlane.xlu1 %973 }
 0x305   :  { %v1023_v41 = vmul.f32 1.442695, %v1006_v39  ;;  %v1005_v43 = vsub.f32 %v6200_v9, %v974_v20 }
 0x306   :  { %v557_v44 = vpop.xlane.xlu0 %556 }
 0x307   :  { %5397 = vpow2.f32 %v1023_v41  ;;  %v1021_v22 = vmul.f32 1.442695, %v1005_v43  ;;  %v588_v38 = vsub.f32 %v6206_v12, %v557_v44 }
 0x308   :  { %v563_v47 = vpop.xlane.xlu1 %562 }
 0x309   :  { %5399 = vpow2.f32 %v1021_v22  ;;  %v604_v48 = vmul.f32 1.442695, %v588_v38  ;;  %v591_v50 = vsub.f32 %v6209_v14, %v563_v47 }
 0x30a   :  { %v980_v3 = vpop.xlane.xlu0 %979 }
 0x30b   :  { %5401 = vpow2.f32 %v604_v48  ;;  %v610_v52 = vmul.f32 1.442695, %v591_v50  ;;  %v1008_v53 = vsub.f32 %v6215_v17, %v980_v3 }
 0x30c   :  { %v561_v6 = vpop.xlane.xlu1 %560 }
 0x30d   :  { %v1027_v55 = vmul.f32 1.442695, %v1008_v53  ;;  %5403 = vpow2.f32 %v610_v52  ;;  %v590_v9 = vsub.f32 %v6218_v19, %v561_v6 }
 0x30e   :  { %v978_v57 = vpop.xlane.xlu0 %977 }
 0x30f   :  { %v1007_v58 = vsub.f32 %v6224_v25, %v978_v57  ;;  %5405 = vpow2.f32 %v1027_v55  ;;  %v608_v1 = vmul.f32 1.442695, %v590_v9 }
 0x310   :  { %v6349_v60 = vpop.eup %5395  ;;  %v567_v12 = vpop.xlane.xlu1 %566 }
 0x311   :  { %v1025_v62 = vmul.f32 1.442695, %v1007_v58  ;;  %638 = vadd.xlane.f32.xlu0 %v6349_v60  ;;  %v593_v14 = vsub.f32 %v6227_v28, %v567_v12 }
 0x312   :  { %v984_v63 = vpop.xlane.xlu0 %983 }
 0x313   :  { %5407 = vpow2.f32 %v1025_v62  ;;  %v614_v25 = vmul.f32 1.442695, %v593_v14  ;;  %v1010_v8 = vsub.f32 %v6233_v29, %v984_v63 }
 0x314   :  { %v6353_v17 = vpop.eup %5397  ;;  %v565_v4 = vpop.xlane.xlu1 %564  ;;  %5409 = vpow2.f32 %v608_v1 }
 0x315   :  { %1055 = vadd.xlane.f32.xlu0 %v6353_v17  ;;  %5411 = vpow2.f32 %v614_v25  ;;  %v592_v21 = vsub.f32 %v6236_v31, %v565_v4  ;;  %v1031_v26 = vmul.f32 1.442695, %v1010_v8 }
 0x316   :  { %v6356_v19 = vpop.eup %5399  ;;  %v982_v5 = vpop.xlane.xlu0 %981 }
 0x317   :  { %v1009_v11 = vsub.f32 %v6242_v34, %v982_v5  ;;  %1053 = vadd.xlane.f32.xlu1 %v6356_v19  ;;  %v612_v29 = vmul.f32 1.442695, %v592_v21 }
 0x318   :  { %v6361_v28 = vpop.eup %5401  ;;  %v571_v13 = vpop.xlane.xlu1 %570 }
 0x319   :  { %v1029_v16 = vmul.f32 1.442695, %v1009_v11  ;;  %636 = vadd.xlane.f32.xlu0 %v6361_v28  ;;  %v595_v37 = vsub.f32 %v6245_v36, %v571_v13 }
 0x31a   :  { %v988_v23 = vpop.xlane.xlu0 %987  ;;  %v6365_v32 = vpop.eup %5403 }
 0x31b   :  { %5413 = vpow2.f32 %v1029_v16  ;;  %v1012_v43 = vsub.f32 %v6251_v40, %v988_v23  ;;  %v618_v22 = vmul.f32 1.442695, %v595_v37 }
 0x31c   :  { %v569_v33 = vpop.xlane.xlu1 %568  ;;  %v6368_v35 = vpop.eup %5405  ;;  %5415 = vpow2.f32 %v1031_v26 }
 0x31d   :  { %642 = vadd.xlane.f32.xlu0 %v6365_v32  ;;  %5417 = vpow2.f32 %v612_v29  ;;  %v1035_v36 = vmul.f32 1.442695, %v1012_v43  ;;  %v594_v50 = vsub.f32 %v6254_v42, %v569_v33 }
 0x31e   :  { %v986_v34 = vpop.xlane.xlu0 %985 }
 0x31f   :  { %v1011_v39 = vsub.f32 %v6260_v45, %v986_v34  ;;  %v616_v57 = vmul.f32 1.442695, %v594_v50 }
 0x320   :  { %v6372_v20 = vpop.eup %5407  ;;  %v575_v31 = vpop.xlane.xlu1 %574 }
 0x321   :  { %v1033_v41 = vmul.f32 1.442695, %v1011_v39  ;;  %1059 = vadd.xlane.f32.xlu0 %v6368_v35  ;;  %1057 = vadd.xlane.f32.xlu1 %v6372_v20  ;;  %v6377_v38 = vpop.eup %5409  ;;  %v597_v6 = vsub.f32 %v6263_v46, %v575_v31 }
 0x322   :  { %v992_v44 = vpop.xlane.xlu0 %991  ;;  %v6380_v48 = vpop.eup %5411 }
 0x323   :  { %5419 = vpow2.f32 %v1033_v41  ;;  %v622_v42 = vmul.f32 1.442695, %v597_v6  ;;  %v1014_v62 = vsub.f32 %v6269_v49, %v992_v44 }
 0x324   :  { %v573_v47 = vpop.xlane.xlu1 %572  ;;  %5421 = vpow2.f32 %v618_v22 }
 0x325   :  { %640 = vadd.xlane.f32.xlu0 %v6377_v38  ;;  %5423 = vpow2.f32 %v1035_v36  ;;  %v596_v4 = vsub.f32 %v6272_v51, %v573_v47  ;;  %v1039_v5 = vmul.f32 1.442695, %v1014_v62 }
 0x326   :  { %v990_v45 = vpop.xlane.xlu0 %989 }
 0x327   :  { %v1013_v3 = vsub.f32 %v6278_v54, %v990_v45  ;;  %v620_v49 = vmul.f32 1.442695, %v596_v4 }
 0x328   :  { %v6384_v52 = vpop.eup %5413  ;;  %v579_v40 = vpop.xlane.xlu1 %578 }
 0x329   :  { %v1037_v53 = vmul.f32 1.442695, %v1013_v3  ;;  %646 = vadd.xlane.f32.xlu0 %v6380_v48  ;;  %1061 = vadd.xlane.f32.xlu1 %v6384_v52  ;;  %v6389_v9 = vpop.eup %5415  ;;  %v599_v16 = vsub.f32 %v6281_v56, %v579_v40 }
 0x32a   :  { %v996_v55 = vpop.xlane.xlu0 %995  ;;  %v6392_v12 = vpop.eup %5417 }
 0x32b   :  { %5425 = vpow2.f32 %v1037_v53  ;;  %v626_v29 = vmul.f32 1.442695, %v599_v16  ;;  %v1016_v34 = vsub.f32 %v6287_v59, %v996_v55 }
 0x32c   :  { %v577_v58 = vpop.xlane.xlu1 %576  ;;  %5427 = vpow2.f32 %v616_v57 }
 0x32d   :  { %1063 = vadd.xlane.f32.xlu0 %v6389_v9  ;;  %5429 = vpow2.f32 %v622_v42  ;;  %v1043_v31 = vmul.f32 1.442695, %v1016_v34  ;;  %v598_v41 = vsub.f32 %v6290_v61, %v577_v58 }
 0x32e   :  { %v994_v54 = vpop.xlane.xlu0 %993 }
 0x32f   :  { %v1015_v14 = vsub.f32 %v6296_v0, %v994_v54  ;;  %v624_v59 = vmul.f32 1.442695, %v598_v41 }
 0x330   :  { %v6396_v63 = vpop.eup %5419  ;;  %v583_v46 = vpop.xlane.xlu1 %582 }
 0x331   :  { %v1041_v1 = vmul.f32 1.442695, %v1015_v14  ;;  %644 = vadd.xlane.f32.xlu0 %v6392_v12  ;;  %1065 = vadd.xlane.f32.xlu1 %v6396_v63  ;;  %v6401_v8 = vpop.eup %5421  ;;  %v601_v22 = vsub.f32 %v6299_v2, %v583_v46 }
 0x332   :  { %v1000_v25 = vpop.xlane.xlu0 %999  ;;  %v6404_v13 = vpop.eup %5423 }
 0x333   :  { %5431 = vpow2.f32 %v1041_v1  ;;  %v630_v45 = vmul.f32 1.442695, %v601_v22  ;;  %v1018_v50 = vsub.f32 %v6305_v7, %v1000_v25 }
 0x334   :  { %v581_v11 = vpop.xlane.xlu1 %580  ;;  %5433 = vpow2.f32 %v1039_v5 }
 0x335   :  { %650 = vadd.xlane.f32.xlu0 %v6401_v8  ;;  %5435 = vpow2.f32 %v620_v49  ;;  %v1047_v2 = vmul.f32 1.442695, %v1018_v50  ;;  %v600_v53 = vsub.f32 %v6308_v10, %v581_v11 }
 0x336   :  { %v998_v0 = vpop.xlane.xlu0 %997 }
 0x337   :  { %v1017_v21 = vsub.f32 %v6314_v15, %v998_v0  ;;  %v628_v55 = vmul.f32 1.442695, %v600_v53 }
 0x338   :  { %v6408_v23 = vpop.eup %5425  ;;  %v587_v51 = vpop.xlane.xlu1 %586 }
 0x339   :  { %v1045_v26 = vmul.f32 1.442695, %v1017_v21  ;;  %1067 = vadd.xlane.f32.xlu0 %v6404_v13  ;;  %1069 = vadd.xlane.f32.xlu1 %v6408_v23  ;;  %v6413_v37 = vpop.eup %5427  ;;  %v603_v58 = vsub.f32 %v6317_v18, %v587_v51 }
 0x33a   :  { %v1004_v33 = vpop.xlane.xlu0 %1003  ;;  %v6416_v15 = vpop.eup %5429 }
 0x33b   :  { %5437 = vpow2.f32 %v1045_v26  ;;  %v634_v10 = vmul.f32 1.442695, %v603_v58  ;;  %v1020_v62 = vsub.f32 %v6323_v27, %v1004_v33 }
 0x33c   :  { %v585_v39 = vpop.xlane.xlu1 %584  ;;  %5439 = vpow2.f32 %v626_v29 }
 0x33d   :  { %648 = vadd.xlane.f32.xlu0 %v6413_v37  ;;  %5441 = vpow2.f32 %v1043_v31  ;;  %v602_v7 = vsub.f32 %v6326_v24, %v585_v39  ;;  %v1051_v24 = vmul.f32 1.442695, %v1020_v62 }
 0x33e   :  { %v1313_v56 = vpop.permute.xlu0 %1312  ;;  %5443 = vpow2.f32 %v624_v59 }
 0x33f   :  { %5073 = vmatprep.subr.mxu0 %v1313_v56  ;;  %5445 = vpow2.f32 %v630_v45  ;;  %v632_v42 = vmul.f32 1.442695, %v602_v7 }
 0x340   :  { %v6419_v43 = vpop.eup %5431  ;;  %v1120_v44 = vpop.permute.xlu1 %1119  ;;  %5074 = vmatpush3.msra.mxu0 %v1313_v56  ;;  %5447 = vpow2.f32 %v1047_v2 }
 0x341   :  { %5017 = vmatprep.subr.mxu1 %v1120_v44  ;;  %654 = vadd.xlane.f32.xlu0 %v6416_v15  ;;  %v6424_v47 = vpop.eup %5433  ;;  %5449 = vpow2.f32 %v628_v55 }
 0x342   :  { %1073 = vadd.xlane.f32.xlu1 %v6419_v43  ;;  %5018 = vmatpush3.msra.mxu1 %v1120_v44  ;;  %v6427_v61 = vpop.eup %5435  ;;  %5451 = vpow2.f32 %v632_v42 }
 0x343   :  { %5453 = vpow2.f32 %v634_v10 }
 0x344   :  { %v1118_v36 = vpop.permute.xlu1 %1117  ;;  %5455 = vpow2.f32 %v1051_v24 }
 0x345   :  { %5019 = vmatprep.subr.mxu1 %v1118_v36  ;;  %1071 = vadd.xlane.f32.xlu0 %v6424_v47 }
 0x346   :  { %5020 = vmatpush3.msra.mxu1 %v1118_v36 }
 0x348   :  { %v6430_v3 = vpop.eup %5437  ;;  %v1311_v40 = vpop.permute.xlu1 %1310 }
 0x349   :  { %652 = vadd.xlane.f32.xlu0 %v6427_v61  ;;  %1077 = vadd.xlane.f32.xlu1 %v6430_v3  ;;  %v6435_v6 = vpop.eup %5439 }
 0x34a   :  { %5075 = vmatprep.subr.mxu0 %v1311_v40  ;;  %v6439_v57 = vpop.eup %5441 }
 0x34b   :  { %5076 = vmatpush3.msra.mxu0 %v1311_v40  ;;  %v6443_v54 = vpop.eup %5443 }
 0x34c   :  { %v6447_v14 = vpop.eup %5445 }
 0x34d   :  { %658 = vadd.xlane.f32.xlu0 %v6435_v6  ;;  %v6450_v46 = vpop.eup %5447 }
 0x34e   :  { %v6453_v18 = vpop.eup %5449 }
 0x34f   :  { %v6456_v1 = vpop.eup %5451 }
 0x350   :  { %v6459_v27 = vpop.eup %5453 }
 0x351   :  { %1075 = vadd.xlane.f32.xlu0 %v6439_v57  ;;  %v6462_v4 = vpop.eup %5455 }
 0x355   :  { %656 = vadd.xlane.f32.xlu0 %v6443_v54 }
 0x359   :  { %662 = vadd.xlane.f32.xlu0 %v6447_v14 }
 0x35d   :  { %1079 = vadd.xlane.f32.xlu0 %v6450_v46 }
 0x361   :  { %660 = vadd.xlane.f32.xlu0 %v6453_v18 }
 0x365   :  { %664 = vadd.xlane.f32.xlu0 %v6456_v1 }
 0x369   :  { %666 = vadd.xlane.f32.xlu0 %v6459_v27 }
 0x36d   :  { %1083 = vadd.xlane.f32.xlu0 %v6462_v4 }
 0x36f   :  { %v1002_v25 = vpop.xlane.xlu0 %1001 }
 0x370   :  { %v1019_v5 = vsub.f32 %v6338_v30, %v1002_v25 }
 0x372   :  { %v1049_v11 = vmul.f32 1.442695, %v1019_v5 }
 0x374   :  { %5457 = vpow2.f32 %v1049_v11 }
 0x381   :  { %v6466_v49 = vpop.eup %5457 }
 0x382   :  { %1081 = vadd.xlane.f32.xlu1 %v6466_v49 }
 0x39a   :  { %v639_v0 = vpop.xlane.xlu0 %638 }
 0x39e   :  { %v1056_v16 = vpop.xlane.xlu0 %1055 }
 0x39f   :  { %5459 = vrcp.f32 %v1056_v16 }
 0x3a0   :  { %v1054_v21 = vpop.xlane.xlu1 %1053 }
 0x3a1   :  { %5461 = vrcp.f32 %v1054_v21 }
 0x3a2   :  { %5463 = vrcp.f32 %v639_v0  ;;  %v637_v51 = vpop.xlane.xlu0 %636 }
 0x3a3   :  { %5465 = vrcp.f32 %v637_v51 }
 0x3a6   :  { %v643_v26 = vpop.xlane.xlu0 %642 }
 0x3aa   :  { %v1058_v33 = vpop.xlane.xlu1 %1057  ;;  %v1060_v29 = vpop.xlane.xlu0 %1059 }
 0x3ab   :  { %5467 = vrcp.f32 %v1058_v33 }
 0x3ac   :  { %5469 = vrcp.f32 %v1060_v29  ;;  %v5460_v30 = vpop.eup %5459 }
 0x3ad   :  { %5471 = vrcp.f32 %v643_v26  ;;  %v1088_v44 = vmul.f32 %v5460_v30, %v6353_v17 }
 0x3ae   :  { %v5462_v34 = vpop.eup %5461  ;;  %v641_v39 = vpop.xlane.xlu0 %640 }
 0x3af   :  { %v5464_v56 = vpop.eup %5463  ;;  %5473 = vrcp.f32 %v641_v39  ;;  %v1086_v31 = vmul.f32 %v5462_v34, %v6356_v19 }
 0x3b0   :  { %v5466_v41 = vpop.eup %5465  ;;  %v671_v45 = vmul.f32 %v5464_v56, %v6349_v60 }
 0x3b1   :  { %5021 = vmatprep.mubr.f32.mxu1 %v1086_v31  ;;  %v669_v59 = vmul.f32 %v5466_v41, %v6361_v28 }
 0x3b2   :  { %v1062_v22 = vpop.xlane.xlu1 %1061  ;;  %5022 = vmatmul.mubr.f32.vlgmr.msra.gmra.mxu1 %v1088_v44  ;;  %v647_v36 = vpop.xlane.xlu0 %646 }
 0x3b3   :  { %5475 = vrcp.f32 %v1062_v22  ;;  %5077 = vmatprep.mubr.f32.mxu0 %v669_v59 }
 0x3b4   :  { %5078 = vmatmul.mubr.f32.vlgmr.msra.gmra.mxu0 %v671_v45 }
 0x3b6   :  { %v1064_v50 = vpop.xlane.xlu0 %1063 }
 0x3b7   :  { %5477 = vrcp.f32 %v1064_v50 }
 0x3b8   :  { %v5468_v40 = vpop.eup %5467  ;;  %5479 = vrcp.f32 %v647_v36 }
 0x3b9   :  { %v5470_v2 = vpop.eup %5469  ;;  %v1090_v19 = vmul.f32 %v5468_v40, %v6372_v20 }
 0x3ba   :  { %v1066_v53 = vpop.xlane.xlu1 %1065  ;;  %v645_v17 = vpop.xlane.xlu0 %644  ;;  %v1092_v55 = vmul.f32 %v5470_v2, %v6368_v35 }
 0x3bb   :  { %v5472_v28 = vpop.eup %5471  ;;  %5481 = vrcp.f32 %v1066_v53  ;;  %5024 = vmatprep.mubr.f32.mxu1 %v1090_v19 }
 0x3bc   :  { %v5474_v7 = vpop.eup %5473  ;;  %5483 = vrcp.f32 %v645_v17  ;;  %5025 = vmatmul.mubr.f32.gmra.mxu1 %v1092_v55  ;;  %v675_v42 = vmul.f32 %v5472_v28, %v6365_v32 }
 0x3bd   :  { %v673_v60 = vmul.f32 %v5474_v7, %v6377_v38 }
 0x3be   :  { %v651_v58 = vpop.xlane.xlu0 %650 }
 0x3bf   :  { %5080 = vmatprep.mubr.f32.mxu0 %v673_v60 }
 0x3c0   :  { %v5476_v10 = vpop.eup %5475  ;;  %5081 = vmatmul.mubr.f32.gmra.mxu0 %v675_v42 }
 0x3c1   :  { %v1094_v20 = vmul.f32 %v5476_v10, %v6384_v52 }
 0x3c2   :  { %v1070_v62 = vpop.xlane.xlu1 %1069  ;;  %v1068_v24 = vpop.xlane.xlu0 %1067 }
 0x3c3   :  { %5485 = vrcp.f32 %v1070_v62  ;;  %5027 = vmatprep.mubr.f32.mxu1 %v1094_v20 }
 0x3c4   :  { %v5478_v35 = vpop.eup %5477  ;;  %5487 = vrcp.f32 %v1068_v24 }
 0x3c5   :  { %v1096_v25 = vmul.f32 %v5478_v35, %v6389_v9  ;;  %5489 = vrcp.f32 %v651_v58  ;;  %v5480_v11 = vpop.eup %5479 }
 0x3c6   :  { %v649_v5 = vpop.xlane.xlu0 %648  ;;  %v679_v51 = vmul.f32 %v5480_v11, %v6380_v48 }
 0x3c7   :  { %5491 = vrcp.f32 %v649_v5  ;;  %5028 = vmatmul.mubr.f32.gmra.mxu1 %v1096_v25  ;;  %v90_v5 = vlaneseq }
 0x3c8   :  { %v5482_v38 = vpop.eup %5481 }
 0x3c9   :  { %v5484_v32 = vpop.eup %5483  ;;  %v1098_v0 = vmul.f32 %v5482_v38, %v6396_v63  ;;  %v91_v11 = vand.u32 127, %v90_v5 }
 0x3ca   :  { %v655_v16 = vpop.xlane.xlu0 %654  ;;  %v677_v52 = vmul.f32 %v5484_v32, %v6392_v12 }
 0x3cb   :  { %v1074_v21 = vpop.xlane.xlu1 %1073  ;;  %5030 = vmatprep.mubr.f32.mxu1 %v1098_v0 }
 0x3cc   :  { %5083 = vmatprep.mubr.f32.mxu0 %v677_v52  ;;  %5493 = vrcp.f32 %v1074_v21  ;;  %v6506_v21 = vld [vmem:[%s8402_s4 + $0x4] ss:$0 sm:$0xff] }
 0x3cd   :  { %5084 = vmatmul.mubr.f32.gmra.mxu0 %v679_v51 }
 0x3ce   :  { %v1072_v9 = vpop.xlane.xlu0 %1071 }
 0x3cf   :  { %5495 = vrcp.f32 %v1072_v9 }
 0x3d0   :  { %v5486_v26 = vpop.eup %5485  ;;  %5497 = vrcp.f32 %v655_v16 }
 0x3d1   :  { %v5488_v33 = vpop.eup %5487  ;;  %v1102_v29 = vmul.f32 %v5486_v26, %v6408_v23 }
 0x3d2   :  { %v653_v30 = vpop.xlane.xlu0 %652  ;;  %v1100_v34 = vmul.f32 %v5488_v33, %v6404_v13  ;;  %v5490_v63 = vpop.eup %5489 }
 0x3d3   :  { %5499 = vrcp.f32 %v653_v30  ;;  %v683_v56 = vmul.f32 %v5490_v63, %v6401_v8  ;;  %v1078_v31 = vpop.xlane.xlu1 %1077 }
 0x3d4   :  { %v5492_v39 = vpop.eup %5491  ;;  %5031 = vmatmul.mubr.f32.gmra.mxu1 %v1100_v34  ;;  %5501 = vrcp.f32 %v1078_v31 }
 0x3d5   :  { %5033 = vmatprep.mubr.f32.mxu1 %v1102_v29  ;;  %v681_v48 = vmul.f32 %v5492_v39, %v6413_v37  ;;  %v5700_v29 = vld [vmem:[%s8398_s0] sm:$0xff] }
 0x3d6   :  { %v659_v12 = vpop.xlane.xlu0 %658 }
 0x3d7   :  { %5086 = vmatprep.mubr.f32.mxu0 %v681_v48 }
 0x3d8   :  { %5087 = vmatmul.mubr.f32.gmra.mxu0 %v683_v56 }
 0x3d9   :  { %v5494_v23 = vpop.eup %5493 }
 0x3da   :  { %v1076_v41 = vpop.xlane.xlu0 %1075  ;;  %v1106_v22 = vmul.f32 %v5494_v23, %v6419_v43 }
 0x3db   :  { %5503 = vrcp.f32 %v1076_v41 }
 0x3dc   :  { %v5496_v44 = vpop.eup %5495  ;;  %5505 = vrcp.f32 %v659_v12 }
 0x3dd   :  { %v1104_v13 = vmul.f32 %v5496_v44, %v6424_v47  ;;  %v5498_v37 = vpop.eup %5497 }
 0x3de   :  { %v657_v59 = vpop.xlane.xlu0 %656  ;;  %v687_v50 = vmul.f32 %v5498_v37, %v6416_v15 }
 0x3df   :  { %5507 = vrcp.f32 %v657_v59  ;;  %5034 = vmatmul.mubr.f32.gmra.mxu1 %v1104_v13 }
 0x3e0   :  { %5036 = vmatprep.mubr.f32.mxu1 %v1106_v22  ;;  %v5500_v36 = vpop.eup %5499 }
 0x3e1   :  { %v685_v45 = vmul.f32 %v5500_v36, %v6427_v61  ;;  %v5502_v2 = vpop.eup %5501  ;;  %v5701_v36 = vld [vmem:[%s8398_s0 + $0x18] sm:$0xff] }
 0x3e2   :  { %v663_v8 = vpop.xlane.xlu0 %662  ;;  %v1110_v53 = vmul.f32 %v5502_v2, %v6430_v3 }
 0x3e3   :  { %5089 = vmatprep.mubr.f32.mxu0 %v685_v45 }
 0x3e4   :  { %5090 = vmatmul.mubr.f32.gmra.mxu0 %v687_v50 }
 0x3e6   :  { %v1080_v40 = vpop.xlane.xlu0 %1079 }
 0x3e7   :  { %5509 = vrcp.f32 %v1080_v40  ;;  %v5702_v40 = vld [vmem:[%s8398_s0 + $0x10] sm:$0xff] }
 0x3e8   :  { %v5504_v47 = vpop.eup %5503  ;;  %5511 = vrcp.f32 %v663_v8 }
 0x3e9   :  { %v1108_v19 = vmul.f32 %v5504_v47, %v6439_v57  ;;  %v5506_v17 = vpop.eup %5505 }
 0x3ea   :  { %v661_v43 = vpop.xlane.xlu0 %660  ;;  %v691_v28 = vmul.f32 %v5506_v17, %v6435_v6 }
 0x3eb   :  { %5513 = vrcp.f32 %v661_v43  ;;  %5037 = vmatmul.mubr.f32.gmra.mxu1 %v1108_v19 }
 0x3ec   :  { %v5508_v55 = vpop.eup %5507  ;;  %5039 = vmatprep.mubr.f32.mxu1 %v1110_v53 }
 0x3ed   :  { %v689_v61 = vmul.f32 %v5508_v55, %v6443_v54 }
 0x3ee   :  { %v665_v15 = vpop.xlane.xlu0 %664 }
 0x3ef   :  { %5515 = vrcp.f32 %v665_v15  ;;  %5092 = vmatprep.mubr.f32.mxu0 %v689_v61 }
 0x3f0   :  { %5093 = vmatmul.mubr.f32.gmra.mxu0 %v691_v28 }
 0x3f2   :  { %v667_v7 = vpop.xlane.xlu0 %666 }
 0x3f3   :  { %5517 = vrcp.f32 %v667_v7 }
 0x3f4   :  { %v5510_v57 = vpop.eup %5509 }
 0x3f5   :  { %v1112_v60 = vmul.f32 %v5510_v57, %v6450_v46  ;;  %v5512_v58 = vpop.eup %5511 }
 0x3f6   :  { %v695_v10 = vmul.f32 %v5512_v58, %v6447_v14  ;;  %v1084_v24 = vpop.xlane.xlu0 %1083 }
 0x3f7   :  { %5040 = vmatmul.mubr.f32.gmra.mxu1 %v1112_v60  ;;  %5519 = vrcp.f32 %v1084_v24 }
 0x3f8   :  { %v5514_v3 = vpop.eup %5513 }
 0x3f9   :  { %v693_v42 = vmul.f32 %v5514_v3, %v6453_v18 }
 0x3fb   :  { %5095 = vmatprep.mubr.f32.mxu0 %v693_v42  ;;  %v5703_v42 = vld [vmem:[%s8398_s0 + $0x28] sm:$0xff] }
 0x3fc   :  { %v5516_v54 = vpop.eup %5515  ;;  %5096 = vmatmul.mubr.f32.gmra.mxu0 %v695_v10 }
 0x3fd   :  { %v697_v6 = vmul.f32 %v5516_v54, %v6456_v1  ;;  %v92_v1 = vand.u32 1, %v91_v11 }
 0x3ff   :  { %5098 = vmatprep.mubr.f32.mxu0 %v697_v6  ;;  %vm93_vm2 = vcmp.eq.s32.totalorder %v92_v1, 0 }
 0x400   :  { %v5518_v20 = vpop.eup %5517 }
 0x401   :  { %v699_v62 = vmul.f32 %v5518_v20, %v6459_v27  ;;  %v5784_v27 = vmov 0.0   ;;  %v5704_v20 = vld [vmem:[%s8398_s0 + $0x20] sm:$0xff] }
 0x402   :  { %v6501_v0 = vsel %vm93_vm2, 1.0, %v5784_v27 }
 0x403   :  { %5099 = vmatmul.mubr.f32.gmra.mxu0 %v699_v62  ;;  %v6512_v26 = vsub.f32 1.0, %v6501_v0 }
 0x404   :  { %v5520_v35 = vpop.eup %5519 }
 0x405   :  { %v1116_v14 = vmul.f32 %v5520_v35, %v6462_v4  ;;  %v5699_v4 = vld [vmem:[%s8398_s0 + $0x8] sm:$0xff] }
 0x40b   :  { %v1082_v46 = vpop.xlane.xlu1 %1081 }
 0x40c   :  { %5521 = vrcp.f32 %v1082_v46 }
 0x419   :  { %v5522_v25 = vpop.eup %5521 }
 0x41a   :  { %v1114_v18 = vmul.f32 %v5522_v25, %v6466_v49 }
 0x41c   :  { %5042 = vmatprep.mubr.f32.mxu1 %v1114_v18 }
 0x41d   :  { %5043 = vmatmul.mubr.f32.gmra.mxu1 %v1116_v14 }
 0x472   :  { %v5023_v38 = vpop.f32.mrf.mxu1 }
 0x474   :  { %v5079_v32 = vpop.f32.mrf.mxu0  ;;  %v1231_v52 = vpop.f32.mrf.mxu1 }
 0x475   :  { %v1430_v16 = vadd.f32 %v5079_v32, %v5023_v38 }
 0x476   :  { %v1424_v49 = vpop.f32.mrf.mxu0 }
 0x477   :  { %v1504_v51 = vadd.f32 %v5699_v4, %v1430_v16  ;;  %v1425_v9 = vadd.f32 %v1424_v49, %v1231_v52  ;;  %v5705_v49 = vld [vmem:[%s8398_s0 + $0x38] sm:$0xff] }
 0x479   :  { %v6515_v33 = vadd.f32 %v6506_v21, %v1504_v51  ;;  %v1503_v30 = vadd.f32 %v5700_v29, %v1425_v9  ;;  %v5706_v29 = vld [vmem:[%s8398_s0 + $0x30] sm:$0xff] }
 0x47b   :  { %v6521_v34 = vadd.f32 %v6506_v21, %v1503_v30  ;;  %v1620_v63 = vmul.f32 %v6515_v33, %v6512_v26  ;;  %v1540_v39 = vmul.f32 %v6501_v0, %v6515_v33 }
 0x47c   :  { %v5026_v41 = vpop.f32.mrf.mxu1 }
 0x47d   :  { %v1638_v48 = vsel %vm104_vm0, %v1620_v63, 0.0  ;;  %v1558_v12 = vsel %vm104_vm0, %v1540_v39, 0.0  ;;  %v1619_v56 = vmul.f32 %v6521_v34, %v6512_v26  ;;  %v1539_v31 = vmul.f32 %v6501_v0, %v6521_v34 }
 0x47e   :  { %1639 = vadd.xlane.f32.xlu0 %v1638_v48  ;;  %1559 = vadd.xlane.f32.xlu1 %v1558_v12  ;;  %v1241_v22 = vpop.f32.mrf.mxu1 }
 0x47f   :  { %v1635_v13 = vsel %vm104_vm0, %v1619_v56, 0.0  ;;  %v1555_v59 = vsel %vm104_vm0, %v1539_v31, 0.0 }
 0x480   :  { %v5082_v23 = vpop.f32.mrf.mxu0 }
 0x481   :  { %v1440_v44 = vadd.f32 %v5082_v23, %v5026_v41 }
 0x482   :  { %1636 = vadd.xlane.f32.xlu0 %v1635_v13  ;;  %1556 = vadd.xlane.f32.xlu1 %v1555_v59  ;;  %v1434_v37 = vpop.f32.mrf.mxu0 }
 0x483   :  { %v1506_v8 = vadd.f32 %v5701_v36, %v1440_v44  ;;  %v1435_v45 = vadd.f32 %v1434_v37, %v1241_v22 }
 0x485   :  { %v6539_v50 = vadd.f32 %v6506_v21, %v1506_v8  ;;  %v1505_v2 = vadd.f32 %v5702_v40, %v1435_v45  ;;  %v5707_v8 = vld [vmem:[%s8398_s0 + $0x48] sm:$0xff] }
 0x487   :  { %v6545_v47 = vadd.f32 %v6506_v21, %v1505_v2  ;;  %v1622_v19 = vmul.f32 %v6539_v50, %v6512_v26  ;;  %v1542_v43 = vmul.f32 %v6501_v0, %v6539_v50  ;;  %v5029_v15 = vpop.f32.mrf.mxu1 }
 0x489   :  { %v1644_v53 = vsel %vm104_vm0, %v1622_v19, 0.0  ;;  %v1564_v17 = vsel %vm104_vm0, %v1542_v43, 0.0  ;;  %v1621_v55 = vmul.f32 %v6545_v47, %v6512_v26  ;;  %v1541_v61 = vmul.f32 %v6501_v0, %v6545_v47  ;;  %v1251_v58 = vpop.f32.mrf.mxu1  ;;  %v5708_v19 = vld [vmem:[%s8398_s0 + $0x40] sm:$0xff] }
 0x48a   :  { %1645 = vadd.xlane.f32.xlu0 %v1644_v53  ;;  %1565 = vadd.xlane.f32.xlu1 %v1564_v17 }
 0x48b   :  { %v1641_v7 = vsel %vm104_vm0, %v1621_v55, 0.0  ;;  %v1561_v57 = vsel %vm104_vm0, %v1541_v61, 0.0 }
 0x48d   :  { %v5085_v28 = vpop.f32.mrf.mxu0 }
 0x48e   :  { %v1450_v60 = vadd.f32 %v5085_v28, %v5029_v15  ;;  %1642 = vadd.xlane.f32.xlu0 %v1641_v7  ;;  %1562 = vadd.xlane.f32.xlu1 %v1561_v57 }
 0x48f   :  { %v1444_v3 = vpop.f32.mrf.mxu0 }
 0x490   :  { %v1508_v10 = vadd.f32 %v5703_v42, %v1450_v60  ;;  %v1445_v54 = vadd.f32 %v1444_v3, %v1251_v58 }
 0x492   :  { %v6563_v6 = vadd.f32 %v6506_v21, %v1508_v10  ;;  %v1507_v62 = vadd.f32 %v5704_v20, %v1445_v54  ;;  %v5709_v20 = vld [vmem:[%s8398_s0 + $0x58] sm:$0xff] }
 0x494   :  { %v6569_v24 = vadd.f32 %v6506_v21, %v1507_v62  ;;  %v1624_v46 = vmul.f32 %v6563_v6, %v6512_v26  ;;  %v1544_v35 = vmul.f32 %v6501_v0, %v6563_v6  ;;  %v5032_v25 = vpop.f32.mrf.mxu1 }
 0x496   :  { %v1650_v18 = vsel %vm104_vm0, %v1624_v46, 0.0  ;;  %v1570_v14 = vsel %vm104_vm0, %v1544_v35, 0.0  ;;  %v1623_v5 = vmul.f32 %v6569_v24, %v6512_v26  ;;  %v1543_v11 = vmul.f32 %v6501_v0, %v6569_v24  ;;  %v1261_v32 = vpop.f32.mrf.mxu1 }
 0x497   :  { %1651 = vadd.xlane.f32.xlu0 %v1650_v18  ;;  %1571 = vadd.xlane.f32.xlu1 %v1570_v14 }
 0x498   :  { %v5088_v1 = vpop.f32.mrf.mxu0  ;;  %v1647_v27 = vsel %vm104_vm0, %v1623_v5, 0.0  ;;  %v1567_v16 = vsel %vm104_vm0, %v1543_v11, 0.0 }
 0x499   :  { %v1460_v38 = vadd.f32 %v5088_v1, %v5032_v25  ;;  %v5710_v25 = vld [vmem:[%s8398_s0 + $0x50] sm:$0xff] }
 0x49a   :  { %v1454_v52 = vpop.f32.mrf.mxu0 }
 0x49b   :  { %v1510_v4 = vadd.f32 %v5705_v49, %v1460_v38  ;;  %1648 = vadd.xlane.f32.xlu0 %v1647_v27  ;;  %1568 = vadd.xlane.f32.xlu1 %v1567_v16  ;;  %v1455_v51 = vadd.f32 %v1454_v52, %v1261_v32 }
 0x49d   :  { %v6587_v9 = vadd.f32 %v6506_v21, %v1510_v4  ;;  %v1509_v30 = vadd.f32 %v5706_v29, %v1455_v51 }
 0x49f   :  { %v6593_v63 = vadd.f32 %v6506_v21, %v1509_v30  ;;  %v1626_v39 = vmul.f32 %v6587_v9, %v6512_v26  ;;  %v1546_v48 = vmul.f32 %v6501_v0, %v6587_v9  ;;  %v5035_v23 = vpop.f32.mrf.mxu1 }
 0x4a1   :  { %v1656_v12 = vsel %vm104_vm0, %v1626_v39, 0.0  ;;  %v1576_v56 = vsel %vm104_vm0, %v1546_v48, 0.0  ;;  %v1625_v31 = vmul.f32 %v6593_v63, %v6512_v26  ;;  %v1545_v41 = vmul.f32 %v6501_v0, %v6593_v63  ;;  %v1271_v37 = vpop.f32.mrf.mxu1  ;;  %v5711_v39 = vld [vmem:[%s8398_s0 + $0x68] sm:$0xff] }
 0x4a2   :  { %1657 = vadd.xlane.f32.xlu0 %v1656_v12  ;;  %1577 = vadd.xlane.f32.xlu1 %v1576_v56 }
 0x4a3   :  { %v1653_v13 = vsel %vm104_vm0, %v1625_v31, 0.0  ;;  %v1573_v59 = vsel %vm104_vm0, %v1545_v41, 0.0  ;;  %v5712_v31 = vld [vmem:[%s8398_s0 + $0x60] sm:$0xff] }
 0x4a4   :  { %v5091_v44 = vpop.f32.mrf.mxu0 }
 0x4a5   :  { %v1470_v22 = vadd.f32 %v5091_v44, %v5035_v23 }
 0x4a6   :  { %1654 = vadd.xlane.f32.xlu0 %v1653_v13  ;;  %1574 = vadd.xlane.f32.xlu1 %v1573_v59  ;;  %v1464_v36 = vpop.f32.mrf.mxu0 }
 0x4a7   :  { %v1512_v45 = vadd.f32 %v5707_v8, %v1470_v22  ;;  %v1465_v40 = vadd.f32 %v1464_v36, %v1271_v37 }
 0x4a9   :  { %v6611_v2 = vadd.f32 %v6506_v21, %v1512_v45  ;;  %v1511_v43 = vadd.f32 %v5708_v19, %v1465_v40 }
 0x4ab   :  { %v6617_v53 = vadd.f32 %v6506_v21, %v1511_v43  ;;  %v1628_v17 = vmul.f32 %v6611_v2, %v6512_v26  ;;  %v1548_v55 = vmul.f32 %v6501_v0, %v6611_v2  ;;  %v5038_v61 = vpop.f32.mrf.mxu1 }
 0x4ad   :  { %v1662_v15 = vsel %vm104_vm0, %v1628_v17, 0.0  ;;  %v1582_v28 = vsel %vm104_vm0, %v1548_v55, 0.0  ;;  %v1627_v7 = vmul.f32 %v6617_v53, %v6512_v26  ;;  %v1547_v57 = vmul.f32 %v6501_v0, %v6617_v53  ;;  %v1281_v3 = vpop.f32.mrf.mxu1 }
 0x4ae   :  { %1663 = vadd.xlane.f32.xlu0 %v1662_v15  ;;  %1583 = vadd.xlane.f32.xlu1 %v1582_v28 }
 0x4af   :  { %v1659_v42 = vsel %vm104_vm0, %v1627_v7, 0.0  ;;  %v1579_v10 = vsel %vm104_vm0, %v1547_v57, 0.0  ;;  %v5714_v7 = vld [vmem:[%s8398_s0 + $0x70] sm:$0xff] }
 0x4b0   :  { %v5094_v60 = vpop.f32.mrf.mxu0 }
 0x4b1   :  { %v1480_v58 = vadd.f32 %v5094_v60, %v5038_v61  ;;  %v5713_v61 = vld [vmem:[%s8398_s0 + $0x78] sm:$0xff] }
 0x4b2   :  { %v1474_v54 = vpop.f32.mrf.mxu0  ;;  %1660 = vadd.xlane.f32.xlu0 %v1659_v42  ;;  %1580 = vadd.xlane.f32.xlu1 %v1579_v10 }
 0x4b3   :  { %v1514_v62 = vadd.f32 %v5709_v20, %v1480_v58  ;;  %v1475_v46 = vadd.f32 %v1474_v54, %v1281_v3 }
 0x4b5   :  { %v6635_v35 = vadd.f32 %v6506_v21, %v1514_v62  ;;  %v1513_v18 = vadd.f32 %v5710_v25, %v1475_v46 }
 0x4b7   :  { %v6641_v14 = vadd.f32 %v6506_v21, %v1513_v18  ;;  %v1630_v5 = vmul.f32 %v6635_v35, %v6512_v26  ;;  %v1550_v11 = vmul.f32 %v6501_v0, %v6635_v35  ;;  %v5041_v16 = vpop.f32.mrf.mxu1 }
 0x4b9   :  { %v1668_v1 = vsel %vm104_vm0, %v1630_v5, 0.0  ;;  %v1588_v38 = vsel %vm104_vm0, %v1550_v11, 0.0  ;;  %v1629_v32 = vmul.f32 %v6641_v14, %v6512_v26  ;;  %v1549_v27 = vmul.f32 %v6501_v0, %v6641_v14  ;;  %v1291_v29 = vpop.f32.mrf.mxu1 }
 0x4ba   :  { %1669 = vadd.xlane.f32.xlu0 %v1668_v1  ;;  %1589 = vadd.xlane.f32.xlu1 %v1588_v38 }
 0x4bb   :  { %v1665_v4 = vsel %vm104_vm0, %v1629_v32, 0.0  ;;  %v1585_v51 = vsel %vm104_vm0, %v1549_v27, 0.0 }
 0x4bc   :  { %v5097_v52 = vpop.f32.mrf.mxu0 }
 0x4bd   :  { %v1490_v49 = vadd.f32 %v5097_v52, %v5041_v16 }
 0x4be   :  { %1666 = vadd.xlane.f32.xlu0 %v1665_v4  ;;  %1586 = vadd.xlane.f32.xlu1 %v1585_v51  ;;  %v1484_v30 = vpop.f32.mrf.mxu0 }
 0x4bf   :  { %v1516_v48 = vadd.f32 %v5711_v39, %v1490_v49  ;;  %v1485_v12 = vadd.f32 %v1484_v30, %v1291_v29 }
 0x4c1   :  { %v6659_v56 = vadd.f32 %v6506_v21, %v1516_v48  ;;  %v1515_v41 = vadd.f32 %v5712_v31, %v1485_v12 }
 0x4c3   :  { %v6665_v23 = vadd.f32 %v6506_v21, %v1515_v41  ;;  %v1632_v44 = vmul.f32 %v6659_v56, %v6512_v26  ;;  %v1552_v13 = vmul.f32 %v6501_v0, %v6659_v56  ;;  %v5100_v40 = vpop.f32.mrf.mxu0 }
 0x4c5   :  { %v1674_v59 = vsel %vm104_vm0, %v1632_v44, 0.0  ;;  %v1594_v22 = vsel %vm104_vm0, %v1552_v13, 0.0  ;;  %v1631_v37 = vmul.f32 %v6665_v23, %v6512_v26  ;;  %v1551_v36 = vmul.f32 %v6501_v0, %v6665_v23  ;;  %v1494_v17 = vpop.f32.mrf.mxu0 }
 0x4c6   :  { %1675 = vadd.xlane.f32.xlu0 %v1674_v59  ;;  %1595 = vadd.xlane.f32.xlu1 %v1594_v22 }
 0x4c7   :  { %v1671_v8 = vsel %vm104_vm0, %v1631_v37, 0.0  ;;  %v1591_v45 = vsel %vm104_vm0, %v1551_v36, 0.0 }
 0x4ca   :  { %1672 = vadd.xlane.f32.xlu0 %v1671_v8  ;;  %1592 = vadd.xlane.f32.xlu1 %v1591_v45 }
 0x4dd   :  { %v5044_v19 = vpop.f32.mrf.mxu1 }
 0x4de   :  { %v1500_v43 = vadd.f32 %v5100_v40, %v5044_v19 }
 0x4df   :  { %v1301_v55 = vpop.f32.mrf.mxu1 }
 0x4e0   :  { %v1518_v15 = vadd.f32 %v5713_v61, %v1500_v43  ;;  %v1495_v28 = vadd.f32 %v1494_v17, %v1301_v55 }
 0x4e2   :  { %v1517_v57 = vadd.f32 %v5714_v7, %v1495_v28  ;;  %v6686_v60 = vadd.f32 %v6506_v21, %v1518_v15 }
 0x4e4   :  { %v6689_v58 = vadd.f32 %v6506_v21, %v1517_v57  ;;  %v1634_v20 = vmul.f32 %v6686_v60, %v6512_v26  ;;  %v1554_v62 = vmul.f32 %v6501_v0, %v6686_v60 }
 0x4e6   :  { %v1633_v3 = vmul.f32 %v6689_v58, %v6512_v26  ;;  %v1553_v42 = vmul.f32 %v6501_v0, %v6689_v58  ;;  %v1680_v21 = vsel %vm104_vm0, %v1634_v20, 0.0  ;;  %v1600_v46 = vsel %vm104_vm0, %v1554_v62, 0.0 }
 0x4e8   :  { %v1677_v10 = vsel %vm104_vm0, %v1633_v3, 0.0  ;;  %v1597_v54 = vsel %vm104_vm0, %v1553_v42, 0.0 }
 0x4e9   :  { %1678 = vadd.xlane.f32.xlu0 %v1677_v10  ;;  %1598 = vadd.xlane.f32.xlu1 %v1597_v54 }
 0x4ed   :  { %1681 = vadd.xlane.f32.xlu0 %v1680_v21  ;;  %1601 = vadd.xlane.f32.xlu1 %v1600_v46 }
 0x507   :  { %v1560_v25 = vpop.xlane.xlu1 %1559  ;;  %v1640_v18 = vpop.xlane.xlu0 %1639 }
 0x508   :  { %v1604_v5 = vmul.f32 %v6501_v0, %v1560_v25  ;;  %v1684_v11 = vmul.f32 %v1640_v18, %v6512_v26 }
 0x50a   :  { %v1700_v1 = vadd.f32 %v1684_v11, %v1604_v5 }
 0x50b   :  { %v1557_v38 = vpop.xlane.xlu1 %1556  ;;  %v1637_v32 = vpop.xlane.xlu0 %1636 }
 0x50c   :  { %v1716_v27 = vmul.f32 0.125, %v1700_v1  ;;  %v1603_v16 = vmul.f32 %v6501_v0, %v1557_v38  ;;  %v1683_v52 = vmul.f32 %v1637_v32, %v6512_v26 }
 0x50e   :  { %v6708_v49 = vsub.f32 %v6515_v33, %v1716_v27  ;;  %v1699_v4 = vadd.f32 %v1683_v52, %v1603_v16 }
 0x510   :  { %v1715_v51 = vmul.f32 0.125, %v1699_v4  ;;  %v1764_v29 = vmul.f32 %v6708_v49, %v6512_v26  ;;  %v1748_v30 = vmul.f32 %v6501_v0, %v6708_v49 }
 0x512   :  { %v6715_v39 = vsub.f32 %v6521_v34, %v1715_v51  ;;  %v1860_v48 = vmul.f32 %v1764_v29, %v1764_v29  ;;  %v1780_v12 = vmul.f32 %v1748_v30, %v1748_v30 }
 0x513   :  { %v1566_v31 = vpop.xlane.xlu1 %1565  ;;  %v1646_v41 = vpop.xlane.xlu0 %1645 }
 0x514   :  { %v1606_v44 = vmul.f32 %v6501_v0, %v1566_v31  ;;  %v1686_v33 = vmul.f32 %v1646_v41, %v6512_v26  ;;  %v1878_v13 = vsel %vm104_vm0, %v1860_v48, 0.0  ;;  %v1798_v59 = vsel %vm104_vm0, %v1780_v12, 0.0 }
 0x515   :  { %1879 = vadd.xlane.f32.xlu0 %v1878_v13  ;;  %1799 = vadd.xlane.f32.xlu1 %v1798_v59  ;;  %v1763_v22 = vmul.f32 %v6715_v39, %v6512_v26  ;;  %v1747_v34 = vmul.f32 %v6501_v0, %v6715_v39 }
 0x516   :  { %v1702_v37 = vadd.f32 %v1686_v33, %v1606_v44 }
 0x517   :  { %v1563_v36 = vpop.xlane.xlu1 %1562  ;;  %v1643_v8 = vpop.xlane.xlu0 %1642  ;;  %v1859_v45 = vmul.f32 %v1763_v22, %v1763_v22  ;;  %v1779_v40 = vmul.f32 %v1747_v34, %v1747_v34 }
 0x518   :  { %v1718_v19 = vmul.f32 0.125, %v1702_v37  ;;  %v1605_v43 = vmul.f32 %v6501_v0, %v1563_v36  ;;  %v1685_v17 = vmul.f32 %v1643_v8, %v6512_v26 }
 0x519   :  { %v1875_v55 = vsel %vm104_vm0, %v1859_v45, 0.0  ;;  %v1795_v61 = vsel %vm104_vm0, %v1779_v40, 0.0 }
 0x51a   :  { %v6730_v15 = vsub.f32 %v6539_v50, %v1718_v19  ;;  %v1701_v28 = vadd.f32 %v1685_v17, %v1605_v43  ;;  %1876 = vadd.xlane.f32.xlu0 %v1875_v55  ;;  %1796 = vadd.xlane.f32.xlu1 %v1795_v61 }
 0x51c   :  { %v1717_v7 = vmul.f32 0.125, %v1701_v28  ;;  %v1766_v57 = vmul.f32 %v6730_v15, %v6512_v26  ;;  %v1750_v3 = vmul.f32 %v6501_v0, %v6730_v15 }
 0x51e   :  { %v6737_v42 = vsub.f32 %v6545_v47, %v1717_v7  ;;  %v1862_v10 = vmul.f32 %v1766_v57, %v1766_v57  ;;  %v1782_v54 = vmul.f32 %v1750_v3, %v1750_v3 }
 0x520   :  { %v1572_v20 = vpop.xlane.xlu1 %1571  ;;  %v1652_v62 = vpop.xlane.xlu0 %1651  ;;  %v1884_v50 = vsel %vm104_vm0, %v1862_v10, 0.0  ;;  %v1804_v21 = vsel %vm104_vm0, %v1782_v54, 0.0  ;;  %v1765_v46 = vmul.f32 %v6737_v42, %v6512_v26  ;;  %v1749_v25 = vmul.f32 %v6501_v0, %v6737_v42 }
 0x521   :  { %v1608_v18 = vmul.f32 %v6501_v0, %v1572_v20  ;;  %v1688_v5 = vmul.f32 %v1652_v62, %v6512_v26  ;;  %1885 = vadd.xlane.f32.xlu0 %v1884_v50  ;;  %1805 = vadd.xlane.f32.xlu1 %v1804_v21 }
 0x522   :  { %v1861_v47 = vmul.f32 %v1765_v46, %v1765_v46  ;;  %v1781_v11 = vmul.f32 %v1749_v25, %v1749_v25 }
 0x523   :  { %v1704_v1 = vadd.f32 %v1688_v5, %v1608_v18 }
 0x524   :  { %v1569_v38 = vpop.xlane.xlu1 %1568  ;;  %v1649_v32 = vpop.xlane.xlu0 %1648  ;;  %v1881_v27 = vsel %vm104_vm0, %v1861_v47, 0.0  ;;  %v1801_v16 = vsel %vm104_vm0, %v1781_v11, 0.0 }
 0x525   :  { %v1720_v52 = vmul.f32 0.125, %v1704_v1  ;;  %v1607_v4 = vmul.f32 %v6501_v0, %v1569_v38  ;;  %v1687_v51 = vmul.f32 %v1649_v32, %v6512_v26  ;;  %1882 = vadd.xlane.f32.xlu0 %v1881_v27  ;;  %1802 = vadd.xlane.f32.xlu1 %v1801_v16 }
 0x527   :  { %v6752_v29 = vsub.f32 %v6563_v6, %v1720_v52  ;;  %v1703_v30 = vadd.f32 %v1687_v51, %v1607_v4  ;;  %v2061_v51 = vld [vmem:[#allocation2 + $0x18] sm:$0xff] }
 0x528   :  { %5101 = vmatprep.subr.mxu1 %v2061_v51 }
 0x529   :  { %v1719_v48 = vmul.f32 0.125, %v1703_v30  ;;  %v1768_v12 = vmul.f32 %v6752_v29, %v6512_v26  ;;  %v1752_v31 = vmul.f32 %v6501_v0, %v6752_v29  ;;  %5102 = vmatpush3.msra.mxu1 %v2061_v51 }
 0x52b   :  { %v6759_v41 = vsub.f32 %v6569_v24, %v1719_v48  ;;  %v1578_v44 = vpop.xlane.xlu1 %1577  ;;  %v1658_v33 = vpop.xlane.xlu0 %1657  ;;  %v1864_v13 = vmul.f32 %v1768_v12, %v1768_v12  ;;  %v1784_v59 = vmul.f32 %v1752_v31, %v1752_v31  ;;  %v2060_v31 = vld [vmem:[#allocation2 + $0x10] sm:$0xff] }
 0x52c   :  { %v1610_v22 = vmul.f32 %v6501_v0, %v1578_v44  ;;  %v1690_v6 = vmul.f32 %v1658_v33, %v6512_v26  ;;  %5103 = vmatprep.subr.mxu1 %v2060_v31 }
 0x52d   :  { %v1890_v34 = vsel %vm104_vm0, %v1864_v13, 0.0  ;;  %v1810_v37 = vsel %vm104_vm0, %v1784_v59, 0.0  ;;  %v1767_v36 = vmul.f32 %v6759_v41, %v6512_v26  ;;  %v1751_v8 = vmul.f32 %v6501_v0, %v6759_v41  ;;  %5104 = vmatpush3.msra.mxu1 %v2060_v31 }
 0x52e   :  { %v1706_v24 = vadd.f32 %v1690_v6, %v1610_v22  ;;  %1891 = vadd.xlane.f32.xlu0 %v1890_v34  ;;  %1811 = vadd.xlane.f32.xlu1 %v1810_v37 }
 0x52f   :  { %v1575_v45 = vpop.xlane.xlu1 %1574  ;;  %v1655_v40 = vpop.xlane.xlu0 %1654  ;;  %v1863_v19 = vmul.f32 %v1767_v36, %v1767_v36  ;;  %v1783_v43 = vmul.f32 %v1751_v8, %v1751_v8 }
 0x530   :  { %v1722_v17 = vmul.f32 0.125, %v1706_v24  ;;  %v1609_v55 = vmul.f32 %v6501_v0, %v1575_v45  ;;  %v1689_v61 = vmul.f32 %v1655_v40, %v6512_v26 }
 0x531   :  { %v1887_v28 = vsel %vm104_vm0, %v1863_v19, 0.0  ;;  %v1807_v7 = vsel %vm104_vm0, %v1783_v43, 0.0 }
 0x532   :  { %v6774_v57 = vsub.f32 %v6587_v9, %v1722_v17  ;;  %v1705_v3 = vadd.f32 %v1689_v61, %v1609_v55  ;;  %1888 = vadd.xlane.f32.xlu0 %v1887_v28  ;;  %1808 = vadd.xlane.f32.xlu1 %v1807_v7 }
 0x534   :  { %v1721_v10 = vmul.f32 0.125, %v1705_v3  ;;  %v1770_v54 = vmul.f32 %v6774_v57, %v6512_v26  ;;  %v1754_v20 = vmul.f32 %v6501_v0, %v6774_v57 }
 0x536   :  { %v6781_v62 = vsub.f32 %v6593_v63, %v1721_v10  ;;  %v1866_v50 = vmul.f32 %v1770_v54, %v1770_v54  ;;  %v1786_v21 = vmul.f32 %v1754_v20, %v1754_v20 }
 0x537   :  { %v1584_v46 = vpop.xlane.xlu1 %1583  ;;  %v1664_v25 = vpop.xlane.xlu0 %1663 }
 0x538   :  { %v1896_v9 = vsel %vm104_vm0, %v1866_v50, 0.0  ;;  %v1816_v18 = vsel %vm104_vm0, %v1786_v21, 0.0  ;;  %v1769_v5 = vmul.f32 %v6781_v62, %v6512_v26  ;;  %v1753_v47 = vmul.f32 %v6501_v0, %v6781_v62 }
 0x539   :  { %v1612_v11 = vmul.f32 %v6501_v0, %v1584_v46  ;;  %v1692_v1 = vmul.f32 %v1664_v25, %v6512_v26  ;;  %1897 = vadd.xlane.f32.xlu0 %v1896_v9  ;;  %1817 = vadd.xlane.f32.xlu1 %v1816_v18 }
 0x53a   :  { %v1865_v63 = vmul.f32 %v1769_v5, %v1769_v5  ;;  %v1785_v38 = vmul.f32 %v1753_v47, %v1753_v47 }
 0x53b   :  { %v1708_v32 = vadd.f32 %v1692_v1, %v1612_v11  ;;  %v1581_v27 = vpop.xlane.xlu1 %1580  ;;  %v1661_v16 = vpop.xlane.xlu0 %1660 }
 0x53c   :  { %v1893_v52 = vsel %vm104_vm0, %v1865_v63, 0.0  ;;  %v1813_v4 = vsel %vm104_vm0, %v1785_v38, 0.0  ;;  %v1611_v48 = vmul.f32 %v6501_v0, %v1581_v27  ;;  %v1691_v12 = vmul.f32 %v1661_v16, %v6512_v26 }
 0x53d   :  { %v1724_v30 = vmul.f32 0.125, %v1708_v32  ;;  %1894 = vadd.xlane.f32.xlu0 %v1893_v52  ;;  %1814 = vadd.xlane.f32.xlu1 %v1813_v4 }
 0x53e   :  { %v1707_v33 = vadd.f32 %v1691_v12, %v1611_v48 }
 0x53f   :  { %v6796_v44 = vsub.f32 %v6611_v2, %v1724_v30 }
 0x540   :  { %v1723_v13 = vmul.f32 0.125, %v1707_v33 }
 0x541   :  { %v1772_v59 = vmul.f32 %v6796_v44, %v6512_v26  ;;  %v1756_v22 = vmul.f32 %v6501_v0, %v6796_v44 }
 0x542   :  { %v6803_v6 = vsub.f32 %v6617_v53, %v1723_v13 }
 0x543   :  { %v1590_v34 = vpop.xlane.xlu1 %1589  ;;  %v1670_v37 = vpop.xlane.xlu0 %1669  ;;  %v1868_v36 = vmul.f32 %v1772_v59, %v1772_v59  ;;  %v1788_v8 = vmul.f32 %v1756_v22, %v1756_v22 }
 0x544   :  { %v1614_v2 = vmul.f32 %v6501_v0, %v1590_v34  ;;  %v1694_v24 = vmul.f32 %v1670_v37, %v6512_v26  ;;  %v1771_v19 = vmul.f32 %v6803_v6, %v6512_v26  ;;  %v1755_v43 = vmul.f32 %v6501_v0, %v6803_v6 }
 0x545   :  { %v1902_v45 = vsel %vm104_vm0, %v1868_v36, 0.0  ;;  %v1822_v40 = vsel %vm104_vm0, %v1788_v8, 0.0 }
 0x546   :  { %v1710_v53 = vadd.f32 %v1694_v24, %v1614_v2  ;;  %1903 = vadd.xlane.f32.xlu0 %v1902_v45  ;;  %1823 = vadd.xlane.f32.xlu1 %v1822_v40  ;;  %v1867_v61 = vmul.f32 %v1771_v19, %v1771_v19  ;;  %v1787_v28 = vmul.f32 %v1755_v43, %v1755_v43 }
 0x547   :  { %v1587_v17 = vpop.xlane.xlu1 %1586  ;;  %v1667_v55 = vpop.xlane.xlu0 %1666 }
 0x548   :  { %v1726_v7 = vmul.f32 0.125, %v1710_v53  ;;  %v1613_v3 = vmul.f32 %v6501_v0, %v1587_v17  ;;  %v1693_v10 = vmul.f32 %v1667_v55, %v6512_v26  ;;  %v1899_v54 = vsel %vm104_vm0, %v1867_v61, 0.0 }
 0x549   :  { %v1819_v20 = vsel %vm104_vm0, %v1787_v28, 0.0 }
 0x54a   :  { %v6818_v50 = vsub.f32 %v6635_v35, %v1726_v7  ;;  %v1709_v21 = vadd.f32 %v1693_v10, %v1613_v3  ;;  %1900 = vadd.xlane.f32.xlu0 %v1899_v54  ;;  %1820 = vadd.xlane.f32.xlu1 %v1819_v20 }
 0x54c   :  { %v1725_v46 = vmul.f32 0.125, %v1709_v21  ;;  %v1774_v25 = vmul.f32 %v6818_v50, %v6512_v26  ;;  %v1758_v9 = vmul.f32 %v6501_v0, %v6818_v50 }
 0x54e   :  { %v6825_v18 = vsub.f32 %v6641_v14, %v1725_v46  ;;  %v1870_v5 = vmul.f32 %v1774_v25, %v1774_v25  ;;  %v1790_v47 = vmul.f32 %v1758_v9, %v1758_v9 }
 0x54f   :  { %v1596_v11 = vpop.xlane.xlu1 %1595  ;;  %v1676_v1 = vpop.xlane.xlu0 %1675 }
 0x550   :  { %v1616_v35 = vmul.f32 %v6501_v0, %v1596_v11  ;;  %v1696_v63 = vmul.f32 %v1676_v1, %v6512_v26  ;;  %v1908_v38 = vsel %vm104_vm0, %v1870_v5, 0.0  ;;  %v1828_v32 = vsel %vm104_vm0, %v1790_v47, 0.0 }
 0x551   :  { %1909 = vadd.xlane.f32.xlu0 %v1908_v38  ;;  %1829 = vadd.xlane.f32.xlu1 %v1828_v32  ;;  %v1773_v27 = vmul.f32 %v6825_v18, %v6512_v26  ;;  %v1757_v14 = vmul.f32 %v6501_v0, %v6825_v18 }
 0x552   :  { %v1712_v16 = vadd.f32 %v1696_v63, %v1616_v35 }
 0x553   :  { %v1593_v52 = vpop.xlane.xlu1 %1592  ;;  %v1673_v4 = vpop.xlane.xlu0 %1672  ;;  %v1869_v51 = vmul.f32 %v1773_v27, %v1773_v27  ;;  %v1789_v30 = vmul.f32 %v1757_v14, %v1757_v14 }
 0x554   :  { %v1728_v48 = vmul.f32 0.125, %v1712_v16  ;;  %v1615_v12 = vmul.f32 %v6501_v0, %v1593_v52  ;;  %v1695_v31 = vmul.f32 %v1673_v4, %v6512_v26 }
 0x555   :  { %v1905_v33 = vsel %vm104_vm0, %v1869_v51, 0.0  ;;  %v1825_v13 = vsel %vm104_vm0, %v1789_v30, 0.0 }
 0x556   :  { %v6840_v59 = vsub.f32 %v6659_v56, %v1728_v48  ;;  %v1711_v22 = vadd.f32 %v1695_v31, %v1615_v12  ;;  %1906 = vadd.xlane.f32.xlu0 %v1905_v33  ;;  %1826 = vadd.xlane.f32.xlu1 %v1825_v13 }
 0x558   :  { %v1727_v34 = vmul.f32 0.125, %v1711_v22  ;;  %v1776_v37 = vmul.f32 %v6840_v59, %v6512_v26  ;;  %v1760_v36 = vmul.f32 %v6501_v0, %v6840_v59 }
 0x55a   :  { %v6847_v8 = vsub.f32 %v6665_v23, %v1727_v34  ;;  %v1872_v2 = vmul.f32 %v1776_v37, %v1776_v37  ;;  %v1792_v24 = vmul.f32 %v1760_v36, %v1760_v36 }
 0x55c   :  { %v1914_v45 = vsel %vm104_vm0, %v1872_v2, 0.0  ;;  %v1834_v56 = vsel %vm104_vm0, %v1792_v24, 0.0  ;;  %v1775_v40 = vmul.f32 %v6847_v8, %v6512_v26  ;;  %v1759_v19 = vmul.f32 %v6501_v0, %v6847_v8 }
 0x55d   :  { %1915 = vadd.xlane.f32.xlu0 %v1914_v45  ;;  %1835 = vadd.xlane.f32.xlu1 %v1834_v56 }
 0x55e   :  { %v1871_v43 = vmul.f32 %v1775_v40, %v1775_v40  ;;  %v1791_v53 = vmul.f32 %v1759_v19, %v1759_v19 }
 0x560   :  { %v1911_v17 = vsel %vm104_vm0, %v1871_v43, 0.0  ;;  %v1831_v23 = vsel %vm104_vm0, %v1791_v53, 0.0 }
 0x561   :  { %1912 = vadd.xlane.f32.xlu0 %v1911_v17  ;;  %1832 = vadd.xlane.f32.xlu1 %v1831_v23 }
 0x572   :  { %v1599_v55 = vpop.xlane.xlu1 %1598  ;;  %v1679_v61 = vpop.xlane.xlu0 %1678 }
 0x573   :  { %v1617_v28 = vmul.f32 %v6501_v0, %v1599_v55  ;;  %v1697_v7 = vmul.f32 %v1679_v61, %v6512_v26 }
 0x575   :  { %v1713_v3 = vadd.f32 %v1697_v7, %v1617_v28 }
 0x576   :  { %v1602_v10 = vpop.xlane.xlu1 %1601  ;;  %v1682_v54 = vpop.xlane.xlu0 %1681 }
 0x577   :  { %v1729_v20 = vmul.f32 0.125, %v1713_v3  ;;  %v1618_v21 = vmul.f32 %v6501_v0, %v1602_v10  ;;  %v1698_v46 = vmul.f32 %v1682_v54, %v6512_v26 }
 0x579   :  { %v6862_v25 = vsub.f32 %v6689_v58, %v1729_v20  ;;  %v1714_v9 = vadd.f32 %v1698_v46, %v1618_v21 }
 0x57b   :  { %v1730_v5 = vmul.f32 0.125, %v1714_v9  ;;  %v1777_v47 = vmul.f32 %v6862_v25, %v6512_v26  ;;  %v1761_v11 = vmul.f32 %v6501_v0, %v6862_v25 }
 0x57d   :  { %v6869_v1 = vsub.f32 %v6686_v60, %v1730_v5  ;;  %v1873_v35 = vmul.f32 %v1777_v47, %v1777_v47  ;;  %v1793_v63 = vmul.f32 %v1761_v11, %v1761_v11  ;;  %v6893_v47 = vld [vmem:[%s8402_s4] ss:$0 sm:$0xff] }
 0x57f   :  { %v1917_v38 = vsel %vm104_vm0, %v1873_v35, 0.0  ;;  %v1837_v32 = vsel %vm104_vm0, %v1793_v63, 0.0  ;;  %v1778_v58 = vmul.f32 %v6869_v1, %v6512_v26  ;;  %v1762_v27 = vmul.f32 %v6501_v0, %v6869_v1 }
 0x580   :  { %1918 = vadd.xlane.f32.xlu0 %v1917_v38  ;;  %1838 = vadd.xlane.f32.xlu1 %v1837_v32 }
 0x581   :  { %v1874_v14 = vmul.f32 %v1778_v58, %v1778_v58  ;;  %v1794_v16 = vmul.f32 %v1762_v27, %v1762_v27 }
 0x583   :  { %v1920_v52 = vsel %vm104_vm0, %v1874_v14, 0.0  ;;  %v1840_v60 = vsel %vm104_vm0, %v1794_v16, 0.0  ;;  %v6902_v16 = vld [vmem:[%s8402_s4 + $0x1] ss:$0 sm:$0xff] }
 0x584   :  { %1921 = vadd.xlane.f32.xlu0 %v1920_v52  ;;  %1841 = vadd.xlane.f32.xlu1 %v1840_v60 }
 0x59e   :  { %v1800_v4 = vpop.xlane.xlu1 %1799  ;;  %v1880_v51 = vpop.xlane.xlu0 %1879 }
 0x59f   :  { %v1844_v30 = vmul.f32 %v6501_v0, %v1800_v4  ;;  %v1924_v48 = vmul.f32 %v1880_v51, %v6512_v26 }
 0x5a1   :  { %v1940_v12 = vadd.f32 %v1924_v48, %v1844_v30 }
 0x5a3   :  { %v1956_v31 = vmul.f32 0.125, %v1940_v12  ;;  %v1797_v33 = vpop.xlane.xlu1 %1796  ;;  %v1877_v13 = vpop.xlane.xlu0 %1876 }
 0x5a4   :  { %v1843_v22 = vmul.f32 %v6501_v0, %v1797_v33  ;;  %v1923_v34 = vmul.f32 %v1877_v13, %v6512_v26 }
 0x5a5   :  { %v1972_v37 = vadd.f32 1e-05, %v1956_v31 }
 0x5a6   :  { %v1939_v36 = vadd.f32 %v1923_v34, %v1843_v22 }
 0x5a7   :  { %5523 = vrsqrt.f32 %v1972_v37 }
 0x5a8   :  { %v1955_v2 = vmul.f32 0.125, %v1939_v36 }
 0x5aa   :  { %v1971_v24 = vadd.f32 1e-05, %v1955_v2  ;;  %v1806_v45 = vpop.xlane.xlu1 %1805  ;;  %v1886_v56 = vpop.xlane.xlu0 %1885 }
 0x5ab   :  { %v1846_v40 = vmul.f32 %v6501_v0, %v1806_v45  ;;  %v1926_v19 = vmul.f32 %v1886_v56, %v6512_v26 }
 0x5ac   :  { %5525 = vrsqrt.f32 %v1971_v24 }
 0x5ad   :  { %v1942_v43 = vadd.f32 %v1926_v19, %v1846_v40 }
 0x5ae   :  { %v1803_v53 = vpop.xlane.xlu1 %1802  ;;  %v1883_v17 = vpop.xlane.xlu0 %1882 }
 0x5af   :  { %v1958_v23 = vmul.f32 0.125, %v1942_v43  ;;  %v1845_v55 = vmul.f32 %v6501_v0, %v1803_v53  ;;  %v1925_v61 = vmul.f32 %v1883_v17, %v6512_v26 }
 0x5b1   :  { %v1974_v28 = vadd.f32 1e-05, %v1958_v23  ;;  %v1941_v7 = vadd.f32 %v1925_v61, %v1845_v55 }
 0x5b3   :  { %5527 = vrsqrt.f32 %v1974_v28  ;;  %v1957_v3 = vmul.f32 0.125, %v1941_v7 }
 0x5b4   :  { %v5524_v10 = vpop.eup %5523 }
 0x5b5   :  { %v1973_v54 = vadd.f32 1e-05, %v1957_v3  ;;  %v2004_v20 = vmul.f32 %v5524_v10, %v6708_v49 }
 0x5b7   :  { %5529 = vrsqrt.f32 %v1973_v54  ;;  %v1812_v21 = vpop.xlane.xlu1 %1811  ;;  %v1892_v46 = vpop.xlane.xlu0 %1891  ;;  %v2024_v49 = vmul.f32 %v6893_v47, %v2004_v20 }
 0x5b8   :  { %v1848_v9 = vmul.f32 %v6501_v0, %v1812_v21  ;;  %v1928_v5 = vmul.f32 %v1892_v46, %v6512_v26 }
 0x5b9   :  { %v5526_v11 = vpop.eup %5525  ;;  %v2044_v51 = vadd.f32 %v6902_v16, %v2024_v49 }
 0x5ba   :  { %v1944_v35 = vadd.f32 %v1928_v5, %v1848_v9  ;;  %v2003_v63 = vmul.f32 %v5526_v11, %v6715_v39 }
 0x5bb   :  { %v1809_v38 = vpop.xlane.xlu1 %1808  ;;  %v1889_v32 = vpop.xlane.xlu0 %1888 }
 0x5bc   :  { %v1960_v58 = vmul.f32 0.125, %v1944_v35  ;;  %v1847_v27 = vmul.f32 %v6501_v0, %v1809_v38  ;;  %v1927_v14 = vmul.f32 %v1889_v32, %v6512_v26  ;;  %v2023_v52 = vmul.f32 %v6893_v47, %v2003_v63 }
 0x5be   :  { %v1976_v60 = vadd.f32 1e-05, %v1960_v58  ;;  %v1943_v4 = vadd.f32 %v1927_v14, %v1847_v27  ;;  %v2043_v39 = vadd.f32 %v6902_v16, %v2023_v52 }
 0x5c0   :  { %v5528_v30 = vpop.eup %5527  ;;  %5531 = vrsqrt.f32 %v1976_v60  ;;  %v1959_v48 = vmul.f32 0.125, %v1943_v4  ;;  %5105 = vmatprep.mubr.msk.f32.mxu1 %vm104_vm0, %v2043_v39 }
 0x5c1   :  { %5106 = vmatmul.mubr.msk.f32.vlgmr.msra.gmra.mxu1 %vm104_vm0, %v2044_v51  ;;  %v2006_v13 = vmul.f32 %v5528_v30, %v6730_v15 }
 0x5c2   :  { %v1975_v12 = vadd.f32 1e-05, %v1959_v48  ;;  %v1818_v31 = vpop.xlane.xlu1 %1817  ;;  %v1898_v33 = vpop.xlane.xlu0 %1897 }
 0x5c3   :  { %v1850_v22 = vmul.f32 %v6501_v0, %v1818_v31  ;;  %v1930_v34 = vmul.f32 %v1898_v33, %v6512_v26  ;;  %v2026_v56 = vmul.f32 %v6893_v47, %v2006_v13 }
 0x5c4   :  { %v5530_v37 = vpop.eup %5529  ;;  %5533 = vrsqrt.f32 %v1975_v12 }
 0x5c5   :  { %v1946_v36 = vadd.f32 %v1930_v34, %v1850_v22  ;;  %v2005_v2 = vmul.f32 %v5530_v37, %v6737_v42  ;;  %v2046_v55 = vadd.f32 %v6902_v16, %v2026_v56 }
 0x5c6   :  { %v1815_v24 = vpop.xlane.xlu1 %1814  ;;  %v1895_v45 = vpop.xlane.xlu0 %1894 }
 0x5c7   :  { %v1962_v40 = vmul.f32 0.125, %v1946_v36  ;;  %v1849_v19 = vmul.f32 %v6501_v0, %v1815_v24  ;;  %v1929_v43 = vmul.f32 %v1895_v45, %v6512_v26  ;;  %v2025_v15 = vmul.f32 %v6893_v47, %v2005_v2 }
 0x5c9   :  { %v1978_v53 = vadd.f32 1e-05, %v1962_v40  ;;  %v1945_v17 = vadd.f32 %v1929_v43, %v1849_v19  ;;  %v2045_v23 = vadd.f32 %v6902_v16, %v2025_v15 }
 0x5cb   :  { %5535 = vrsqrt.f32 %v1978_v53  ;;  %v1961_v61 = vmul.f32 0.125, %v1945_v17  ;;  %5108 = vmatprep.mubr.msk.f32.mxu1 %vm104_vm0, %v2045_v23 }
 0x5cc   :  { %5109 = vmatmul.mubr.msk.f32.gmra.mxu1 %vm104_vm0, %v2046_v55 }
 0x5cd   :  { %v5532_v42 = vpop.eup %5531  ;;  %v1977_v28 = vadd.f32 1e-05, %v1961_v61 }
 0x5ce   :  { %v2008_v10 = vmul.f32 %v5532_v42, %v6752_v29 }
 0x5cf   :  { %5537 = vrsqrt.f32 %v1977_v28  ;;  %v1824_v7 = vpop.xlane.xlu1 %1823  ;;  %v1904_v3 = vpop.xlane.xlu0 %1903 }
 0x5d0   :  { %v1852_v54 = vmul.f32 %v6501_v0, %v1824_v7  ;;  %v1932_v20 = vmul.f32 %v1904_v3, %v6512_v26  ;;  %v2028_v35 = vmul.f32 %v6893_v47, %v2008_v10 }
 0x5d1   :  { %v5534_v21 = vpop.eup %5533 }
 0x5d2   :  { %v1948_v46 = vadd.f32 %v1932_v20, %v1852_v54  ;;  %v2007_v9 = vmul.f32 %v5534_v21, %v6759_v41  ;;  %v2048_v14 = vadd.f32 %v6902_v16, %v2028_v35 }
 0x5d3   :  { %v1821_v5 = vpop.xlane.xlu1 %1820  ;;  %v1901_v11 = vpop.xlane.xlu0 %1900 }
 0x5d4   :  { %v1964_v63 = vmul.f32 0.125, %v1948_v46  ;;  %v1851_v38 = vmul.f32 %v6501_v0, %v1821_v5  ;;  %v1931_v32 = vmul.f32 %v1901_v11, %v6512_v26  ;;  %v2027_v49 = vmul.f32 %v6893_v47, %v2007_v9 }
 0x5d6   :  { %v1980_v29 = vadd.f32 1e-05, %v1964_v63  ;;  %v1947_v58 = vadd.f32 %v1931_v32, %v1851_v38  ;;  %v2047_v27 = vadd.f32 %v6902_v16, %v2027_v49 }
 0x5d8   :  { %v5536_v52 = vpop.eup %5535  ;;  %5539 = vrsqrt.f32 %v1980_v29  ;;  %v1963_v41 = vmul.f32 0.125, %v1947_v58  ;;  %5111 = vmatprep.mubr.msk.f32.mxu1 %vm104_vm0, %v2047_v27 }
 0x5d9   :  { %5112 = vmatmul.mubr.msk.f32.gmra.mxu1 %vm104_vm0, %v2048_v14  ;;  %v2010_v51 = vmul.f32 %v5536_v52, %v6774_v57 }
 0x5da   :  { %v1979_v60 = vadd.f32 1e-05, %v1963_v41  ;;  %v1830_v4 = vpop.xlane.xlu1 %1829  ;;  %v1910_v39 = vpop.xlane.xlu0 %1909 }
 0x5db   :  { %v1854_v30 = vmul.f32 %v6501_v0, %v1830_v4  ;;  %v1934_v48 = vmul.f32 %v1910_v39, %v6512_v26  ;;  %v2030_v13 = vmul.f32 %v6893_v47, %v2010_v51 }
 0x5dc   :  { %v5538_v12 = vpop.eup %5537  ;;  %5541 = vrsqrt.f32 %v1979_v60 }
 0x5dd   :  { %v1950_v31 = vadd.f32 %v1934_v48, %v1854_v30  ;;  %v2009_v33 = vmul.f32 %v5538_v12, %v6781_v62  ;;  %v2050_v40 = vadd.f32 %v6902_v16, %v2030_v13 }
 0x5df   :  { %v1966_v22 = vmul.f32 0.125, %v1950_v31  ;;  %v1827_v34 = vpop.xlane.xlu1 %1826  ;;  %v1907_v37 = vpop.xlane.xlu0 %1906  ;;  %v2029_v36 = vmul.f32 %v6893_v47, %v2009_v33 }
 0x5e0   :  { %v1853_v2 = vmul.f32 %v6501_v0, %v1827_v34  ;;  %v1933_v57 = vmul.f32 %v1907_v37, %v6512_v26 }
 0x5e1   :  { %v1982_v24 = vadd.f32 1e-05, %v1966_v22  ;;  %v2049_v45 = vadd.f32 %v6902_v16, %v2029_v36 }
 0x5e2   :  { %v1949_v56 = vadd.f32 %v1933_v57, %v1853_v2 }
 0x5e3   :  { %5543 = vrsqrt.f32 %v1982_v24  ;;  %5114 = vmatprep.mubr.msk.f32.mxu1 %vm104_vm0, %v2049_v45 }
 0x5e4   :  { %v1965_v62 = vmul.f32 0.125, %v1949_v56  ;;  %5115 = vmatmul.mubr.msk.f32.gmra.mxu1 %vm104_vm0, %v2050_v40 }
 0x5e5   :  { %v5540_v19 = vpop.eup %5539 }
 0x5e6   :  { %v1981_v43 = vadd.f32 1e-05, %v1965_v62  ;;  %v1836_v15 = vpop.xlane.xlu1 %1835  ;;  %v1916_v53 = vpop.xlane.xlu0 %1915  ;;  %v2012_v55 = vmul.f32 %v5540_v19, %v6796_v44 }
 0x5e7   :  { %v1856_v17 = vmul.f32 %v6501_v0, %v1836_v15  ;;  %v1936_v23 = vmul.f32 %v1916_v53, %v6512_v26 }
 0x5e8   :  { %5545 = vrsqrt.f32 %v1981_v43  ;;  %v2032_v21 = vmul.f32 %v6893_v47, %v2012_v55 }
 0x5e9   :  { %v5542_v61 = vpop.eup %5541  ;;  %v1952_v42 = vadd.f32 %v1936_v23, %v1856_v17 }
 0x5ea   :  { %v1833_v28 = vpop.xlane.xlu1 %1832  ;;  %v1913_v7 = vpop.xlane.xlu0 %1912  ;;  %v2011_v3 = vmul.f32 %v5542_v61, %v6803_v6  ;;  %v2052_v35 = vadd.f32 %v6902_v16, %v2032_v21 }
 0x5eb   :  { %v1968_v10 = vmul.f32 0.125, %v1952_v42  ;;  %v1855_v54 = vmul.f32 %v6501_v0, %v1833_v28  ;;  %v1935_v20 = vmul.f32 %v1913_v7, %v6512_v26 }
 0x5ec   :  { %v2031_v46 = vmul.f32 %v6893_v47, %v2011_v3 }
 0x5ed   :  { %v1984_v9 = vadd.f32 1e-05, %v1968_v10  ;;  %v1951_v5 = vadd.f32 %v1935_v20, %v1855_v54 }
 0x5ee   :  { %v2051_v44 = vadd.f32 %v6902_v16, %v2031_v46 }
 0x5ef   :  { %5547 = vrsqrt.f32 %v1984_v9  ;;  %v1967_v11 = vmul.f32 0.125, %v1951_v5 }
 0x5f0   :  { %v5544_v63 = vpop.eup %5543  ;;  %5117 = vmatprep.mubr.msk.f32.mxu1 %vm104_vm0, %v2051_v44 }
 0x5f1   :  { %v1983_v6 = vadd.f32 1e-05, %v1967_v11  ;;  %5118 = vmatmul.mubr.msk.f32.gmra.mxu1 %vm104_vm0, %v2052_v35  ;;  %v2014_v38 = vmul.f32 %v5544_v63, %v6818_v50 }
 0x5f3   :  { %5549 = vrsqrt.f32 %v1983_v6  ;;  %v2034_v29 = vmul.f32 %v6893_v47, %v2014_v38 }
 0x5f5   :  { %v5546_v32 = vpop.eup %5545  ;;  %v2054_v14 = vadd.f32 %v6902_v16, %v2034_v29 }
 0x5f6   :  { %v2013_v49 = vmul.f32 %v5546_v32, %v6825_v18 }
 0x5f8   :  { %v2033_v58 = vmul.f32 %v6893_v47, %v2013_v49 }
 0x5fa   :  { %v2053_v27 = vadd.f32 %v6902_v16, %v2033_v58 }
 0x5fc   :  { %v5548_v52 = vpop.eup %5547  ;;  %5120 = vmatprep.mubr.msk.f32.mxu1 %vm104_vm0, %v2053_v27 }
 0x5fd   :  { %5121 = vmatmul.mubr.msk.f32.gmra.mxu1 %vm104_vm0, %v2054_v14  ;;  %v2016_v41 = vmul.f32 %v5548_v52, %v6840_v59 }
 0x5ff   :  { %v2036_v18 = vmul.f32 %v6893_v47, %v2016_v41 }
 0x600   :  { %v5550_v60 = vpop.eup %5549 }
 0x601   :  { %v2015_v50 = vmul.f32 %v5550_v60, %v6847_v8  ;;  %v2056_v51 = vadd.f32 %v6902_v16, %v2036_v18 }
 0x603   :  { %v2035_v4 = vmul.f32 %v6893_v47, %v2015_v50 }
 0x605   :  { %v2055_v39 = vadd.f32 %v6902_v16, %v2035_v4 }
 0x607   :  { %5123 = vmatprep.mubr.msk.f32.mxu1 %vm104_vm0, %v2055_v39 }
 0x608   :  { %5124 = vmatmul.mubr.msk.f32.gmra.mxu1 %vm104_vm0, %v2056_v51 }
 0x609   :  { %v1839_v30 = vpop.xlane.xlu1 %1838  ;;  %v1919_v48 = vpop.xlane.xlu0 %1918 }
 0x60a   :  { %v1857_v12 = vmul.f32 %v6501_v0, %v1839_v30  ;;  %v1937_v59 = vmul.f32 %v1919_v48, %v6512_v26 }
 0x60c   :  { %v1953_v31 = vadd.f32 %v1937_v59, %v1857_v12 }
 0x60d   :  { %v1842_v8 = vpop.xlane.xlu1 %1841  ;;  %v1922_v33 = vpop.xlane.xlu0 %1921 }
 0x60e   :  { %v1969_v13 = vmul.f32 0.125, %v1953_v31  ;;  %v1858_v22 = vmul.f32 %v6501_v0, %v1842_v8  ;;  %v1938_v34 = vmul.f32 %v1922_v33, %v6512_v26 }
 0x610   :  { %v1985_v37 = vadd.f32 1e-05, %v1969_v13  ;;  %v1954_v36 = vadd.f32 %v1938_v34, %v1858_v22 }
 0x612   :  { %5551 = vrsqrt.f32 %v1985_v37  ;;  %v1970_v2 = vmul.f32 0.125, %v1954_v36 }
 0x614   :  { %v1986_v57 = vadd.f32 1e-05, %v1970_v2 }
 0x616   :  { %5553 = vrsqrt.f32 %v1986_v57 }
 0x61f   :  { %v5552_v24 = vpop.eup %5551 }
 0x620   :  { %v2017_v45 = vmul.f32 %v5552_v24, %v6862_v25  ;;  %v4472_v25 = vld [vmem:[%s8401_s3 + $0x1] ss:$0 sm:$0xff] }
 0x622   :  { %v2037_v56 = vmul.f32 %v6893_v47, %v2017_v45 }
 0x623   :  { %v5554_v40 = vpop.eup %5553 }
 0x624   :  { %v2057_v62 = vadd.f32 %v6902_v16, %v2037_v56  ;;  %v2018_v19 = vmul.f32 %v5554_v40, %v6869_v1 }
 0x626   :  { %5126 = vmatprep.mubr.msk.f32.mxu1 %vm104_vm0, %v2057_v62  ;;  %v2038_v43 = vmul.f32 %v6893_v47, %v2018_v19 }
 0x628   :  { %v2058_v15 = vadd.f32 %v6902_v16, %v2038_v43 }
 0x62a   :  { %5127 = vmatmul.mubr.msk.f32.gmra.mxu1 %vm104_vm0, %v2058_v15 }
 0x681   :  { %v5107_v53 = vpop.f32.mrf.mxu1 }
 0x682   :  { %v7070_v52 = vadd.f32 %v5107_v53, %v4472_v25 }
 0x683   :  { %v2181_v17 = vpop.f32.mrf.mxu1 }
 0x684   :  { %v6988_v23 = vadd.f32 %v4472_v25, %v2181_v17 }
 0x686   :  { %5161 = vmatprep.mubr.msk.f32.mxu0 %vm346_vm1, %v6988_v23 }
 0x68c   :  { %v5110_v1 = vpop.f32.mrf.mxu1 }
 0x68d   :  { %v7058_v27 = vadd.f32 %v5110_v1, %v4472_v25 }
 0x68e   :  { %v2191_v55 = vpop.f32.mrf.mxu1 }
 0x68f   :  { %v7064_v14 = vadd.f32 %v4472_v25, %v2191_v55 }
 0x699   :  { %v5113_v61 = vpop.f32.mrf.mxu1 }
 0x69a   :  { %v7046_v29 = vadd.f32 %v5113_v61, %v4472_v25 }
 0x69b   :  { %v2201_v42 = vpop.f32.mrf.mxu1 }
 0x69c   :  { %v7052_v58 = vadd.f32 %v4472_v25, %v2201_v42 }
 0x6a4   :  { %v5116_v47 = vpop.f32.mrf.mxu1 }
 0x6a5   :  { %v7034_v32 = vadd.f32 %v5116_v47, %v4472_v25 }
 0x6a6   :  { %v2211_v28 = vpop.f32.mrf.mxu1 }
 0x6a7   :  { %v7040_v49 = vadd.f32 %v4472_v25, %v2211_v28 }
 0x6b1   :  { %v5119_v16 = vpop.f32.mrf.mxu1 }
 0x6b2   :  { %v7022_v6 = vadd.f32 %v5119_v16, %v4472_v25 }
 0x6b3   :  { %v2221_v7 = vpop.f32.mrf.mxu1 }
 0x6b4   :  { %v7028_v38 = vadd.f32 %v4472_v25, %v2221_v7 }
 0x6bd   :  { %v5122_v3 = vpop.f32.mrf.mxu1 }
 0x6be   :  { %v7010_v35 = vadd.f32 %v5122_v3, %v4472_v25 }
 0x6bf   :  { %v2231_v10 = vpop.f32.mrf.mxu1 }
 0x6c0   :  { %v7016_v63 = vadd.f32 %v4472_v25, %v2231_v10 }
 0x6c8   :  { %v5125_v54 = vpop.f32.mrf.mxu1 }
 0x6c9   :  { %v6992_v20 = vadd.f32 %v5125_v54, %v4472_v25 }
 0x6ca   :  { %v2241_v21 = vpop.f32.mrf.mxu1 }
 0x6cb   :  { %2719 = vrot.lane.b32.xlu1 %v6992_v20, %s5780_s16  ;;  %v7004_v11 = vadd.f32 %v4472_v25, %v2241_v21 }
 0x6ea   :  { %v5128_v46 = vpop.f32.mrf.mxu1 }
 0x6eb   :  { %v6996_v9 = vadd.f32 %v5128_v46, %v4472_v25 }
 0x6ec   :  { %v2251_v5 = vpop.f32.mrf.mxu1 }
 0x6ed   :  { %v6998_v44 = vadd.f32 %v4472_v25, %v2251_v5  ;;  %2723 = vrot.lane.b32.xlu1 %v6996_v9, %s5780_s16 }
 0x6ef   :  { %2721 = vrot.lane.b32.xlu0 %v6998_v44, %s5780_s16 }
 0x6f1   :  { %2306 = vrot.lane.b32.xlu1 %v6996_v9, %s5779_s15 }
 0x6f3   :  { %2717 = vrot.lane.b32.xlu0 %v7004_v11, %s5780_s16 }
 0x6f5   :  { %2302 = vrot.lane.b32.xlu1 %v6992_v20, %s5779_s15 }
 0x6f7   :  { %2715 = vrot.lane.b32.xlu0 %v7010_v35, %s5780_s16 }
 0x6f9   :  { %2300 = vrot.lane.b32.xlu1 %v7004_v11, %s5779_s15 }
 0x6fb   :  { %2713 = vrot.lane.b32.xlu0 %v7016_v63, %s5780_s16 }
 0x6fd   :  { %2304 = vrot.lane.b32.xlu1 %v6998_v44, %s5779_s15 }
 0x6ff   :  { %2711 = vrot.lane.b32.xlu0 %v7022_v6, %s5780_s16 }
 0x701   :  { %2298 = vrot.lane.b32.xlu1 %v7010_v35, %s5779_s15 }
 0x703   :  { %2709 = vrot.lane.b32.xlu0 %v7028_v38, %s5780_s16 }
 0x705   :  { %2296 = vrot.lane.b32.xlu1 %v7016_v63, %s5779_s15 }
 0x707   :  { %2707 = vrot.lane.b32.xlu0 %v7034_v32, %s5780_s16 }
 0x709   :  { %2294 = vrot.lane.b32.xlu1 %v7022_v6, %s5779_s15 }
 0x70b   :  { %2705 = vrot.lane.b32.xlu0 %v7040_v49, %s5780_s16 }
 0x70d   :  { %2292 = vrot.lane.b32.xlu1 %v7028_v38, %s5779_s15 }
 0x70f   :  { %2703 = vrot.lane.b32.xlu0 %v7046_v29, %s5780_s16 }
 0x711   :  { %2290 = vrot.lane.b32.xlu1 %v7034_v32, %s5779_s15 }
 0x713   :  { %2701 = vrot.lane.b32.xlu0 %v7052_v58, %s5780_s16 }
 0x715   :  { %2288 = vrot.lane.b32.xlu1 %v7040_v49, %s5779_s15 }
 0x717   :  { %2699 = vrot.lane.b32.xlu0 %v7058_v27, %s5780_s16 }
 0x719   :  { %2286 = vrot.lane.b32.xlu1 %v7046_v29, %s5779_s15 }
 0x71b   :  { %2697 = vrot.lane.b32.xlu0 %v7064_v14, %s5780_s16 }
 0x71d   :  { %2284 = vrot.lane.b32.xlu1 %v7052_v58, %s5779_s15 }
 0x71f   :  { %2695 = vrot.lane.b32.xlu0 %v7070_v52, %s5780_s16 }
 0x721   :  { %2282 = vrot.lane.b32.xlu1 %v7058_v27, %s5779_s15 }
 0x723   :  { %2693 = vrot.lane.b32.xlu0 %v6988_v23, %s5780_s16 }
 0x725   :  { %2661 = vrot.lane.b32.xlu1 %v6988_v23, %s5781_s17 }
 0x727   :  { %2280 = vrot.lane.b32.xlu0 %v7064_v14, %s5779_s15 }
 0x729   :  { %2663 = vrot.lane.b32.xlu1 %v7070_v52, %s5781_s17 }
 0x72b   :  { %2665 = vrot.lane.b32.xlu0 %v7064_v14, %s5781_s17 }
 0x72d   :  { %2278 = vrot.lane.b32.xlu1 %v7070_v52, %s5779_s15 }
 0x72f   :  { %2667 = vrot.lane.b32.xlu0 %v7058_v27, %s5781_s17 }
 0x731   :  { %2669 = vrot.lane.b32.xlu1 %v7052_v58, %s5781_s17 }
 0x733   :  { %2276 = vrot.lane.b32.xlu0 %v6988_v23, %s5779_s15 }
 0x735   :  { %2671 = vrot.lane.b32.xlu1 %v7046_v29, %s5781_s17 }
 0x737   :  { %2673 = vrot.lane.b32.xlu0 %v7040_v49, %s5781_s17 }
 0x739   :  { %2675 = vrot.lane.b32.xlu1 %v7034_v32, %s5781_s17 }
 0x73b   :  { %2677 = vrot.lane.b32.xlu0 %v7028_v38, %s5781_s17 }
 0x73d   :  { %2679 = vrot.lane.b32.xlu1 %v7022_v6, %s5781_s17  ;;  %v2720_v41 = vpop.permute.xlu1 %2719 }
 0x73f   :  { %2681 = vrot.lane.b32.xlu0 %v7016_v63, %s5781_s17 }
 0x741   :  { %2683 = vrot.lane.b32.xlu1 %v7010_v35, %s5781_s17 }
 0x743   :  { %2685 = vrot.lane.b32.xlu0 %v7004_v11, %s5781_s17 }
 0x745   :  { %2687 = vrot.lane.b32.xlu1 %v6992_v20, %s5781_s17 }
 0x747   :  { %2689 = vrot.lane.b32.xlu0 %v6998_v44, %s5781_s17 }
 0x749   :  { %2691 = vrot.lane.b32.xlu1 %v6996_v9, %s5781_s17 }
 0x74b   :  { %3102 = vrot.lane.b32.xlu0 %v7004_v11, %s5783_s19 }
 0x74d   :  { %3108 = vrot.lane.b32.xlu1 %v6996_v9, %s5783_s19 }
 0x74f   :  { %3098 = vrot.lane.b32.xlu0 %v7016_v63, %s5783_s19 }
 0x751   :  { %3104 = vrot.lane.b32.xlu1 %v6992_v20, %s5783_s19 }
 0x753   :  { %3094 = vrot.lane.b32.xlu0 %v7028_v38, %s5783_s19 }
 0x755   :  { %3100 = vrot.lane.b32.xlu1 %v7010_v35, %s5783_s19 }
 0x757   :  { %3090 = vrot.lane.b32.xlu0 %v7040_v49, %s5783_s19 }
 0x759   :  { %3096 = vrot.lane.b32.xlu1 %v7022_v6, %s5783_s19 }
 0x75b   :  { %3086 = vrot.lane.b32.xlu0 %v7052_v58, %s5783_s19 }
 0x75d   :  { %3092 = vrot.lane.b32.xlu1 %v7034_v32, %s5783_s19 }
 0x75f   :  { %v2724_v60 = vpop.permute.xlu1 %2723  ;;  %3301 = vrot.lane.b32.xlu0 %v6996_v9, %s5782_s18 }
 0x760   :  { %5185 = vmatprep.subr.msk.mxu1 %vm346_vm1, %v2724_v60 }
 0x761   :  { %5186 = vmatpush3.xpose.msk.msra.mxu1 %vm346_vm1, %v2724_v60  ;;  %3088 = vrot.lane.b32.xlu1 %v7046_v29, %s5783_s19  ;;  %v2722_v50 = vpop.permute.xlu0 %2721 }
 0x762   :  { %5187 = vmatprep.subr.msk.mxu1 %vm346_vm1, %v2722_v50 }
 0x763   :  { %v2307_v18 = vpop.permute.xlu1 %2306  ;;  %3297 = vrot.lane.b32.xlu0 %v6992_v20, %s5782_s18 }
 0x764   :  { %5129 = vmatprep.subr.msk.mxu0 %vm346_vm1, %v2307_v18 }
 0x765   :  { %5130 = vmatpush3.xpose.msk.msra.mxu0 %vm346_vm1, %v2307_v18  ;;  %3084 = vrot.lane.b32.xlu1 %v7058_v27, %s5783_s19  ;;  %v2718_v4 = vpop.permute.xlu0 %2717 }
 0x766   :  { %5188 = vmatpush3.xpose.msk.msra.mxu1 %vm346_vm1, %v2722_v50 }
 0x767   :  { %5189 = vmatprep.subr.msk.mxu1 %vm346_vm1, %v2720_v41  ;;  %v2303_v39 = vpop.permute.xlu1 %2302  ;;  %3291 = vrot.lane.b32.xlu0 %v7016_v63, %s5782_s18 }
 0x769   :  { %3082 = vrot.lane.b32.xlu1 %v7064_v14, %s5783_s19  ;;  %v2716_v51 = vpop.permute.xlu0 %2715 }
 0x76a   :  { %5190 = vmatpush3.xpose.msk.msra.mxu1 %vm346_vm1, %v2720_v41 }
 0x76b   :  { %5191 = vmatprep.subr.msk.mxu1 %vm346_vm1, %v2718_v4  ;;  %v2301_v30 = vpop.permute.xlu1 %2300  ;;  %3287 = vrot.lane.b32.xlu0 %v7028_v38, %s5782_s18 }
 0x76d   :  { %3080 = vrot.lane.b32.xlu1 %v7070_v52, %s5783_s19  ;;  %v2714_v48 = vpop.permute.xlu0 %2713 }
 0x76e   :  { %5192 = vmatpush3.xpose.msk.msra.mxu1 %vm346_vm1, %v2718_v4 }
 0x76f   :  { %5193 = vmatprep.subr.msk.mxu1 %vm346_vm1, %v2716_v51  ;;  %v2305_v12 = vpop.permute.xlu1 %2304  ;;  %3283 = vrot.lane.b32.xlu0 %v7040_v49, %s5782_s18 }
 0x770   :  { %5131 = vmatprep.subr.msk.mxu0 %vm346_vm1, %v2305_v12 }
 0x771   :  { %3078 = vrot.lane.b32.xlu1 %v6988_v23, %s5783_s19  ;;  %5132 = vmatpush3.xpose.msk.msra.mxu0 %vm346_vm1, %v2305_v12  ;;  %v2712_v59 = vpop.permute.xlu0 %2711 }
 0x772   :  { %5194 = vmatpush3.xpose.msk.msra.mxu1 %vm346_vm1, %v2716_v51  ;;  %5133 = vmatprep.subr.msk.mxu0 %vm346_vm1, %v2303_v39 }
 0x773   :  { %5195 = vmatprep.subr.msk.mxu1 %vm346_vm1, %v2714_v48  ;;  %v2299_v31 = vpop.permute.xlu1 %2298  ;;  %3106 = vrot.lane.b32.xlu0 %v6998_v44, %s5783_s19 }
 0x775   :  { %3295 = vrot.lane.b32.xlu1 %v7004_v11, %s5782_s18  ;;  %5134 = vmatpush3.xpose.msk.msra.mxu0 %vm346_vm1, %v2303_v39  ;;  %v2710_v8 = vpop.permute.xlu0 %2709 }
 0x776   :  { %5196 = vmatpush3.xpose.msk.msra.mxu1 %vm346_vm1, %v2714_v48  ;;  %5135 = vmatprep.subr.msk.mxu0 %vm346_vm1, %v2301_v30 }
 0x777   :  { %5197 = vmatprep.subr.msk.mxu1 %vm346_vm1, %v2712_v59  ;;  %v2297_v33 = vpop.permute.xlu1 %2296 }
 0x779   :  { %3293 = vrot.lane.b32.xlu1 %v7010_v35, %s5782_s18  ;;  %5136 = vmatpush3.xpose.msk.msra.mxu0 %vm346_vm1, %v2301_v30  ;;  %v2708_v13 = vpop.permute.xlu0 %2707 }
 0x77a   :  { %5198 = vmatpush3.xpose.msk.msra.mxu1 %vm346_vm1, %v2712_v59  ;;  %5137 = vmatprep.subr.msk.mxu0 %vm346_vm1, %v2299_v31 }
 0x77b   :  { %5199 = vmatprep.subr.msk.mxu1 %vm346_vm1, %v2710_v8  ;;  %v2295_v22 = vpop.permute.xlu1 %2294 }
 0x77d   :  { %3289 = vrot.lane.b32.xlu1 %v7022_v6, %s5782_s18  ;;  %5138 = vmatpush3.xpose.msk.msra.mxu0 %vm346_vm1, %v2299_v31  ;;  %v2706_v34 = vpop.permute.xlu0 %2705 }
 0x77e   :  { %5200 = vmatpush3.xpose.msk.msra.mxu1 %vm346_vm1, %v2710_v8  ;;  %5139 = vmatprep.subr.msk.mxu0 %vm346_vm1, %v2297_v33 }
 0x77f   :  { %5201 = vmatprep.subr.msk.mxu1 %vm346_vm1, %v2708_v13  ;;  %v2293_v37 = vpop.permute.xlu1 %2292 }
 0x781   :  { %3285 = vrot.lane.b32.xlu1 %v7034_v32, %s5782_s18  ;;  %5140 = vmatpush3.xpose.msk.msra.mxu0 %vm346_vm1, %v2297_v33  ;;  %v2704_v36 = vpop.permute.xlu0 %2703 }
 0x782   :  { %5202 = vmatpush3.xpose.msk.msra.mxu1 %vm346_vm1, %v2708_v13  ;;  %5141 = vmatprep.subr.msk.mxu0 %vm346_vm1, %v2295_v22 }
 0x783   :  { %5203 = vmatprep.subr.msk.mxu1 %vm346_vm1, %v2706_v34  ;;  %v2291_v2 = vpop.permute.xlu1 %2290 }
 0x785   :  { %3281 = vrot.lane.b32.xlu1 %v7046_v29, %s5782_s18  ;;  %5142 = vmatpush3.xpose.msk.msra.mxu0 %vm346_vm1, %v2295_v22  ;;  %v2702_v57 = vpop.permute.xlu0 %2701 }
 0x786   :  { %5204 = vmatpush3.xpose.msk.msra.mxu1 %vm346_vm1, %v2706_v34  ;;  %5143 = vmatprep.subr.msk.mxu0 %vm346_vm1, %v2293_v37 }
 0x787   :  { %5205 = vmatprep.subr.msk.mxu1 %vm346_vm1, %v2704_v36  ;;  %v2289_v24 = vpop.permute.xlu1 %2288 }
 0x789   :  { %3299 = vrot.lane.b32.xlu1 %v6998_v44, %s5782_s18  ;;  %5144 = vmatpush3.xpose.msk.msra.mxu0 %vm346_vm1, %v2293_v37  ;;  %v2700_v45 = vpop.permute.xlu0 %2699 }
 0x78a   :  { %5206 = vmatpush3.xpose.msk.msra.mxu1 %vm346_vm1, %v2704_v36  ;;  %5145 = vmatprep.subr.msk.mxu0 %vm346_vm1, %v2291_v2 }
 0x78b   :  { %5207 = vmatprep.subr.msk.mxu1 %vm346_vm1, %v2702_v57  ;;  %v2287_v56 = vpop.permute.xlu1 %2286 }
 0x78d   :  { %5146 = vmatpush3.xpose.msk.msra.mxu0 %vm346_vm1, %v2291_v2  ;;  %v2698_v40 = vpop.permute.xlu0 %2697  ;;  %v5715_v2 = vld [vmem:[%s8399_s1 + $0x8] sm:$0xff] }
 0x78e   :  { %5208 = vmatpush3.xpose.msk.msra.mxu1 %vm346_vm1, %v2702_v57  ;;  %5147 = vmatprep.subr.msk.mxu0 %vm346_vm1, %v2289_v24 }
 0x78f   :  { %5209 = vmatprep.subr.msk.mxu1 %vm346_vm1, %v2700_v45  ;;  %v2285_v62 = vpop.permute.xlu1 %2284 }
 0x791   :  { %5148 = vmatpush3.xpose.msk.msra.mxu0 %vm346_vm1, %v2289_v24  ;;  %v2696_v19 = vpop.permute.xlu0 %2695 }
 0x792   :  { %5210 = vmatpush3.xpose.msk.msra.mxu1 %vm346_vm1, %v2700_v45  ;;  %5149 = vmatprep.subr.msk.mxu0 %vm346_vm1, %v2287_v56  ;;  %v5716_v45 = vld [vmem:[%s8399_s1] sm:$0xff] }
 0x793   :  { %5211 = vmatprep.subr.msk.mxu1 %vm346_vm1, %v2698_v40  ;;  %v2283_v43 = vpop.permute.xlu1 %2282 }
 0x795   :  { %5150 = vmatpush3.xpose.msk.msra.mxu0 %vm346_vm1, %v2287_v56  ;;  %v2694_v15 = vpop.permute.xlu0 %2693 }
 0x796   :  { %5212 = vmatpush3.xpose.msk.msra.mxu1 %vm346_vm1, %v2698_v40  ;;  %5151 = vmatprep.subr.msk.mxu0 %vm346_vm1, %v2285_v62 }
 0x797   :  { %5213 = vmatprep.subr.msk.mxu1 %vm346_vm1, %v2696_v19  ;;  %v2662_v53 = vpop.permute.xlu1 %2661 }
 0x798   :  { %5217 = vmatprep.mubr.msk.f32.mxu1 %vm346_vm1, %v2662_v53 }
 0x799   :  { %5152 = vmatpush3.xpose.msk.msra.mxu0 %vm346_vm1, %v2285_v62  ;;  %v2281_v25 = vpop.permute.xlu0 %2280 }
 0x79a   :  { %5214 = vmatpush3.xpose.msk.msra.mxu1 %vm346_vm1, %v2696_v19  ;;  %5153 = vmatprep.subr.msk.mxu0 %vm346_vm1, %v2283_v43  ;;  %v5717_v19 = vld [vmem:[%s8399_s1 + $0x18] sm:$0xff] }
 0x79b   :  { %5215 = vmatprep.subr.msk.mxu1 %vm346_vm1, %v2694_v15  ;;  %v2664_v17 = vpop.permute.xlu1 %2663 }
 0x79d   :  { %5154 = vmatpush3.xpose.msk.msra.mxu0 %vm346_vm1, %v2283_v43  ;;  %v2666_v1 = vpop.permute.xlu0 %2665 }
 0x79e   :  { %5216 = vmatpush3.xpose.msk.msra.mxu1 %vm346_vm1, %v2694_v15  ;;  %5155 = vmatprep.subr.msk.mxu0 %vm346_vm1, %v2281_v25 }
 0x79f   :  { %v2279_v55 = vpop.permute.xlu1 %2278 }
 0x7a1   :  { %5218 = vmatmul.mubr.msk.f32.vlgmr.msra.gmra.mxu1 %vm346_vm1, %v2664_v17  ;;  %5156 = vmatpush3.xpose.msk.msra.mxu0 %vm346_vm1, %v2281_v25  ;;  %v2668_v61 = vpop.permute.xlu0 %2667  ;;  %v5718_v25 = vld [vmem:[%s8399_s1 + $0x10] sm:$0xff] }
 0x7a2   :  { %5220 = vmatprep.mubr.msk.f32.mxu1 %vm346_vm1, %v2666_v1  ;;  %5157 = vmatprep.subr.msk.mxu0 %vm346_vm1, %v2279_v55 }
 0x7a3   :  { %v2670_v42 = vpop.permute.xlu1 %2669 }
 0x7a5   :  { %5221 = vmatmul.mubr.msk.f32.gmra.mxu1 %vm346_vm1, %v2668_v61  ;;  %5158 = vmatpush3.xpose.msk.msra.mxu0 %vm346_vm1, %v2279_v55  ;;  %v2277_v47 = vpop.permute.xlu0 %2276 }
 0x7a6   :  { %5223 = vmatprep.mubr.msk.f32.mxu1 %vm346_vm1, %v2670_v42  ;;  %5159 = vmatprep.subr.msk.mxu0 %vm346_vm1, %v2277_v47 }
 0x7a7   :  { %v2672_v28 = vpop.permute.xlu1 %2671 }
 0x7a9   :  { %5224 = vmatmul.mubr.msk.f32.gmra.mxu1 %vm346_vm1, %v2672_v28  ;;  %5160 = vmatpush3.xpose.msk.msra.mxu0 %vm346_vm1, %v2277_v47  ;;  %v2674_v16 = vpop.permute.xlu0 %2673  ;;  %v5719_v28 = vld [vmem:[%s8399_s1 + $0x28] sm:$0xff] }
 0x7aa   :  { %5226 = vmatprep.mubr.msk.f32.mxu1 %vm346_vm1, %v2674_v16 }
 0x7ab   :  { %v2676_v7 = vpop.permute.xlu1 %2675 }
 0x7ac   :  { %5162 = vmatmul.mubr.msk.f32.vlgmr.msra.gmra.mxu0 %vm346_vm1, %v7070_v52 }
 0x7ad   :  { %5227 = vmatmul.mubr.msk.f32.gmra.mxu1 %vm346_vm1, %v2676_v7  ;;  %5164 = vmatprep.mubr.msk.f32.mxu0 %vm346_vm1, %v7064_v14  ;;  %v2678_v3 = vpop.permute.xlu0 %2677 }
 0x7ae   :  { %5229 = vmatprep.mubr.msk.f32.mxu1 %vm346_vm1, %v2678_v3 }
 0x7af   :  { %v2680_v10 = vpop.permute.xlu1 %2679 }
 0x7b0   :  { %5165 = vmatmul.mubr.msk.f32.gmra.mxu0 %vm346_vm1, %v7058_v27 }
 0x7b1   :  { %5230 = vmatmul.mubr.msk.f32.gmra.mxu1 %vm346_vm1, %v2680_v10  ;;  %5167 = vmatprep.mubr.msk.f32.mxu0 %vm346_vm1, %v7052_v58  ;;  %v2682_v54 = vpop.permute.xlu0 %2681 }
 0x7b2   :  { %5232 = vmatprep.mubr.msk.f32.mxu1 %vm346_vm1, %v2682_v54 }
 0x7b3   :  { %v2684_v21 = vpop.permute.xlu1 %2683 }
 0x7b4   :  { %5168 = vmatmul.mubr.msk.f32.gmra.mxu0 %vm346_vm1, %v7046_v29 }
 0x7b5   :  { %5233 = vmatmul.mubr.msk.f32.gmra.mxu1 %vm346_vm1, %v2684_v21  ;;  %5170 = vmatprep.mubr.msk.f32.mxu0 %vm346_vm1, %v7040_v49  ;;  %v2686_v46 = vpop.permute.xlu0 %2685  ;;  %v5720_v21 = vld [vmem:[%s8399_s1 + $0x38] sm:$0xff] }
 0x7b6   :  { %5235 = vmatprep.mubr.msk.f32.mxu1 %vm346_vm1, %v2686_v46 }
 0x7b7   :  { %v2688_v5 = vpop.permute.xlu1 %2687 }
 0x7b8   :  { %5171 = vmatmul.mubr.msk.f32.gmra.mxu0 %vm346_vm1, %v7034_v32 }
 0x7b9   :  { %5236 = vmatmul.mubr.msk.f32.gmra.mxu1 %vm346_vm1, %v2688_v5  ;;  %5173 = vmatprep.mubr.msk.f32.mxu0 %vm346_vm1, %v7028_v38  ;;  %v2690_v41 = vpop.permute.xlu0 %2689 }
 0x7ba   :  { %5238 = vmatprep.mubr.msk.f32.mxu1 %vm346_vm1, %v2690_v41 }
 0x7bb   :  { %v2692_v29 = vpop.permute.xlu1 %2691 }
 0x7bc   :  { %5174 = vmatmul.mubr.msk.f32.gmra.mxu0 %vm346_vm1, %v7022_v6 }
 0x7bd   :  { %5239 = vmatmul.mubr.msk.f32.gmra.mxu1 %vm346_vm1, %v2692_v29  ;;  %5176 = vmatprep.mubr.msk.f32.mxu0 %vm346_vm1, %v7016_v63  ;;  %v3103_v49 = vpop.permute.xlu0 %3102 }
 0x7bf   :  { %v3109_v60 = vpop.permute.xlu1 %3108 }
 0x7c0   :  { %5177 = vmatmul.mubr.msk.f32.gmra.mxu0 %vm346_vm1, %v7010_v35  ;;  %5241 = vmatprep.subr.mxu0 %v3109_v60 }
 0x7c1   :  { %5179 = vmatprep.mubr.msk.f32.mxu0 %vm346_vm1, %v7004_v11  ;;  %5242 = vmatpush3.msra.mxu0 %v3109_v60  ;;  %v3099_v38 = vpop.permute.xlu0 %3098  ;;  %v5721_v60 = vld [vmem:[%s8399_s1 + $0x48] sm:$0xff] }
 0x7c3   :  { %v3105_v32 = vpop.permute.xlu1 %3104 }
 0x7c4   :  { %5180 = vmatmul.mubr.msk.f32.gmra.mxu0 %vm346_vm1, %v6992_v20 }
 0x7c5   :  { %5182 = vmatprep.mubr.msk.f32.mxu0 %vm346_vm1, %v6998_v44  ;;  %v3095_v6 = vpop.permute.xlu0 %3094 }
 0x7c7   :  { %v3101_v63 = vpop.permute.xlu1 %3100 }
 0x7c8   :  { %5183 = vmatmul.mubr.msk.f32.gmra.mxu0 %vm346_vm1, %v6996_v9 }
 0x7c9   :  { %v3091_v50 = vpop.permute.xlu0 %3090 }
 0x7cb   :  { %v3097_v35 = vpop.permute.xlu1 %3096 }
 0x7cd   :  { %v3087_v18 = vpop.permute.xlu0 %3086 }
 0x7cf   :  { %v3093_v4 = vpop.permute.xlu1 %3092 }
 0x7d1   :  { %v7282_v39 = vpop.permute.xlu0 %3301 }
 0x7d2   :  { %5353 = vmatprep.subr.mxu1 %v7282_v39 }
 0x7d3   :  { %v3089_v11 = vpop.permute.xlu1 %3088  ;;  %5369 = vmatpush3.msra.mxu1 %v7282_v39 }
 0x7d5   :  { %v7286_v20 = vpop.permute.xlu0 %3297 }
 0x7d7   :  { %v3085_v51 = vpop.permute.xlu1 %3084 }
 0x7d9   :  { %v7288_v44 = vpop.permute.xlu0 %3291 }
 0x7db   :  { %v3083_v30 = vpop.permute.xlu1 %3082 }
 0x7dd   :  { %v7290_v48 = vpop.permute.xlu0 %3287 }
 0x7df   :  { %v3081_v9 = vpop.permute.xlu1 %3080 }
 0x7e1   :  { %v7292_v12 = vpop.permute.xlu0 %3283 }
 0x7e3   :  { %v3079_v59 = vpop.permute.xlu1 %3078 }
 0x7e5   :  { %v3107_v31 = vpop.permute.xlu0 %3106 }
 0x7e6   :  { %5243 = vmatprep.subr.mxu0 %v3107_v31 }
 0x7e7   :  { %v7294_v8 = vpop.permute.xlu1 %3295  ;;  %5244 = vmatpush3.msra.mxu0 %v3107_v31 }
 0x7e8   :  { %5245 = vmatprep.subr.mxu0 %v3105_v32 }
 0x7e9   :  { %5246 = vmatpush3.msra.mxu0 %v3105_v32 }
 0x7ea   :  { %5247 = vmatprep.subr.mxu0 %v3103_v49 }
 0x7eb   :  { %v7296_v33 = vpop.permute.xlu1 %3293  ;;  %5248 = vmatpush3.msra.mxu0 %v3103_v49 }
 0x7ec   :  { %5249 = vmatprep.subr.mxu0 %v3101_v63 }
 0x7ed   :  { %5250 = vmatpush3.msra.mxu0 %v3101_v63 }
 0x7ee   :  { %5251 = vmatprep.subr.mxu0 %v3099_v38 }
 0x7ef   :  { %v7298_v13 = vpop.permute.xlu1 %3289  ;;  %5252 = vmatpush3.msra.mxu0 %v3099_v38 }
 0x7f0   :  { %5253 = vmatprep.subr.mxu0 %v3097_v35 }
 0x7f1   :  { %5254 = vmatpush3.msra.mxu0 %v3097_v35  ;;  %v5722_v35 = vld [vmem:[%s8399_s1 + $0x58] sm:$0xff] }
 0x7f2   :  { %5255 = vmatprep.subr.mxu0 %v3095_v6 }
 0x7f3   :  { %v7300_v22 = vpop.permute.xlu1 %3285  ;;  %5256 = vmatpush3.msra.mxu0 %v3095_v6 }
 0x7f4   :  { %5257 = vmatprep.subr.mxu0 %v3093_v4 }
 0x7f5   :  { %5258 = vmatpush3.msra.mxu0 %v3093_v4 }
 0x7f6   :  { %5259 = vmatprep.subr.mxu0 %v3091_v50 }
 0x7f7   :  { %v7302_v34 = vpop.permute.xlu1 %3281  ;;  %5260 = vmatpush3.msra.mxu0 %v3091_v50 }
 0x7f8   :  { %5261 = vmatprep.subr.mxu0 %v3089_v11 }
 0x7f9   :  { %5262 = vmatpush3.msra.mxu0 %v3089_v11 }
 0x7fa   :  { %5263 = vmatprep.subr.mxu0 %v3087_v18 }
 0x7fb   :  { %v7304_v37 = vpop.permute.xlu1 %3299  ;;  %5264 = vmatpush3.msra.mxu0 %v3087_v18 }
 0x7fc   :  { %5265 = vmatprep.subr.mxu0 %v3085_v51  ;;  %5354 = vmatprep.subr.mxu1 %v7304_v37 }
 0x7fd   :  { %5266 = vmatpush3.msra.mxu0 %v3085_v51  ;;  %5370 = vmatpush3.msra.mxu1 %v7304_v37 }
 0x7fe   :  { %5267 = vmatprep.subr.mxu0 %v3083_v30  ;;  %5355 = vmatprep.subr.mxu1 %v7286_v20 }
 0x7ff   :  { %5268 = vmatpush3.msra.mxu0 %v3083_v30  ;;  %5371 = vmatpush3.msra.mxu1 %v7286_v20 }
 0x800   :  { %5269 = vmatprep.subr.mxu0 %v3081_v9  ;;  %5356 = vmatprep.subr.mxu1 %v7294_v8 }
 0x801   :  { %5270 = vmatpush3.msra.mxu0 %v3081_v9  ;;  %5372 = vmatpush3.msra.mxu1 %v7294_v8  ;;  %v5723_v9 = vld [vmem:[%s8399_s1 + $0x20] sm:$0xff] }
 0x802   :  { %5271 = vmatprep.subr.mxu0 %v3079_v59  ;;  %5357 = vmatprep.subr.mxu1 %v7296_v33 }
 0x803   :  { %5272 = vmatpush3.msra.mxu0 %v3079_v59  ;;  %5373 = vmatpush3.msra.mxu1 %v7296_v33 }
 0x804   :  { %5297 = vmatprep.subr.mxu0 %v7282_v39  ;;  %5358 = vmatprep.subr.mxu1 %v7288_v44 }
 0x805   :  { %5374 = vmatpush3.msra.mxu1 %v7288_v44 }
 0x806   :  { %5359 = vmatprep.subr.mxu1 %v7298_v13 }
 0x807   :  { %5375 = vmatpush3.msra.mxu1 %v7298_v13 }
 0x808   :  { %5360 = vmatprep.subr.mxu1 %v7290_v48 }
 0x809   :  { %5376 = vmatpush3.msra.mxu1 %v7290_v48 }
 0x80a   :  { %5361 = vmatprep.subr.mxu1 %v7300_v22 }
 0x80b   :  { %5377 = vmatpush3.msra.mxu1 %v7300_v22 }
 0x80c   :  { %5362 = vmatprep.subr.mxu1 %v7292_v12 }
 0x80d   :  { %5378 = vmatpush3.msra.mxu1 %v7292_v12 }
 0x80e   :  { %5363 = vmatprep.subr.mxu1 %v7302_v34 }
 0x80f   :  { %5379 = vmatpush3.msra.mxu1 %v7302_v34 }
 0x861   :  { %v5219_v36 = vpop.f32.mrf.mxu1 }
 0x862   :  { %v7330_v57 = vadd.f32 %v5715_v2, %v5219_v36 }
 0x863   :  { %v2855_v24 = vpop.f32.mrf.mxu1 }
 0x864   :  { %v7335_v56 = vadd.f32 %v5716_v45, %v2855_v24  ;;  %2936 = vmax.xlane.f32.xlu1 %v7330_v57 }
 0x865   :  { %v5222_v40 = vpop.f32.mrf.mxu1 }
 0x866   :  { %2934 = vmax.xlane.f32.xlu0 %v7335_v56  ;;  %v7342_v43 = vadd.f32 %v5717_v19, %v5222_v40 }
 0x867   :  { %v2865_v62 = vpop.f32.mrf.mxu1 }
 0x868   :  { %v7348_v17 = vadd.f32 %v5718_v25, %v2865_v62 }
 0x869   :  { %v5225_v15 = vpop.f32.mrf.mxu1 }
 0x86a   :  { %2940 = vmax.xlane.f32.xlu0 %v7342_v43  ;;  %v7357_v16 = vadd.f32 %v5719_v28, %v5225_v15  ;;  %v5725_v15 = vld [vmem:[%s8399_s1 + $0x68] sm:$0xff] }
 0x86b   :  { %v2875_v53 = vpop.f32.mrf.mxu1 }
 0x86c   :  { %v5163_v1 = vpop.f32.mrf.mxu0  ;;  %v7393_v59 = vadd.f32 %v5723_v9, %v2875_v53 }
 0x86d   :  { %v7350_v55 = vadd.f32 %v5715_v2, %v5163_v1  ;;  %v5228_v61 = vpop.f32.mrf.mxu1  ;;  %v5726_v1 = vld [vmem:[%s8399_s1 + $0x30] sm:$0xff] }
 0x86e   :  { %2938 = vmax.xlane.f32.xlu0 %v7348_v17  ;;  %v2438_v42 = vpop.f32.mrf.mxu0  ;;  %v7366_v46 = vadd.f32 %v5720_v21, %v5228_v61 }
 0x86f   :  { %v2885_v47 = vpop.f32.mrf.mxu1  ;;  %2519 = vmax.xlane.f32.xlu1 %v7350_v55  ;;  %v7359_v3 = vadd.f32 %v5716_v45, %v2438_v42  ;;  %v5724_v45 = vld [vmem:[%s8399_s1 + $0x50] sm:$0xff] }
 0x870   :  { %v5166_v7 = vpop.f32.mrf.mxu0  ;;  %v7420_v61 = vadd.f32 %v5726_v1, %v2885_v47 }
 0x871   :  { %v5231_v10 = vpop.f32.mrf.mxu1  ;;  %v7368_v41 = vadd.f32 %v5717_v19, %v5166_v7 }
 0x872   :  { %2944 = vmax.xlane.f32.xlu0 %v7357_v16  ;;  %v2448_v54 = vpop.f32.mrf.mxu0  ;;  %v7375_v38 = vadd.f32 %v5721_v60, %v5231_v10  ;;  %v5727_v10 = vld [vmem:[%s8399_s1 + $0x60] sm:$0xff] }
 0x873   :  { %2517 = vmax.xlane.f32.xlu1 %v7359_v3  ;;  %v2895_v29 = vpop.f32.mrf.mxu1  ;;  %v7377_v6 = vadd.f32 %v5718_v25, %v2448_v54 }
 0x874   :  { %v5169_v5 = vpop.f32.mrf.mxu0 }
 0x875   :  { %v5234_v63 = vpop.f32.mrf.mxu1  ;;  %v7386_v11 = vadd.f32 %v5719_v28, %v5169_v5 }
 0x876   :  { %2948 = vmax.xlane.f32.xlu0 %v7366_v46  ;;  %v2458_v49 = vpop.f32.mrf.mxu0  ;;  %v7384_v18 = vadd.f32 %v5722_v35, %v5234_v63 }
 0x877   :  { %2523 = vmax.xlane.f32.xlu1 %v7368_v41  ;;  %v2905_v36 = vpop.f32.mrf.mxu1  ;;  %v7399_v24 = vadd.f32 %v5723_v9, %v2458_v49 }
 0x878   :  { %v5172_v32 = vpop.f32.mrf.mxu0 }
 0x879   :  { %v5237_v62 = vpop.f32.mrf.mxu1  ;;  %v7408_v19 = vadd.f32 %v5720_v21, %v5172_v32  ;;  %v5728_v32 = vld [vmem:[%s8399_s1 + $0x40] sm:$0xff] }
 0x87a   :  { %2952 = vmax.xlane.f32.xlu0 %v7375_v38  ;;  %v2468_v50 = vpop.f32.mrf.mxu0  ;;  %v7413_v53 = vadd.f32 %v5725_v15, %v5237_v62  ;;  %v7444_v63 = vadd.f32 %v5728_v32, %v2895_v29  ;;  %v7459_v29 = vadd.f32 %v5724_v45, %v2905_v36 }
 0x87b   :  { %2521 = vmax.xlane.f32.xlu1 %v7377_v6  ;;  %v2915_v28 = vpop.f32.mrf.mxu1  ;;  %v7426_v7 = vadd.f32 %v5726_v1, %v2468_v50  ;;  %v5729_v50 = vld [vmem:[%s8399_s1 + $0x78] sm:$0xff] }
 0x87c   :  { %v5175_v4 = vpop.f32.mrf.mxu0  ;;  %v7431_v54 = vadd.f32 %v5727_v10, %v2915_v28 }
 0x87d   :  { %v7435_v47 = vadd.f32 %v5721_v60, %v5175_v4  ;;  %v5240_v49 = vpop.f32.mrf.mxu1 }
 0x87e   :  { %2956 = vmax.xlane.f32.xlu0 %v7384_v18  ;;  %v2478_v51 = vpop.f32.mrf.mxu0 }
 0x87f   :  { %2527 = vmax.xlane.f32.xlu1 %v7386_v11  ;;  %v7453_v4 = vadd.f32 %v5728_v32, %v2478_v51  ;;  %v2925_v9 = vpop.f32.mrf.mxu1 }
 0x880   :  { %v5178_v30 = vpop.f32.mrf.mxu0 }
 0x881   :  { %v7395_v31 = vadd.f32 %v5722_v35, %v5178_v30  ;;  %v7449_v35 = vadd.f32 %v5729_v50, %v5240_v49 }
 0x882   :  { %v2488_v2 = vpop.f32.mrf.mxu0 }
 0x883   :  { %2942 = vmax.xlane.f32.xlu1 %v7393_v59  ;;  %2539 = vmax.xlane.f32.xlu0 %v7395_v31  ;;  %v7404_v40 = vadd.f32 %v5724_v45, %v2488_v2  ;;  %v5730_v2 = vld [vmem:[%s8399_s1 + $0x70] sm:$0xff] }
 0x884   :  { %v5181_v25 = vpop.f32.mrf.mxu0  ;;  %v7464_v62 = vadd.f32 %v5730_v2, %v2925_v9 }
 0x885   :  { %v7422_v42 = vadd.f32 %v5725_v15, %v5181_v25 }
 0x886   :  { %v2498_v21 = vpop.f32.mrf.mxu0 }
 0x887   :  { %2525 = vmax.xlane.f32.xlu1 %v7399_v24  ;;  %2537 = vmax.xlane.f32.xlu0 %v7404_v40  ;;  %v7437_v5 = vadd.f32 %v5727_v10, %v2498_v21 }
 0x888   :  { %v5184_v60 = vpop.f32.mrf.mxu0 }
 0x889   :  { %v7455_v30 = vadd.f32 %v5729_v50, %v5184_v60 }
 0x88a   :  { %v2508_v51 = vpop.f32.mrf.mxu0 }
 0x88b   :  { %2531 = vmax.xlane.f32.xlu1 %v7408_v19  ;;  %2960 = vmax.xlane.f32.xlu0 %v7413_v53  ;;  %v7474_v36 = vadd.f32 %v5730_v2, %v2508_v51 }
 0x88f   :  { %2946 = vmax.xlane.f32.xlu1 %v7420_v61  ;;  %2543 = vmax.xlane.f32.xlu0 %v7422_v42 }
 0x893   :  { %2529 = vmax.xlane.f32.xlu1 %v7426_v7  ;;  %2958 = vmax.xlane.f32.xlu0 %v7431_v54 }
 0x897   :  { %2535 = vmax.xlane.f32.xlu1 %v7435_v47  ;;  %2541 = vmax.xlane.f32.xlu0 %v7437_v5 }
 0x89b   :  { %2950 = vmax.xlane.f32.xlu1 %v7444_v63  ;;  %2964 = vmax.xlane.f32.xlu0 %v7449_v35 }
 0x89f   :  { %2533 = vmax.xlane.f32.xlu1 %v7453_v4  ;;  %2547 = vmax.xlane.f32.xlu0 %v7455_v30 }
 0x8a3   :  { %2954 = vmax.xlane.f32.xlu1 %v7459_v29  ;;  %2962 = vmax.xlane.f32.xlu0 %v7464_v62 }
 0x8b4   :  { %3277 = vrot.lane.b32.xlu1 %v7058_v27, %s5782_s18 }
 0x8b8   :  { %3275 = vrot.lane.b32.xlu1 %v7064_v14, %s5782_s18 }
 0x8b9   :  { %3279 = vrot.lane.b32.xlu0 %v7052_v58, %s5782_s18 }
 0x8d8   :  { %2545 = vmax.xlane.f32.xlu0 %v7474_v36 }
 0x8ed   :  { %v2937_v45 = vpop.xlane.xlu1 %2936 }
 0x8ee   :  { %v2967_v15 = vsub.f32 %v7330_v57, %v2937_v45 }
 0x8ef   :  { %v2935_v25 = vpop.xlane.xlu0 %2934 }
 0x8f0   :  { %v2984_v1 = vmul.f32 1.442695, %v2967_v15  ;;  %v2966_v58 = vsub.f32 %v7335_v56, %v2935_v25 }
 0x8f2   :  { %5555 = vpow2.f32 %v2984_v1  ;;  %v2982_v57 = vmul.f32 1.442695, %v2966_v58 }
 0x8f3   :  { %v2941_v28 = vpop.xlane.xlu0 %2940 }
 0x8f4   :  { %v2969_v27 = vsub.f32 %v7342_v43, %v2941_v28 }
 0x8f6   :  { %v2988_v10 = vmul.f32 1.442695, %v2969_v27 }
 0x8f7   :  { %v2939_v21 = vpop.xlane.xlu0 %2938 }
 0x8f8   :  { %5557 = vpow2.f32 %v2988_v10  ;;  %v2520_v14 = vpop.xlane.xlu1 %2519 }
 0x8f9   :  { %v2550_v49 = vsub.f32 %v7350_v55, %v2520_v14 }
 0x8fb   :  { %v2567_v32 = vmul.f32 1.442695, %v2550_v49  ;;  %v2945_v50 = vpop.xlane.xlu0 %2944 }
 0x8fc   :  { %v2971_v60 = vsub.f32 %v7357_v16, %v2945_v50  ;;  %v2518_v9 = vpop.xlane.xlu1 %2517 }
 0x8fd   :  { %5559 = vpow2.f32 %v2567_v32  ;;  %v2549_v2 = vsub.f32 %v7359_v3, %v2518_v9  ;;  %v2968_v3 = vsub.f32 %v7348_v17, %v2939_v21 }
 0x8fe   :  { %v2992_v51 = vmul.f32 1.442695, %v2971_v60 }
 0x8ff   :  { %v7483_v45 = vpop.eup %5555  ;;  %v2949_v43 = vpop.xlane.xlu0 %2948  ;;  %v2565_v55 = vmul.f32 1.442695, %v2549_v2  ;;  %v2986_v58 = vmul.f32 1.442695, %v2968_v3 }
 0x900   :  { %5561 = vpow2.f32 %v2992_v51  ;;  %v2973_v15 = vsub.f32 %v7366_v46, %v2949_v43  ;;  %3016 = vadd.xlane.f32.xlu0 %v7483_v45  ;;  %v2524_v56 = vpop.xlane.xlu1 %2523 }
 0x901   :  { %5563 = vpow2.f32 %v2982_v57  ;;  %v2552_v25 = vsub.f32 %v7368_v41, %v2524_v56 }
 0x902   :  { %v2996_v16 = vmul.f32 1.442695, %v2973_v15 }
 0x903   :  { %v2953_v1 = vpop.xlane.xlu0 %2952  ;;  %v2571_v10 = vmul.f32 1.442695, %v2552_v25 }
 0x904   :  { %5565 = vpow2.f32 %v2996_v16  ;;  %v2522_v28 = vpop.xlane.xlu1 %2521 }
 0x905   :  { %v7488_v27 = vpop.eup %5557  ;;  %5567 = vpow2.f32 %v2565_v55  ;;  %v2551_v49 = vsub.f32 %v7377_v6, %v2522_v28 }
 0x906   :  { %3020 = vadd.xlane.f32.xlu0 %v7488_v27  ;;  %5569 = vpow2.f32 %v2571_v10 }
 0x907   :  { %v7492_v46 = vpop.xlane.xlu0 %2956  ;;  %5571 = vpow2.f32 %v2986_v58  ;;  %v2569_v17 = vmul.f32 1.442695, %v2551_v49 }
 0x908   :  { %v2528_v14 = vpop.xlane.xlu1 %2527 }
 0x909   :  { %v2554_v21 = vsub.f32 %v7386_v11, %v2528_v14  ;;  %5573 = vpow2.f32 %v2569_v17  ;;  %v2975_v17 = vsub.f32 %v7375_v38, %v2953_v1 }
 0x90a   :  { %v7495_v41 = vpop.eup %5559 }
 0x90b   :  { %2599 = vadd.xlane.f32.xlu1 %v7495_v41  ;;  %v2575_v43 = vmul.f32 1.442695, %v2554_v21 }
 0x90c   :  { %v2943_v32 = vpop.xlane.xlu1 %2942  ;;  %v7498_v50 = vpop.xlane.xlu0 %2539 }
 0x90d   :  { %v7500_v60 = vpop.eup %5561  ;;  %v2970_v6 = vsub.f32 %v7393_v59, %v2943_v32  ;;  %5575 = vpow2.f32 %v2575_v43 }
 0x90e   :  { %v7503_v9 = vpop.eup %5563  ;;  %3024 = vadd.xlane.f32.xlu0 %v7500_v60 }
 0x90f   :  { %3014 = vadd.xlane.f32.xlu1 %v7503_v9  ;;  %v2990_v11 = vmul.f32 1.442695, %v2970_v6 }
 0x910   :  { %v2526_v57 = vpop.xlane.xlu1 %2525  ;;  %v7508_v2 = vpop.xlane.xlu0 %2537 }
 0x911   :  { %v7510_v51 = vpop.eup %5565  ;;  %v2553_v59 = vsub.f32 %v7399_v24, %v2526_v57  ;;  %5577 = vpow2.f32 %v2990_v11  ;;  %v3000_v11 = vmul.f32 1.442695, %v2975_v17 }
 0x912   :  { %v7512_v15 = vpop.eup %5567  ;;  %3028 = vadd.xlane.f32.xlu0 %v7510_v51 }
 0x913   :  { %2597 = vadd.xlane.f32.xlu1 %v7512_v15  ;;  %v7520_v16 = vpop.eup %5569  ;;  %v2573_v14 = vmul.f32 1.442695, %v2553_v59 }
 0x914   :  { %v2532_v56 = vpop.xlane.xlu1 %2531  ;;  %v7516_v55 = vpop.xlane.xlu0 %2960 }
 0x915   :  { %v2556_v25 = vsub.f32 %v7408_v19, %v2532_v56  ;;  %v7526_v49 = vpop.eup %5571 }
 0x916   :  { %v7531_v6 = vpop.eup %5573 }
 0x917   :  { %v2579_v28 = vmul.f32 1.442695, %v2556_v25  ;;  %2603 = vadd.xlane.f32.xlu1 %v7520_v16 }
 0x918   :  { %v2947_v3 = vpop.xlane.xlu1 %2946  ;;  %v7523_v10 = vpop.xlane.xlu0 %2543 }
 0x919   :  { %5579 = vpow2.f32 %v2579_v28  ;;  %v2972_v58 = vsub.f32 %v7420_v61, %v2947_v3 }
 0x91a   :  { %5581 = vpow2.f32 %v2573_v14  ;;  %v7537_v59 = vpop.eup %5575 }
 0x91b   :  { %3018 = vadd.xlane.f32.xlu1 %v7526_v49  ;;  %v2994_v24 = vmul.f32 1.442695, %v2972_v58 }
 0x91c   :  { %v2530_v32 = vpop.xlane.xlu1 %2529  ;;  %v2959_v19 = vpop.xlane.xlu0 %2958 }
 0x91d   :  { %v2555_v21 = vsub.f32 %v7426_v7, %v2530_v32  ;;  %5583 = vpow2.f32 %v2994_v24 }
 0x91e   :  { %v7542_v25 = vpop.eup %5577 }
 0x91f   :  { %v2577_v57 = vmul.f32 1.442695, %v2555_v21  ;;  %2601 = vadd.xlane.f32.xlu1 %v7531_v6 }
 0x920   :  { %v2536_v43 = vpop.xlane.xlu1 %2535  ;;  %v7534_v61 = vpop.xlane.xlu0 %2541 }
 0x921   :  { %5585 = vpow2.f32 %v2577_v57  ;;  %v2558_v56 = vsub.f32 %v7435_v47, %v2536_v43  ;;  %v2977_v47 = vsub.f32 %v7384_v18, %v7492_v46  ;;  %v2560_v57 = vsub.f32 %v7395_v31, %v7498_v50 }
 0x922   :  { %5587 = vpow2.f32 %v3000_v11  ;;  %v2978_v18 = vsub.f32 %v7431_v54, %v2959_v19  ;;  %v2559_v31 = vsub.f32 %v7404_v40, %v7508_v2 }
 0x923   :  { %2607 = vadd.xlane.f32.xlu1 %v7537_v59  ;;  %v2583_v38 = vmul.f32 1.442695, %v2558_v56  ;;  %v3004_v21 = vmul.f32 1.442695, %v2977_v47 }
 0x924   :  { %v2951_v1 = vpop.xlane.xlu1 %2950  ;;  %v7540_v7 = vpop.xlane.xlu0 %2964  ;;  %v3006_v54 = vmul.f32 1.442695, %v2978_v18  ;;  %v2585_v40 = vmul.f32 1.442695, %v2559_v31 }
 0x925   :  { %v2974_v28 = vsub.f32 %v7444_v63, %v2951_v1  ;;  %5589 = vpow2.f32 %v2583_v38  ;;  %v2587_v1 = vmul.f32 1.442695, %v2560_v57  ;;  %v2561_v57 = vsub.f32 %v7437_v5, %v7534_v61 }
 0x926   :  { %v7545_v3 = vpop.eup %5579 }
 0x927   :  { %v2998_v14 = vmul.f32 1.442695, %v2974_v28  ;;  %3022 = vadd.xlane.f32.xlu1 %v7542_v25  ;;  %2611 = vadd.xlane.f32.xlu0 %v7545_v3  ;;  %v7554_v17 = vpop.eup %5581 }
 0x928   :  { %v2534_v58 = vpop.xlane.xlu1 %2533  ;;  %v7551_v24 = vpop.xlane.xlu0 %2547 }
 0x929   :  { %5591 = vpow2.f32 %v2998_v14  ;;  %v2557_v32 = vsub.f32 %v7453_v4, %v2534_v58 }
 0x92a   :  { %v7559_v56 = vpop.eup %5583 }
 0x92b   :  { %v2581_v63 = vmul.f32 1.442695, %v2557_v32  ;;  %2605 = vadd.xlane.f32.xlu1 %v7554_v17 }
 0x92c   :  { %v2955_v43 = vpop.xlane.xlu1 %2954  ;;  %v2963_v11 = vpop.xlane.xlu0 %2962 }
 0x92d   :  { %5593 = vpow2.f32 %v2581_v63  ;;  %v2976_v46 = vsub.f32 %v7459_v29, %v2955_v43  ;;  %v2980_v29 = vsub.f32 %v7464_v62, %v2963_v11  ;;  %v2979_v62 = vsub.f32 %v7413_v53, %v7516_v55 }
 0x92e   :  { %v7563_v38 = vpop.eup %5585  ;;  %5595 = vpow2.f32 %v3004_v21  ;;  %v2562_v63 = vsub.f32 %v7422_v42, %v7523_v10  ;;  %v2589_v42 = vmul.f32 1.442695, %v2561_v57  ;;  %v2981_v10 = vsub.f32 %v7449_v35, %v7540_v7 }
 0x92f   :  { %v3002_v4 = vmul.f32 1.442695, %v2976_v46  ;;  %3026 = vadd.xlane.f32.xlu1 %v7559_v56  ;;  %2609 = vadd.xlane.f32.xlu0 %v7563_v38  ;;  %v7575_v19 = vpop.eup %5587  ;;  %v3010_v47 = vmul.f32 1.442695, %v2980_v29  ;;  %v3008_v32 = vmul.f32 1.442695, %v2979_v62  ;;  %v2564_v46 = vsub.f32 %v7455_v30, %v7551_v24 }
 0x930   :  { %v7569_v50 = vpop.permute.xlu1 %3277  ;;  %v7571_v28 = vpop.permute.xlu0 %3279  ;;  %v2591_v55 = vmul.f32 1.442695, %v2562_v63  ;;  %v3012_v61 = vmul.f32 1.442695, %v2981_v10 }
 0x931   :  { %5597 = vpow2.f32 %v3002_v4  ;;  %5364 = vmatprep.subr.mxu1 %v7571_v28  ;;  %v2595_v35 = vmul.f32 1.442695, %v2564_v46 }
 0x932   :  { %5380 = vmatpush3.msra.mxu1 %v7571_v28  ;;  %5599 = vpow2.f32 %v2587_v1  ;;  %v7583_v14 = vpop.eup %5589 }
 0x933   :  { %3032 = vadd.xlane.f32.xlu0 %v7575_v19  ;;  %5365 = vmatprep.subr.mxu1 %v7569_v50  ;;  %5601 = vpow2.f32 %v3006_v54 }
 0x934   :  { %v7580_v2 = vpop.permute.xlu1 %3275  ;;  %5381 = vmatpush3.msra.mxu1 %v7569_v50  ;;  %5603 = vpow2.f32 %v2585_v40 }
 0x935   :  { %5366 = vmatprep.subr.mxu1 %v7580_v2  ;;  %5605 = vpow2.f32 %v3010_v47 }
 0x936   :  { %v7588_v58 = vpop.eup %5591  ;;  %5382 = vmatpush3.msra.mxu1 %v7580_v2  ;;  %5607 = vpow2.f32 %v3008_v32 }
 0x937   :  { %3030 = vadd.xlane.f32.xlu1 %v7588_v58  ;;  %2615 = vadd.xlane.f32.xlu0 %v7583_v14  ;;  %5609 = vpow2.f32 %v2591_v55 }
 0x938   :  { %5611 = vpow2.f32 %v2589_v42 }
 0x939   :  { %5613 = vpow2.f32 %v3012_v61 }
 0x93a   :  { %v7595_v21 = vpop.eup %5593  ;;  %5615 = vpow2.f32 %v2595_v35 }
 0x93b   :  { %2613 = vadd.xlane.f32.xlu0 %v7595_v21  ;;  %v7598_v53 = vpop.eup %5595 }
 0x93e   :  { %v7602_v43 = vpop.eup %5597 }
 0x93f   :  { %3034 = vadd.xlane.f32.xlu1 %v7602_v43  ;;  %3036 = vadd.xlane.f32.xlu0 %v7598_v53  ;;  %v7606_v11 = vpop.eup %5599 }
 0x940   :  { %v7610_v18 = vpop.eup %5601 }
 0x941   :  { %v7614_v5 = vpop.eup %5603 }
 0x942   :  { %v7618_v4 = vpop.eup %5605 }
 0x943   :  { %2619 = vadd.xlane.f32.xlu0 %v7606_v11  ;;  %3038 = vadd.xlane.f32.xlu1 %v7610_v18  ;;  %v7622_v7 = vpop.eup %5607 }
 0x944   :  { %v7625_v1 = vpop.eup %5609 }
 0x945   :  { %v7628_v31 = vpop.eup %5611 }
 0x946   :  { %v7631_v30 = vpop.eup %5613 }
 0x947   :  { %2617 = vadd.xlane.f32.xlu0 %v7614_v5  ;;  %3042 = vadd.xlane.f32.xlu1 %v7618_v4  ;;  %v7636_v24 = vpop.eup %5615 }
 0x94b   :  { %3040 = vadd.xlane.f32.xlu0 %v7622_v7 }
 0x94f   :  { %2623 = vadd.xlane.f32.xlu0 %v7625_v1 }
 0x953   :  { %2621 = vadd.xlane.f32.xlu0 %v7628_v31 }
 0x957   :  { %3044 = vadd.xlane.f32.xlu0 %v7631_v30 }
 0x958   :  { %3271 = vrot.lane.b32.xlu1 %v6988_v23, %s5782_s18 }
 0x95b   :  { %2627 = vadd.xlane.f32.xlu0 %v7636_v24 }
 0x961   :  { %v2546_v54 = vpop.xlane.xlu0 %2545 }
 0x962   :  { %v2563_v29 = vsub.f32 %v7474_v36, %v2546_v54 }
 0x964   :  { %v2593_v40 = vmul.f32 1.442695, %v2563_v29 }
 0x966   :  { %5617 = vpow2.f32 %v2593_v40 }
 0x973   :  { %v7640_v62 = vpop.eup %5617 }
 0x974   :  { %2625 = vadd.xlane.f32.xlu0 %v7640_v62 }
 0x989   :  { %v3017_v32 = vpop.xlane.xlu0 %3016 }
 0x98a   :  { %3273 = vrot.lane.b32.xlu0 %v7070_v52, %s5782_s18  ;;  %5619 = vrcp.f32 %v3017_v32 }
 0x98f   :  { %v3021_v36 = vpop.xlane.xlu0 %3020 }
 0x994   :  { %v7645_v47 = vpop.xlane.xlu1 %2599 }
 0x997   :  { %v5620_v42 = vpop.eup %5619  ;;  %v3025_v35 = vpop.xlane.xlu0 %3024 }
 0x998   :  { %v3015_v23 = vpop.xlane.xlu1 %3014  ;;  %v3049_v52 = vmul.f32 %v5620_v42, %v7483_v45 }
 0x999   :  { %5621 = vrcp.f32 %v3015_v23 }
 0x99a   :  { %5623 = vrcp.f32 %v3021_v36 }
 0x99c   :  { %v7647_v63 = vpop.xlane.xlu1 %2597 }
 0x9a0   :  { %v7649_v55 = vpop.xlane.xlu1 %2603 }
 0x9a4   :  { %v3019_v57 = vpop.xlane.xlu1 %3018 }
 0x9a5   :  { %5625 = vrcp.f32 %v3019_v57 }
 0x9a6   :  { %v5622_v10 = vpop.eup %5621  ;;  %5627 = vrcp.f32 %v3025_v35 }
 0x9a7   :  { %v3047_v61 = vmul.f32 %v5622_v10, %v7503_v9  ;;  %v3029_v9 = vpop.xlane.xlu0 %3028  ;;  %v5624_v29 = vpop.eup %5623 }
 0x9a8   :  { %v7652_v46 = vpop.xlane.xlu1 %2601  ;;  %v3053_v32 = vmul.f32 %v5624_v29, %v7488_v27 }
 0x9a9   :  { %5273 = vmatprep.mubr.f32.mxu0 %v3047_v61 }
 0x9aa   :  { %5274 = vmatmul.mubr.f32.vlgmr.msra.gmra.mxu0 %v3049_v52 }
 0x9ab   :  { %5298 = vmatpush3.msra.mxu0 %v7282_v39 }
 0x9ac   :  { %5299 = vmatprep.subr.mxu0 %v7304_v37  ;;  %v7657_v54 = vpop.xlane.xlu1 %2607 }
 0x9ad   :  { %5300 = vmatpush3.msra.mxu0 %v7304_v37 }
 0x9ae   :  { %5301 = vmatprep.subr.mxu0 %v7286_v20 }
 0x9af   :  { %5302 = vmatpush3.msra.mxu0 %v7286_v20 }
 0x9b0   :  { %5303 = vmatprep.subr.mxu0 %v7294_v8  ;;  %v3023_v45 = vpop.xlane.xlu1 %3022  ;;  %v7667_v40 = vpop.xlane.xlu0 %2611 }
 0x9b1   :  { %5629 = vrcp.f32 %v3023_v45  ;;  %5304 = vmatpush3.msra.mxu0 %v7294_v8 }
 0x9b2   :  { %v5626_v39 = vpop.eup %5625  ;;  %5305 = vmatprep.subr.mxu0 %v7296_v33  ;;  %5631 = vrcp.f32 %v3029_v9 }
 0x9b3   :  { %5306 = vmatpush3.msra.mxu0 %v7296_v33  ;;  %v3051_v37 = vmul.f32 %v5626_v39, %v7526_v49  ;;  %v5628_v27 = vpop.eup %5627 }
 0x9b4   :  { %5307 = vmatprep.subr.mxu0 %v7288_v44  ;;  %v7670_v20 = vpop.xlane.xlu1 %2605 }
 0x9b5   :  { %5308 = vmatpush3.msra.mxu0 %v7288_v44  ;;  %5276 = vmatprep.mubr.f32.mxu0 %v3051_v37 }
 0x9b6   :  { %5309 = vmatprep.subr.mxu0 %v7298_v13  ;;  %5277 = vmatmul.mubr.f32.gmra.mxu0 %v3053_v32 }
 0x9b7   :  { %5310 = vmatpush3.msra.mxu0 %v7298_v13 }
 0x9b8   :  { %5311 = vmatprep.subr.mxu0 %v7290_v48  ;;  %v3027_v8 = vpop.xlane.xlu1 %3026  ;;  %v2610_v33 = vpop.xlane.xlu0 %2609 }
 0x9b9   :  { %5633 = vrcp.f32 %v3027_v8  ;;  %5312 = vmatpush3.msra.mxu0 %v7290_v48 }
 0x9ba   :  { %5635 = vrcp.f32 %v2610_v33  ;;  %5313 = vmatprep.subr.mxu0 %v7300_v22 }
 0x9bb   :  { %5314 = vmatpush3.msra.mxu0 %v7300_v22  ;;  %v3057_v22 = vmul.f32 %v5628_v27, %v7500_v60 }
 0x9bc   :  { %5315 = vmatprep.subr.mxu0 %v7292_v12  ;;  %v3033_v44 = vpop.xlane.xlu0 %3032 }
 0x9bd   :  { %5316 = vmatpush3.msra.mxu0 %v7292_v12  ;;  %5637 = vrcp.f32 %v3033_v44 }
 0x9be   :  { %v5630_v13 = vpop.eup %5629  ;;  %5317 = vmatprep.subr.mxu0 %v7302_v34 }
 0x9bf   :  { %5318 = vmatpush3.msra.mxu0 %v7302_v34  ;;  %v3055_v49 = vmul.f32 %v5630_v13, %v7542_v25  ;;  %v5632_v34 = vpop.eup %5631 }
 0x9c0   :  { %5319 = vmatprep.subr.mxu0 %v7571_v28  ;;  %v3031_v48 = vpop.xlane.xlu1 %3030  ;;  %v7686_v23 = vpop.xlane.xlu0 %2615  ;;  %v3061_v10 = vmul.f32 %v5632_v34, %v7510_v51 }
 0x9c1   :  { %5639 = vrcp.f32 %v3031_v48  ;;  %5320 = vmatpush3.msra.mxu0 %v7571_v28  ;;  %5279 = vmatprep.mubr.f32.mxu0 %v3055_v49 }
 0x9c2   :  { %5321 = vmatprep.subr.mxu0 %v7569_v50  ;;  %5280 = vmatmul.mubr.f32.gmra.mxu0 %v3057_v22 }
 0x9c3   :  { %5322 = vmatpush3.msra.mxu0 %v7569_v50 }
 0x9c4   :  { %5323 = vmatprep.subr.mxu0 %v7580_v2  ;;  %v2614_v12 = vpop.xlane.xlu0 %2613 }
 0x9c5   :  { %5324 = vmatpush3.msra.mxu0 %v7580_v2 }
 0x9c6   :  { %v5634_v25 = vpop.eup %5633 }
 0x9c7   :  { %v5636_v36 = vpop.eup %5635  ;;  %v3059_v57 = vmul.f32 %v5634_v25, %v7559_v56 }
 0x9c8   :  { %v3035_v60 = vpop.xlane.xlu1 %3034  ;;  %v3037_v42 = vpop.xlane.xlu0 %3036  ;;  %v2642_v28 = vmul.f32 %v5636_v36, %v7563_v38 }
 0x9c9   :  { %5641 = vrcp.f32 %v3035_v60  ;;  %5282 = vmatprep.mubr.f32.mxu0 %v3059_v57 }
 0x9ca   :  { %5643 = vrcp.f32 %v3037_v42  ;;  %5338 = vmatprep.mubr.f32.mxu1 %v2642_v28  ;;  %5283 = vmatmul.mubr.f32.gmra.mxu0 %v3061_v10  ;;  %v5638_v52 = vpop.eup %5637 }
 0x9cb   :  { %v3065_v56 = vmul.f32 %v5638_v52, %v7575_v19 }
 0x9cc   :  { %v3039_v50 = vpop.xlane.xlu1 %3038  ;;  %v2620_v61 = vpop.xlane.xlu0 %2619 }
 0x9cd   :  { %5645 = vrcp.f32 %v3039_v50 }
 0x9ce   :  { %v5640_v2 = vpop.eup %5639 }
 0x9cf   :  { %v3063_v35 = vmul.f32 %v5640_v2, %v7588_v58 }
 0x9d0   :  { %v2618_v9 = vpop.xlane.xlu0 %2617  ;;  %v3043_v45 = vpop.xlane.xlu1 %3042 }
 0x9d1   :  { %5285 = vmatprep.mubr.f32.mxu0 %v3063_v35  ;;  %5647 = vrcp.f32 %v3043_v45 }
 0x9d2   :  { %5286 = vmatmul.mubr.f32.gmra.mxu0 %v3065_v56 }
 0x9d4   :  { %v3041_v51 = vpop.xlane.xlu0 %3040 }
 0x9d5   :  { %5649 = vrcp.f32 %v3041_v51 }
 0x9d6   :  { %v5642_v38 = vpop.eup %5641  ;;  %5651 = vrcp.f32 %v7647_v63 }
 0x9d7   :  { %v5644_v29 = vpop.eup %5643  ;;  %v3067_v39 = vmul.f32 %v5642_v38, %v7602_v43 }
 0x9d8   :  { %v2624_v37 = vpop.xlane.xlu0 %2623  ;;  %v3069_v32 = vmul.f32 %v5644_v29, %v7598_v53 }
 0x9d9   :  { %5288 = vmatprep.mubr.f32.mxu0 %v3067_v39 }
 0x9da   :  { %v5646_v8 = vpop.eup %5645  ;;  %5289 = vmatmul.mubr.f32.gmra.mxu0 %v3069_v32 }
 0x9db   :  { %v3071_v58 = vmul.f32 %v5646_v8, %v7610_v18 }
 0x9dc   :  { %v2622_v33 = vpop.xlane.xlu0 %2621 }
 0x9dd   :  { %5291 = vmatprep.mubr.f32.mxu0 %v3071_v58 }
 0x9de   :  { %v5648_v44 = vpop.eup %5647 }
 0x9df   :  { %v3075_v43 = vmul.f32 %v5648_v44, %v7618_v4 }
 0x9e0   :  { %v3045_v19 = vpop.xlane.xlu0 %3044 }
 0x9e1   :  { %5653 = vrcp.f32 %v3045_v19  ;;  %v7759_v19 = vld [vmem:[%s8402_s4 + $0x3] ss:$0 sm:$0xff] }
 0x9e2   :  { %v5650_v27 = vpop.eup %5649  ;;  %5655 = vrcp.f32 %v7645_v47 }
 0x9e3   :  { %v3073_v13 = vmul.f32 %v5650_v27, %v7622_v7  ;;  %v5652_v53 = vpop.eup %5651  ;;  %5657 = vrcp.f32 %v7652_v46 }
 0x9e4   :  { %v2630_v18 = vmul.f32 %v5652_v53, %v7512_v15  ;;  %5659 = vrcp.f32 %v7667_v40  ;;  %v2628_v4 = vpop.xlane.xlu0 %2627  ;;  %v3272_v40 = vpop.permute.xlu1 %3271 }
 0x9e5   :  { %5292 = vmatmul.mubr.f32.gmra.mxu0 %v3073_v13  ;;  %5661 = vrcp.f32 %v2614_v12 }
 0x9e6   :  { %5294 = vmatprep.mubr.f32.mxu0 %v3075_v43  ;;  %5663 = vrcp.f32 %v7649_v55 }
 0x9e7   :  { %5665 = vrcp.f32 %v7670_v20 }
 0x9e8   :  { %5667 = vrcp.f32 %v7686_v23 }
 0x9e9   :  { %5669 = vrcp.f32 %v2618_v9 }
 0x9ea   :  { %5671 = vrcp.f32 %v7657_v54 }
 0x9eb   :  { %5673 = vrcp.f32 %v2620_v61 }
 0x9ec   :  { %5675 = vrcp.f32 %v2622_v33 }
 0x9ed   :  { %5677 = vrcp.f32 %v2624_v37  ;;  %v7751_v37 = vld [vmem:[%s8402_s4 + $0x2] ss:$0 sm:$0xff] }
 0x9ee   :  { %v5654_v49 = vpop.eup %5653 }
 0x9ef   :  { %v3077_v48 = vmul.f32 %v5654_v49, %v7631_v30  ;;  %v5656_v7 = vpop.eup %5655 }
 0x9f0   :  { %v5658_v30 = vpop.eup %5657  ;;  %v2632_v54 = vmul.f32 %v5656_v7, %v7495_v41 }
 0x9f1   :  { %5295 = vmatmul.mubr.f32.gmra.mxu0 %v3077_v48  ;;  %v5660_v47 = vpop.eup %5659  ;;  %v2634_v12 = vmul.f32 %v5658_v30, %v7531_v6 }
 0x9f2   :  { %5329 = vmatprep.mubr.f32.mxu0 %v2630_v18  ;;  %v5662_v46 = vpop.eup %5661  ;;  %v2644_v23 = vmul.f32 %v5660_v47, %v7545_v3 }
 0x9f3   :  { %v5664_v55 = vpop.eup %5663  ;;  %v2646_v34 = vmul.f32 %v5662_v46, %v7595_v21 }
 0x9f4   :  { %v5666_v20 = vpop.eup %5665  ;;  %v2636_v57 = vmul.f32 %v5664_v55, %v7520_v16 }
 0x9f5   :  { %v5668_v22 = vpop.eup %5667  ;;  %v2638_v3 = vmul.f32 %v5666_v20, %v7554_v17 }
 0x9f6   :  { %v5670_v25 = vpop.eup %5669  ;;  %v2648_v60 = vmul.f32 %v5668_v22, %v7583_v14 }
 0x9f7   :  { %v5672_v36 = vpop.eup %5671  ;;  %v2650_v42 = vmul.f32 %v5670_v25, %v7614_v5 }
 0x9f8   :  { %v5674_v41 = vpop.eup %5673  ;;  %v2640_v6 = vmul.f32 %v5672_v36, %v7537_v59 }
 0x9f9   :  { %v5676_v28 = vpop.eup %5675  ;;  %v2652_v21 = vmul.f32 %v5674_v41, %v7606_v11 }
 0x9fa   :  { %v5678_v10 = vpop.eup %5677  ;;  %v2654_v50 = vmul.f32 %v5676_v28, %v7628_v31 }
 0x9fb   :  { %v2656_v17 = vmul.f32 %v5678_v10, %v7625_v1 }
 0x9fd   :  { %v2626_v15 = vpop.xlane.xlu0 %2625 }
 0x9fe   :  { %5679 = vrcp.f32 %v2626_v15 }
 0x9ff   :  { %5681 = vrcp.f32 %v2628_v4 }
 0xa01   :  { %v3274_v63 = vpop.permute.xlu0 %3273 }
 0xa02   :  { %5325 = vmatprep.subr.mxu0 %v3274_v63  ;;  %5367 = vmatprep.subr.mxu1 %v3274_v63 }
 0xa03   :  { %5326 = vmatpush3.msra.mxu0 %v3274_v63  ;;  %5383 = vmatpush3.msra.mxu1 %v3274_v63 }
 0xa04   :  { %5327 = vmatprep.subr.mxu0 %v3272_v40  ;;  %5368 = vmatprep.subr.mxu1 %v3272_v40 }
 0xa05   :  { %5328 = vmatpush3.msra.mxu0 %v3272_v40  ;;  %5384 = vmatpush3.msra.mxu1 %v3272_v40 }
 0xa06   :  { %5330 = vmatmul.mubr.f32.vlgmr.msra.gmra.mxu0 %v2632_v54  ;;  %5339 = vmatmul.mubr.f32.vlgmr.msra.gmra.mxu1 %v2644_v23 }
 0xa07   :  { %5332 = vmatprep.mubr.f32.mxu0 %v2634_v12  ;;  %5341 = vmatprep.mubr.f32.mxu1 %v2646_v34 }
 0xa0a   :  { %5333 = vmatmul.mubr.f32.gmra.mxu0 %v2636_v57  ;;  %5342 = vmatmul.mubr.f32.gmra.mxu1 %v2648_v60 }
 0xa0b   :  { %5335 = vmatprep.mubr.f32.mxu0 %v2638_v3  ;;  %5344 = vmatprep.mubr.f32.mxu1 %v2650_v42  ;;  %v5680_v16 = vpop.eup %5679 }
 0xa0c   :  { %v5682_v14 = vpop.eup %5681  ;;  %v2658_v5 = vmul.f32 %v5680_v16, %v7640_v62 }
 0xa0d   :  { %v2660_v61 = vmul.f32 %v5682_v14, %v7636_v24  ;;  %v7743_v24 = vld [vmem:[%s8402_s4 + $0x5] ss:$0 sm:$0xff] }
 0xa0e   :  { %5336 = vmatmul.mubr.f32.gmra.mxu0 %v2640_v6  ;;  %5345 = vmatmul.mubr.f32.gmra.mxu1 %v2652_v21 }
 0xa0f   :  { %5347 = vmatprep.mubr.f32.mxu1 %v2654_v50 }
 0xa12   :  { %5348 = vmatmul.mubr.f32.gmra.mxu1 %v2656_v17 }
 0xa13   :  { %5350 = vmatprep.mubr.f32.mxu1 %v2658_v5 }
 0xa16   :  { %5351 = vmatmul.mubr.f32.gmra.mxu1 %v2660_v61 }
 0xa6a   :  { %v7728_v59 = vpop.f32.mrf.mxu0 }
 0xa6c   :  { %v7730_v11 = vpop.f32.mrf.mxu0 }
 0xa76   :  { %v7732_v52 = vpop.f32.mrf.mxu0 }
 0xa78   :  { %v7734_v31 = vpop.f32.mrf.mxu0 }
 0xa82   :  { %v7736_v2 = vpop.f32.mrf.mxu0 }
 0xa84   :  { %v7738_v35 = vpop.f32.mrf.mxu0 }
 0xa8a   :  { %v5284_v1 = vpop.f32.mrf.mxu0 }
 0xa8c   :  { %v3222_v9 = vpop.f32.mrf.mxu0 }
 0xa92   :  { %v5287_v62 = vpop.f32.mrf.mxu0 }
 0xa94   :  { %v3232_v38 = vpop.f32.mrf.mxu0 }
 0xa9a   :  { %v5290_v8 = vpop.f32.mrf.mxu0 }
 0xa9c   :  { %v3242_v4 = vpop.f32.mrf.mxu0 }
 0xaa5   :  { %v5293_v47 = vpop.f32.mrf.mxu0 }
 0xaa7   :  { %v3252_v22 = vpop.f32.mrf.mxu0 }
 0xab1   :  { %v5296_v57 = vpop.f32.mrf.mxu0 }
 0xab3   :  { %v3262_v10 = vpop.f32.mrf.mxu0 }
 0xac6   :  { %v5340_v56 = vpop.f32.mrf.mxu1  ;;  %v5331_v14 = vpop.f32.mrf.mxu0 }
 0xac7   :  { %v3421_v45 = vadd.f32 %v5340_v56, %v5284_v1 }
 0xac8   :  { %v3415_v51 = vpop.f32.mrf.mxu1 }
 0xac9   :  { %v7746_v29 = vadd.f32 %v7743_v24, %v3421_v45  ;;  %v3416_v39 = vadd.f32 %v3415_v51, %v3222_v9  ;;  %v3385_v51 = vpop.f32.mrf.mxu0 }
 0xaca   :  { %v5343_v32 = vpop.f32.mrf.mxu1 }
 0xacb   :  { %v7754_v58 = vadd.f32 %v7743_v24, %v3416_v39  ;;  %v3431_v33 = vadd.f32 %v5343_v32, %v5287_v62  ;;  %v3495_v27 = vmul.f32 %v7751_v37, %v7746_v29  ;;  %v3563_v18 = vmul.f32 %v7759_v19, %v7746_v29 }
 0xacc   :  { %v3425_v44 = vpop.f32.mrf.mxu1 }
 0xacd   :  { %v3426_v13 = vadd.f32 %v3425_v44, %v3232_v38  ;;  %v7764_v43 = vadd.f32 %v7743_v24, %v3431_v33  ;;  %v3525_v53 = vsel %vm104_vm0, %v3495_v27, 0.0  ;;  %v3494_v48 = vmul.f32 %v7751_v37, %v7754_v58 }
 0xace   :  { %v5346_v49 = vpop.f32.mrf.mxu1  ;;  %3526 = vadd.xlane.f32.xlu0 %v3525_v53  ;;  %v3562_v30 = vmul.f32 %v7759_v19, %v7754_v58  ;;  %v3593_v55 = vsel %vm104_vm0, %v3563_v18, 0.0  ;;  %v3391_v53 = vadd.f32 %v5331_v14, %v7728_v59 }
 0xacf   :  { %v7772_v15 = vadd.f32 %v7743_v24, %v3426_v13  ;;  %v3522_v7 = vsel %vm104_vm0, %v3494_v48, 0.0  ;;  %v3441_v46 = vadd.f32 %v5346_v49, %v5290_v8  ;;  %v3497_v40 = vmul.f32 %v7751_v37, %v7764_v43  ;;  %v5334_v13 = vpop.f32.mrf.mxu0 }
 0xad0   :  { %v3435_v63 = vpop.f32.mrf.mxu1  ;;  %3523 = vadd.xlane.f32.xlu1 %v3522_v7  ;;  %v3590_v54 = vsel %vm104_vm0, %v3562_v30, 0.0  ;;  %v3565_v36 = vmul.f32 %v7759_v19, %v7764_v43  ;;  %v7833_v59 = vadd.f32 %v7743_v24, %v3391_v53 }
 0xad1   :  { %v3436_v20 = vadd.f32 %v3435_v63, %v3242_v4  ;;  %v3496_v23 = vmul.f32 %v7751_v37, %v7772_v15  ;;  %v7784_v34 = vadd.f32 %v7743_v24, %v3441_v46  ;;  %v3531_v25 = vsel %vm104_vm0, %v3497_v40, 0.0 }
 0xad2   :  { %3594 = vadd.xlane.f32.xlu0 %v3593_v55  ;;  %v5349_v12 = vpop.f32.mrf.mxu1  ;;  %v3564_v3 = vmul.f32 %v7759_v19, %v7772_v15  ;;  %v3599_v6 = vsel %vm104_vm0, %v3565_v36, 0.0  ;;  %v3386_v63 = vadd.f32 %v3385_v51, %v7730_v11 }
 0xad3   :  { %v7790_v60 = vadd.f32 %v7743_v24, %v3436_v20  ;;  %v3528_v41 = vsel %vm104_vm0, %v3496_v23, 0.0  ;;  %v3451_v28 = vadd.f32 %v5349_v12, %v5293_v47  ;;  %v3499_v21 = vmul.f32 %v7751_v37, %v7784_v34  ;;  %v3395_v47 = vpop.f32.mrf.mxu0 }
 0xad4   :  { %3591 = vadd.xlane.f32.xlu1 %v3590_v54  ;;  %v3445_v42 = vpop.f32.mrf.mxu1  ;;  %v3596_v16 = vsel %vm104_vm0, %v3564_v3, 0.0  ;;  %v3567_v9 = vmul.f32 %v7759_v19, %v7784_v34  ;;  %v7843_v23 = vadd.f32 %v7743_v24, %v3386_v63  ;;  %v3557_v12 = vmul.f32 %v7759_v19, %v7833_v59 }
 0xad5   :  { %v3446_v50 = vadd.f32 %v3445_v42, %v3252_v22  ;;  %v3498_v17 = vmul.f32 %v7751_v37, %v7790_v60  ;;  %v7802_v61 = vadd.f32 %v7743_v24, %v3451_v28  ;;  %v3537_v1 = vsel %vm104_vm0, %v3499_v21, 0.0  ;;  %v5337_v54 = vpop.f32.mrf.mxu0 }
 0xad6   :  { %3532 = vadd.xlane.f32.xlu0 %v3531_v25  ;;  %v5352_v5 = vpop.f32.mrf.mxu1  ;;  %v3566_v45 = vmul.f32 %v7759_v19, %v7790_v60  ;;  %v3605_v32 = vsel %vm104_vm0, %v3567_v9, 0.0  ;;  %v3401_v22 = vadd.f32 %v5334_v13, %v7732_v52  ;;  %v3396_v25 = vadd.f32 %v3395_v47, %v7734_v31 }
 0xad7   :  { %v7808_v62 = vadd.f32 %v7743_v24, %v3446_v50  ;;  %v3534_v56 = vsel %vm104_vm0, %v3498_v17, 0.0  ;;  %v3461_v39 = vadd.f32 %v5352_v5, %v5296_v57  ;;  %v3501_v8 = vmul.f32 %v7751_v37, %v7802_v61 }
 0xad8   :  { %3529 = vadd.xlane.f32.xlu1 %v3528_v41  ;;  %v3455_v38 = vpop.f32.mrf.mxu1  ;;  %v3602_v44 = vsel %vm104_vm0, %v3566_v45, 0.0  ;;  %v3569_v18 = vmul.f32 %v7759_v19, %v7802_v61  ;;  %v3489_v57 = vmul.f32 %v7751_v37, %v7833_v59  ;;  %v3405_v41 = vpop.f32.mrf.mxu0  ;;  %v7854_v3 = vadd.f32 %v7743_v24, %v3401_v22 }
 0xad9   :  { %v3456_v33 = vadd.f32 %v3455_v38, %v3262_v10  ;;  %v3500_v27 = vmul.f32 %v7751_v37, %v7808_v62  ;;  %v7821_v49 = vadd.f32 %v7743_v24, %v3461_v39  ;;  %v3543_v48 = vsel %vm104_vm0, %v3501_v8, 0.0 }
 0xada   :  { %3600 = vadd.xlane.f32.xlu0 %v3599_v6  ;;  %v3568_v30 = vmul.f32 %v7759_v19, %v7808_v62  ;;  %v3611_v46 = vsel %vm104_vm0, %v3569_v18, 0.0  ;;  %v3575_v52 = vsel %vm104_vm0, %v3557_v12, 0.0  ;;  %v3488_v42 = vmul.f32 %v7751_v37, %v7843_v23 }
 0xadb   :  { %v7827_v4 = vadd.f32 %v7743_v24, %v3456_v33  ;;  %v3540_v7 = vsel %vm104_vm0, %v3500_v27, 0.0  ;;  %v3503_v55 = vmul.f32 %v7751_v37, %v7821_v49  ;;  %v7860_v28 = vadd.f32 %v7743_v24, %v3396_v25 }
 0xadc   :  { %3597 = vadd.xlane.f32.xlu1 %v3596_v16  ;;  %v3608_v40 = vsel %vm104_vm0, %v3568_v30, 0.0  ;;  %v3406_v31 = vadd.f32 %v3405_v41, %v7738_v35  ;;  %v3507_v6 = vsel %vm104_vm0, %v3489_v57, 0.0  ;;  %v3556_v21 = vmul.f32 %v7759_v19, %v7843_v23 }
 0xadd   :  { %v3502_v20 = vmul.f32 %v7751_v37, %v7827_v4  ;;  %v3549_v11 = vsel %vm104_vm0, %v3503_v55, 0.0  ;;  %v3504_v10 = vsel %vm104_vm0, %v3488_v42, 0.0  ;;  %v3491_v50 = vmul.f32 %v7751_v37, %v7854_v3 }
 0xade   :  { %3538 = vadd.xlane.f32.xlu0 %v3537_v1  ;;  %v7870_v16 = vadd.f32 %v7743_v24, %v3406_v31  ;;  %v3572_v17 = vsel %vm104_vm0, %v3556_v21, 0.0  ;;  %v3558_v35 = vmul.f32 %v7759_v19, %v7860_v28  ;;  %v3411_v14 = vadd.f32 %v5337_v54, %v7736_v2 }
 0xadf   :  { %v3546_v36 = vsel %vm104_vm0, %v3502_v20, 0.0  ;;  %v3513_v5 = vsel %vm104_vm0, %v3491_v50, 0.0  ;;  %v3559_v1 = vmul.f32 %v7759_v19, %v7854_v3  ;;  %v3490_v2 = vmul.f32 %v7751_v37, %v7860_v28 }
 0xae0   :  { %3535 = vadd.xlane.f32.xlu1 %v3534_v56  ;;  %v3578_v9 = vsel %vm104_vm0, %v3558_v35, 0.0  ;;  %v3492_v56 = vmul.f32 %v7751_v37, %v7870_v16  ;;  %v7883_v45 = vadd.f32 %v7743_v24, %v3411_v14  ;;  %v3560_v39 = vmul.f32 %v7759_v19, %v7870_v16 }
 0xae1   :  { %v3581_v51 = vsel %vm104_vm0, %v3559_v1, 0.0  ;;  %v3570_v33 = vmul.f32 %v7759_v19, %v7827_v4 }
 0xae2   :  { %3606 = vadd.xlane.f32.xlu0 %v3605_v32  ;;  %v3516_v38 = vsel %vm104_vm0, %v3492_v56, 0.0  ;;  %v3510_v32 = vsel %vm104_vm0, %v3490_v2, 0.0  ;;  %v3493_v8 = vmul.f32 %v7751_v37, %v7883_v45  ;;  %v3584_v24 = vsel %vm104_vm0, %v3560_v39, 0.0 }
 0xae3   :  { %v3561_v27 = vmul.f32 %v7759_v19, %v7883_v45  ;;  %v3614_v13 = vsel %vm104_vm0, %v3570_v33, 0.0  ;;  %v3571_v37 = vmul.f32 %v7759_v19, %v7821_v49 }
 0xae4   :  { %3603 = vadd.xlane.f32.xlu1 %v3602_v44  ;;  %v3519_v44 = vsel %vm104_vm0, %v3493_v8, 0.0 }
 0xae5   :  { %v3587_v53 = vsel %vm104_vm0, %v3561_v27, 0.0 }
 0xae6   :  { %3544 = vadd.xlane.f32.xlu0 %v3543_v48  ;;  %v3617_v48 = vsel %vm104_vm0, %v3571_v37, 0.0 }
 0xae8   :  { %3541 = vadd.xlane.f32.xlu1 %v3540_v7 }
 0xaea   :  { %3612 = vadd.xlane.f32.xlu0 %v3611_v46 }
 0xaec   :  { %3609 = vadd.xlane.f32.xlu1 %v3608_v40  ;;  %v7912_v40 = vld [vmem:[%s8402_s4 + $0x6] ss:$0 sm:$0xff] }
 0xaee   :  { %3550 = vadd.xlane.f32.xlu0 %v3549_v11 }
 0xaf0   :  { %3547 = vadd.xlane.f32.xlu1 %v3546_v36 }
 0xaf2   :  { %3576 = vadd.xlane.f32.xlu0 %v3575_v52 }
 0xaf4   :  { %3508 = vadd.xlane.f32.xlu1 %v3507_v6 }
 0xaf6   :  { %3505 = vadd.xlane.f32.xlu0 %v3504_v10 }
 0xaf8   :  { %3573 = vadd.xlane.f32.xlu1 %v3572_v17 }
 0xafa   :  { %3514 = vadd.xlane.f32.xlu0 %v3513_v5 }
 0xafc   :  { %3579 = vadd.xlane.f32.xlu1 %v3578_v9 }
 0xafe   :  { %3582 = vadd.xlane.f32.xlu0 %v3581_v51 }
 0xb00   :  { %3517 = vadd.xlane.f32.xlu1 %v3516_v38 }
 0xb02   :  { %3511 = vadd.xlane.f32.xlu0 %v3510_v32 }
 0xb04   :  { %3585 = vadd.xlane.f32.xlu1 %v3584_v24 }
 0xb06   :  { %3520 = vadd.xlane.f32.xlu0 %v3519_v44 }
 0xb08   :  { %3615 = vadd.xlane.f32.xlu1 %v3614_v13 }
 0xb0a   :  { %3588 = vadd.xlane.f32.xlu0 %v3587_v53 }
 0xb0e   :  { %3618 = vadd.xlane.f32.xlu0 %v3617_v48 }
 0xb57   :  { %v3527_v18 = vpop.xlane.xlu0 %3526 }
 0xb58   :  { %v3627_v7 = vmul.f32 %v6501_v0, %v3527_v18 }
 0xb59   :  { %v3524_v30 = vpop.xlane.xlu1 %3523 }
 0xb5a   :  { %v3626_v47 = vmul.f32 %v6501_v0, %v3524_v30  ;;  %v3643_v46 = vadd.f32 %v3627_v7, %v7746_v29 }
 0xb5b   :  { %v3595_v63 = vpop.xlane.xlu0 %3594 }
 0xb5c   :  { %v3659_v55 = vmul.f32 %v3595_v63, %v6512_v26  ;;  %v3642_v20 = vadd.f32 %v3626_v47, %v7754_v58 }
 0xb5d   :  { %v3592_v19 = vpop.xlane.xlu1 %3591 }
 0xb5e   :  { %v3675_v54 = vadd.f32 %v3659_v55, %v3643_v46  ;;  %v3658_v22 = vmul.f32 %v3592_v19, %v6512_v26 }
 0xb5f   :  { %v3533_v11 = vpop.xlane.xlu0 %3532 }
 0xb60   :  { %v7917_v12 = vadd.f32 %v7912_v40, %v3675_v54  ;;  %v3674_v25 = vadd.f32 %v3658_v22, %v3642_v20  ;;  %v3629_v29 = vmul.f32 %v6501_v0, %v3533_v11 }
 0xb61   :  { %v3530_v36 = vpop.xlane.xlu1 %3529 }
 0xb62   :  { %v7921_v57 = vadd.f32 %v7912_v40, %v3674_v25  ;;  %v3628_v41 = vmul.f32 %v6501_v0, %v3530_v36  ;;  %v3711_v52 = vmul.f32 %v6501_v0, %v7917_v12  ;;  %v3645_v58 = vadd.f32 %v3629_v29, %v7764_v43 }
 0xb63   :  { %v3601_v42 = vpop.xlane.xlu0 %3600  ;;  %v3831_v10 = vmul.f32 %v7917_v12, %v6512_v26 }
 0xb64   :  { %v3661_v31 = vmul.f32 %v3601_v42, %v6512_v26  ;;  %v3741_v6 = vsel %vm104_vm0, %v3711_v52, 0.0  ;;  %v3710_v21 = vmul.f32 %v6501_v0, %v7921_v57  ;;  %v3644_v50 = vadd.f32 %v3628_v41, %v7772_v15 }
 0xb65   :  { %v3598_v17 = vpop.xlane.xlu1 %3597  ;;  %3742 = vadd.xlane.f32.xlu0 %v3741_v6  ;;  %v3830_v5 = vmul.f32 %v7921_v57, %v6512_v26  ;;  %v3861_v15 = vsel %vm104_vm0, %v3831_v10, 0.0 }
 0xb66   :  { %v3677_v35 = vadd.f32 %v3661_v31, %v3645_v58  ;;  %v3660_v14 = vmul.f32 %v3598_v17, %v6512_v26  ;;  %v3738_v43 = vsel %vm104_vm0, %v3710_v21, 0.0 }
 0xb67   :  { %v3539_v1 = vpop.xlane.xlu0 %3538  ;;  %3739 = vadd.xlane.f32.xlu1 %v3738_v43  ;;  %v3858_v32 = vsel %vm104_vm0, %v3830_v5, 0.0 }
 0xb68   :  { %v7939_v9 = vadd.f32 %v7912_v40, %v3677_v35  ;;  %v3676_v56 = vadd.f32 %v3660_v14, %v3644_v50  ;;  %v3631_v51 = vmul.f32 %v6501_v0, %v3539_v1 }
 0xb69   :  { %v3536_v2 = vpop.xlane.xlu1 %3535  ;;  %3862 = vadd.xlane.f32.xlu0 %v3861_v15 }
 0xb6a   :  { %v7944_v38 = vadd.f32 %v7912_v40, %v3676_v56  ;;  %v3630_v39 = vmul.f32 %v6501_v0, %v3536_v2  ;;  %v3713_v8 = vmul.f32 %v6501_v0, %v7939_v9  ;;  %v3647_v24 = vadd.f32 %v3631_v51, %v7784_v34 }
 0xb6b   :  { %v3607_v33 = vpop.xlane.xlu0 %3606  ;;  %3859 = vadd.xlane.f32.xlu1 %v3858_v32  ;;  %v3833_v53 = vmul.f32 %v7939_v9, %v6512_v26 }
 0xb6c   :  { %v3663_v44 = vmul.f32 %v3607_v33, %v6512_v26  ;;  %v3747_v27 = vsel %vm104_vm0, %v3713_v8, 0.0  ;;  %v3712_v13 = vmul.f32 %v6501_v0, %v7944_v38  ;;  %v3646_v37 = vadd.f32 %v3630_v39, %v7790_v60 }
 0xb6d   :  { %v3604_v48 = vpop.xlane.xlu1 %3603  ;;  %3748 = vadd.xlane.f32.xlu0 %v3747_v27  ;;  %v3832_v30 = vmul.f32 %v7944_v38, %v6512_v26  ;;  %v3867_v60 = vsel %vm104_vm0, %v3833_v53, 0.0 }
 0xb6e   :  { %v3679_v18 = vadd.f32 %v3663_v44, %v3647_v24  ;;  %v3662_v7 = vmul.f32 %v3604_v48, %v6512_v26  ;;  %v3744_v34 = vsel %vm104_vm0, %v3712_v13, 0.0 }
 0xb6f   :  { %v3545_v47 = vpop.xlane.xlu0 %3544  ;;  %3745 = vadd.xlane.f32.xlu1 %v3744_v34  ;;  %v3864_v22 = vsel %vm104_vm0, %v3832_v30, 0.0 }
 0xb70   :  { %v7963_v63 = vadd.f32 %v7912_v40, %v3679_v18  ;;  %v3678_v46 = vadd.f32 %v3662_v7, %v3646_v37  ;;  %v3633_v55 = vmul.f32 %v6501_v0, %v3545_v47 }
 0xb71   :  { %v3542_v19 = vpop.xlane.xlu1 %3541  ;;  %3868 = vadd.xlane.f32.xlu0 %v3867_v60 }
 0xb72   :  { %v7968_v20 = vadd.f32 %v7912_v40, %v3678_v46  ;;  %v3632_v54 = vmul.f32 %v6501_v0, %v3542_v19  ;;  %v3715_v11 = vmul.f32 %v6501_v0, %v7963_v63  ;;  %v3649_v25 = vadd.f32 %v3633_v55, %v7802_v61 }
 0xb73   :  { %v3613_v29 = vpop.xlane.xlu0 %3612  ;;  %3865 = vadd.xlane.f32.xlu1 %v3864_v22  ;;  %v3835_v58 = vmul.f32 %v7963_v63, %v6512_v26 }
 0xb74   :  { %v3665_v36 = vmul.f32 %v3613_v29, %v6512_v26  ;;  %v3753_v41 = vsel %vm104_vm0, %v3715_v11, 0.0  ;;  %v3714_v52 = vmul.f32 %v6501_v0, %v7968_v20  ;;  %v3648_v42 = vadd.f32 %v3632_v54, %v7808_v62 }
 0xb75   :  { %v3610_v31 = vpop.xlane.xlu1 %3609  ;;  %3754 = vadd.xlane.f32.xlu0 %v3753_v41  ;;  %v3834_v10 = vmul.f32 %v7968_v20, %v6512_v26  ;;  %v3873_v14 = vsel %vm104_vm0, %v3835_v58, 0.0 }
 0xb76   :  { %v3681_v6 = vadd.f32 %v3665_v36, %v3649_v25  ;;  %v3664_v21 = vmul.f32 %v3610_v31, %v6512_v26  ;;  %v3750_v61 = vsel %vm104_vm0, %v3714_v52, 0.0 }
 0xb77   :  { %v3551_v50 = vpop.xlane.xlu0 %3550  ;;  %3751 = vadd.xlane.f32.xlu1 %v3750_v61  ;;  %v3870_v5 = vsel %vm104_vm0, %v3834_v10, 0.0 }
 0xb78   :  { %v7987_v17 = vadd.f32 %v7912_v40, %v3681_v6  ;;  %v3680_v35 = vadd.f32 %v3664_v21, %v3648_v42  ;;  %v3635_v29 = vmul.f32 %v6501_v0, %v3551_v50 }
 0xb79   :  { %v3548_v43 = vpop.xlane.xlu1 %3547  ;;  %3874 = vadd.xlane.f32.xlu0 %v3873_v14 }
 0xb7a   :  { %v7991_v62 = vadd.f32 %v7912_v40, %v3680_v35  ;;  %v3717_v1 = vmul.f32 %v6501_v0, %v7987_v17  ;;  %v3837_v2 = vmul.f32 %v7987_v17, %v6512_v26  ;;  %v3634_v30 = vmul.f32 %v6501_v0, %v3548_v43 }
 0xb7b   :  { %v3577_v56 = vpop.xlane.xlu0 %3576  ;;  %3871 = vadd.xlane.f32.xlu1 %v3870_v5  ;;  %v3651_v31 = vadd.f32 %v3635_v29, %v7821_v49 }
 0xb7c   :  { %v3759_v51 = vsel %vm104_vm0, %v3717_v1, 0.0  ;;  %v3716_v15 = vmul.f32 %v6501_v0, %v7991_v62  ;;  %v3836_v8 = vmul.f32 %v7991_v62, %v6512_v26  ;;  %v3879_v33 = vsel %vm104_vm0, %v3837_v2, 0.0 }
 0xb7d   :  { %v3509_v39 = vpop.xlane.xlu1 %3508  ;;  %3760 = vadd.xlane.f32.xlu0 %v3759_v51  ;;  %v3650_v54 = vadd.f32 %v3634_v30, %v7827_v4 }
 0xb7e   :  { %v3756_v32 = vsel %vm104_vm0, %v3716_v15, 0.0  ;;  %v3876_v27 = vsel %vm104_vm0, %v3836_v8, 0.0  ;;  %v3621_v60 = vmul.f32 %v6501_v0, %v3509_v39 }
 0xb7f   :  { %3757 = vadd.xlane.f32.xlu1 %v3756_v32  ;;  %v3506_v24 = vpop.xlane.xlu0 %3505 }
 0xb80   :  { %v3620_v18 = vmul.f32 %v6501_v0, %v3506_v24  ;;  %v3637_v41 = vadd.f32 %v3621_v60, %v7833_v59 }
 0xb81   :  { %v3574_v44 = vpop.xlane.xlu1 %3573  ;;  %3880 = vadd.xlane.f32.xlu0 %v3879_v33 }
 0xb82   :  { %v3636_v47 = vadd.f32 %v3620_v18, %v7843_v23  ;;  %v3652_v46 = vmul.f32 %v3574_v44, %v6512_v26  ;;  %v3653_v23 = vmul.f32 %v3577_v56, %v6512_v26 }
 0xb83   :  { %3877 = vadd.xlane.f32.xlu1 %v3876_v27  ;;  %v3515_v13 = vpop.xlane.xlu0 %3514 }
 0xb84   :  { %v3668_v22 = vadd.f32 %v3652_v46, %v3636_v47  ;;  %v3669_v21 = vadd.f32 %v3653_v23, %v3637_v41  ;;  %v3623_v50 = vmul.f32 %v6501_v0, %v3515_v13 }
 0xb85   :  { %v3580_v53 = vpop.xlane.xlu1 %3579 }
 0xb86   :  { %v8018_v58 = vadd.f32 %v7912_v40, %v3668_v22  ;;  %v3654_v61 = vmul.f32 %v3580_v53, %v6512_v26  ;;  %v8034_v49 = vadd.f32 %v7912_v40, %v3669_v21  ;;  %v3639_v51 = vadd.f32 %v3623_v50, %v7854_v3 }
 0xb87   :  { %v3583_v37 = vpop.xlane.xlu0 %3582 }
 0xb88   :  { %v3704_v43 = vmul.f32 %v6501_v0, %v8018_v58  ;;  %v3655_v5 = vmul.f32 %v3583_v37, %v6512_v26  ;;  %v3824_v15 = vmul.f32 %v8018_v58, %v6512_v26  ;;  %v3705_v3 = vmul.f32 %v6501_v0, %v8034_v49 }
 0xb89   :  { %v3518_v48 = vpop.xlane.xlu1 %3517 }
 0xb8a   :  { %v3624_v1 = vmul.f32 %v6501_v0, %v3518_v48  ;;  %v3720_v32 = vsel %vm104_vm0, %v3704_v43, 0.0  ;;  %v3671_v24 = vadd.f32 %v3655_v5, %v3639_v51  ;;  %v3840_v53 = vsel %vm104_vm0, %v3824_v15, 0.0 }
 0xb8b   :  { %v3512_v7 = vpop.xlane.xlu0 %3511  ;;  %v3723_v18 = vsel %vm104_vm0, %v3705_v3, 0.0 }
 0xb8c   :  { %v3622_v11 = vmul.f32 %v6501_v0, %v3512_v7  ;;  %v3640_v33 = vadd.f32 %v3624_v1, %v7870_v16  ;;  %v8060_v48 = vadd.f32 %v7912_v40, %v3671_v24  ;;  %v3825_v7 = vmul.f32 %v8034_v49, %v6512_v26 }
 0xb8d   :  { %v3586_v34 = vpop.xlane.xlu1 %3585 }
 0xb8e   :  { %v3638_v42 = vadd.f32 %v3622_v11, %v7860_v28  ;;  %v3656_v39 = vmul.f32 %v3586_v34, %v6512_v26  ;;  %v3843_v60 = vsel %vm104_vm0, %v3825_v7, 0.0 }
 0xb8f   :  { %v3521_v55 = vpop.xlane.xlu0 %3520 }
 0xb90   :  { %v3670_v35 = vadd.f32 %v3654_v61, %v3638_v42  ;;  %v3672_v27 = vadd.f32 %v3656_v39, %v3640_v33  ;;  %v3625_v13 = vmul.f32 %v6501_v0, %v3521_v55 }
 0xb91   :  { %v3616_v19 = vpop.xlane.xlu1 %3615 }
 0xb92   :  { %v3666_v25 = vmul.f32 %v3616_v19, %v6512_v26  ;;  %v8045_v2 = vadd.f32 %v7912_v40, %v3670_v35  ;;  %v8067_v34 = vadd.f32 %v7912_v40, %v3672_v27  ;;  %v3641_v30 = vadd.f32 %v3625_v13, %v7883_v45 }
 0xb93   :  { %v3589_v36 = vpop.xlane.xlu0 %3588  ;;  %v3707_v19 = vmul.f32 %v6501_v0, %v8060_v48 }
 0xb94   :  { %v3682_v52 = vadd.f32 %v3666_v25, %v3650_v54  ;;  %v3706_v37 = vmul.f32 %v6501_v0, %v8045_v2  ;;  %v3657_v16 = vmul.f32 %v3589_v36, %v6512_v26  ;;  %v3826_v46 = vmul.f32 %v8045_v2, %v6512_v26 }
 0xb95   :  { %v3708_v22 = vmul.f32 %v6501_v0, %v8067_v34  ;;  %v3729_v11 = vsel %vm104_vm0, %v3707_v19, 0.0  ;;  %v3827_v25 = vmul.f32 %v8060_v48, %v6512_v26  ;;  %v3828_v36 = vmul.f32 %v8067_v34, %v6512_v26 }
 0xb96   :  { %v8022_v4 = vadd.f32 %v7912_v40, %v3682_v52  ;;  %v3726_v47 = vsel %vm104_vm0, %v3706_v37, 0.0  ;;  %v3673_v55 = vadd.f32 %v3657_v16, %v3641_v30  ;;  %v3846_v54 = vsel %vm104_vm0, %v3826_v46, 0.0 }
 0xb97   :  { %v3619_v6 = vpop.xlane.xlu0 %3618  ;;  %v3732_v29 = vsel %vm104_vm0, %v3708_v22, 0.0  ;;  %v3849_v41 = vsel %vm104_vm0, %v3827_v25, 0.0 }
 0xb98   :  { %v3667_v10 = vmul.f32 %v3619_v6, %v6512_v26  ;;  %v3718_v59 = vmul.f32 %v6501_v0, %v8022_v4  ;;  %v8080_v45 = vadd.f32 %v7912_v40, %v3673_v55  ;;  %v3838_v23 = vmul.f32 %v8022_v4, %v6512_v26 }
 0xb9a   :  { %v3683_v14 = vadd.f32 %v3667_v10, %v3651_v31  ;;  %v3762_v28 = vsel %vm104_vm0, %v3718_v59, 0.0  ;;  %v3709_v52 = vmul.f32 %v6501_v0, %v8080_v45  ;;  %v3829_v31 = vmul.f32 %v8080_v45, %v6512_v26 }
 0xb9b   :  { %3763 = vadd.xlane.f32.xlu1 %v3762_v28  ;;  %v3882_v6 = vsel %vm104_vm0, %v3838_v23, 0.0 }
 0xb9c   :  { %v8039_v56 = vadd.f32 %v7912_v40, %v3683_v14  ;;  %v3852_v40 = vsel %vm104_vm0, %v3828_v36, 0.0  ;;  %v3735_v42 = vsel %vm104_vm0, %v3709_v52, 0.0  ;;  %v3855_v21 = vsel %vm104_vm0, %v3829_v31, 0.0 }
 0xb9e   :  { %v3719_v8 = vmul.f32 %v6501_v0, %v8039_v56  ;;  %v3839_v61 = vmul.f32 %v8039_v56, %v6512_v26 }
 0xb9f   :  { %3721 = vadd.xlane.f32.xlu1 %v3720_v32 }
 0xba0   :  { %v3765_v44 = vsel %vm104_vm0, %v3719_v8, 0.0  ;;  %v3885_v10 = vsel %vm104_vm0, %v3839_v61, 0.0 }
 0xba1   :  { %3766 = vadd.xlane.f32.xlu0 %v3765_v44 }
 0xba3   :  { %3841 = vadd.xlane.f32.xlu1 %v3840_v53 }
 0xba5   :  { %3724 = vadd.xlane.f32.xlu0 %v3723_v18 }
 0xba7   :  { %3727 = vadd.xlane.f32.xlu1 %v3726_v47 }
 0xba9   :  { %3844 = vadd.xlane.f32.xlu0 %v3843_v60 }
 0xbab   :  { %3847 = vadd.xlane.f32.xlu1 %v3846_v54 }
 0xbad   :  { %3730 = vadd.xlane.f32.xlu0 %v3729_v11 }
 0xbaf   :  { %3733 = vadd.xlane.f32.xlu1 %v3732_v29 }
 0xbb1   :  { %3850 = vadd.xlane.f32.xlu0 %v3849_v41 }
 0xbb3   :  { %3853 = vadd.xlane.f32.xlu1 %v3852_v40 }
 0xbb5   :  { %3736 = vadd.xlane.f32.xlu0 %v3735_v42 }
 0xbb7   :  { %3883 = vadd.xlane.f32.xlu1 %v3882_v6 }
 0xbb9   :  { %3856 = vadd.xlane.f32.xlu0 %v3855_v21 }
 0xbbd   :  { %3886 = vadd.xlane.f32.xlu0 %v3885_v10 }
 0xbee   :  { %v3743_v59 = vpop.xlane.xlu0 %3742 }
 0xbf0   :  { %v3740_v50 = vpop.xlane.xlu1 %3739 }
 0xbf1   :  { %v3789_v35 = vadd.f32 %v3743_v59, %v3740_v50 }
 0xbf2   :  { %v3863_v14 = vpop.xlane.xlu0 %3862 }
 0xbf3   :  { %v3790_v28 = vrot.slane %v3789_v35, 4 }
 0xbf4   :  { %v3860_v43 = vpop.xlane.xlu1 %3859 }
 0xbf5   :  { %v3791_v5 = vadd.f32 %v3790_v28, %v3789_v35  ;;  %v3909_v1 = vadd.f32 %v3863_v14, %v3860_v43 }
 0xbf6   :  { %v3749_v51 = vpop.xlane.xlu0 %3748 }
 0xbf7   :  { %v3792_v15 = vrot.slane %v3791_v5, 2  ;;  %v3910_v39 = vrot.slane %v3909_v1, 4 }
 0xbf8   :  { %v3746_v32 = vpop.xlane.xlu1 %3745 }
 0xbf9   :  { %v3793_v8 = vadd.f32 %v3792_v15, %v3791_v5  ;;  %v3911_v24 = vadd.f32 %v3910_v39, %v3909_v1  ;;  %v3796_v33 = vadd.f32 %v3749_v51, %v3746_v32 }
 0xbfa   :  { %v3869_v44 = vpop.xlane.xlu0 %3868 }
 0xbfb   :  { %v3794_v3 = vrot.slane %v3793_v8, 1  ;;  %v3912_v27 = vrot.slane %v3911_v24, 2  ;;  %v3797_v13 = vrot.slane %v3796_v33, 4 }
 0xbfc   :  { %v3866_v53 = vpop.xlane.xlu1 %3865 }
 0xbfd   :  { %v3913_v37 = vadd.f32 %v3912_v27, %v3911_v24  ;;  %v3798_v16 = vadd.f32 %v3797_v13, %v3796_v33  ;;  %v3916_v18 = vadd.f32 %v3869_v44, %v3866_v53  ;;  %v3795_v7 = vadd.f32 %v3794_v3, %v3793_v8 }
 0xbfe   :  { %v3755_v30 = vpop.xlane.xlu0 %3754 }
 0xbff   :  { %v3914_v47 = vrot.slane %v3913_v37, 1  ;;  %v3799_v46 = vrot.slane %v3798_v16, 2  ;;  %v3917_v55 = vrot.slane %v3916_v18, 4  ;;  %v3947_v25 = vmul.f32 %v6501_v0, %v3795_v7 }
 0xc00   :  { %v3752_v60 = vpop.xlane.xlu1 %3751 }
 0xc01   :  { %v3915_v19 = vadd.f32 %v3914_v47, %v3913_v37  ;;  %v3800_v54 = vadd.f32 %v3799_v46, %v3798_v16  ;;  %v3918_v22 = vadd.f32 %v3917_v55, %v3916_v18  ;;  %v3803_v11 = vadd.f32 %v3755_v30, %v3752_v60 }
 0xc02   :  { %v3875_v29 = vpop.xlane.xlu0 %3874 }
 0xc03   :  { %v3955_v36 = vmul.f32 %v3915_v19, %v6512_v26  ;;  %v3801_v41 = vrot.slane %v3800_v54, 1  ;;  %v3919_v52 = vrot.slane %v3918_v22, 2  ;;  %v3804_v40 = vrot.slane %v3803_v11, 4 }
 0xc04   :  { %v3872_v23 = vpop.xlane.xlu1 %3871 }
 0xc05   :  { %v3963_v42 = vadd.f32 %v3955_v36, %v3947_v25  ;;  %v3920_v31 = vadd.f32 %v3919_v52, %v3918_v22  ;;  %v3805_v6 = vadd.f32 %v3804_v40, %v3803_v11  ;;  %v3802_v21 = vadd.f32 %v3801_v41, %v3800_v54 }
 0xc06   :  { %v3923_v61 = vadd.f32 %v3875_v29, %v3872_v23  ;;  %v3761_v10 = vpop.xlane.xlu0 %3760 }
 0xc07   :  { %v3921_v59 = vrot.slane %v3920_v31, 1  ;;  %v3806_v50 = vrot.slane %v3805_v6, 2  ;;  %v3971_v35 = vmul.f32 0.0078125, %v3963_v42  ;;  %v3948_v15 = vmul.f32 %v6501_v0, %v3802_v21 }
 0xc08   :  { %v3924_v14 = vrot.slane %v3923_v61, 4  ;;  %v3758_v28 = vpop.xlane.xlu1 %3757 }
 0xc09   :  { %v3922_v43 = vadd.f32 %v3921_v59, %v3920_v31  ;;  %v3807_v5 = vadd.f32 %v3806_v50, %v3805_v6  ;;  %v3810_v1 = vadd.f32 %v3761_v10, %v3758_v28  ;;  %v8105_v51 = vsub.f32 %v7917_v12, %v3971_v35 }
 0xc0a   :  { %v3925_v39 = vadd.f32 %v3924_v14, %v3923_v61  ;;  %v8109_v32 = vsub.f32 %v7921_v57, %v3971_v35  ;;  %v3881_v27 = vpop.xlane.xlu0 %3880 }
 0xc0b   :  { %v3956_v8 = vmul.f32 %v3922_v43, %v6512_v26  ;;  %v3808_v24 = vrot.slane %v3807_v5, 1  ;;  %v3811_v33 = vrot.slane %v3810_v1, 4  ;;  %v3999_v44 = vmul.f32 %v6501_v0, %v8105_v51 }
 0xc0c   :  { %v3926_v3 = vrot.slane %v3925_v39, 2  ;;  %v3878_v13 = vpop.xlane.xlu1 %3877  ;;  %v3998_v12 = vmul.f32 %v6501_v0, %v8109_v32  ;;  %v4015_v53 = vmul.f32 %v8105_v51, %v6512_v26  ;;  %v4014_v57 = vmul.f32 %v8109_v32, %v6512_v26 }
 0xc0d   :  { %v3964_v37 = vadd.f32 %v3956_v8, %v3948_v15  ;;  %v3812_v16 = vadd.f32 %v3811_v33, %v3810_v1  ;;  %v3930_v18 = vadd.f32 %v3881_v27, %v3878_v13  ;;  %v4031_v30 = vmul.f32 %v3999_v44, %v3999_v44 }
 0xc0e   :  { %v3927_v7 = vadd.f32 %v3926_v3, %v3925_v39  ;;  %v4030_v47 = vmul.f32 %v3998_v12, %v3998_v12  ;;  %v3809_v46 = vadd.f32 %v3808_v24, %v3807_v5  ;;  %v4151_v19 = vmul.f32 %v4015_v53, %v4015_v53 }
 0xc0f   :  { %v3813_v55 = vrot.slane %v3812_v16, 2  ;;  %v3931_v60 = vrot.slane %v3930_v18, 4  ;;  %v4061_v22 = vsel %vm104_vm0, %v4031_v30, 0.0  ;;  %v4150_v25 = vmul.f32 %v4014_v57, %v4014_v57 }
 0xc10   :  { %v3928_v54 = vrot.slane %v3927_v7, 1  ;;  %v4058_v11 = vsel %vm104_vm0, %v4030_v47, 0.0  ;;  %4062 = vadd.xlane.f32.xlu0 %v4061_v22  ;;  %v3972_v41 = vmul.f32 0.0078125, %v3964_v37  ;;  %v3949_v6 = vmul.f32 %v6501_v0, %v3809_v46 }
 0xc11   :  { %v3814_v29 = vadd.f32 %v3813_v55, %v3812_v16  ;;  %v3932_v36 = vadd.f32 %v3931_v60, %v3930_v18  ;;  %4059 = vadd.xlane.f32.xlu1 %v4058_v11  ;;  %v4181_v61 = vsel %vm104_vm0, %v4151_v19, 0.0  ;;  %v4178_v10 = vsel %vm104_vm0, %v4150_v25, 0.0 }
 0xc12   :  { %v3929_v52 = vadd.f32 %v3928_v54, %v3927_v7  ;;  %v8123_v42 = vsub.f32 %v7939_v9, %v3972_v41  ;;  %v8126_v31 = vsub.f32 %v7944_v38, %v3972_v41 }
 0xc13   :  { %v3815_v40 = vrot.slane %v3814_v29, 1  ;;  %v3933_v23 = vrot.slane %v3932_v36, 2 }
 0xc14   :  { %v3957_v21 = vmul.f32 %v3929_v52, %v6512_v26  ;;  %4182 = vadd.xlane.f32.xlu0 %v4181_v61  ;;  %v4001_v50 = vmul.f32 %v6501_v0, %v8123_v42  ;;  %v4000_v9 = vmul.f32 %v6501_v0, %v8126_v31  ;;  %v4017_v38 = vmul.f32 %v8123_v42, %v6512_v26 }
 0xc15   :  { %v3934_v59 = vadd.f32 %v3933_v23, %v3932_v36  ;;  %4179 = vadd.xlane.f32.xlu1 %v4178_v10  ;;  %v4016_v14 = vmul.f32 %v8126_v31, %v6512_v26  ;;  %v3816_v28 = vadd.f32 %v3815_v40, %v3814_v29 }
 0xc16   :  { %v3965_v35 = vadd.f32 %v3957_v21, %v3949_v6  ;;  %v4033_v5 = vmul.f32 %v4001_v50, %v4001_v50  ;;  %v4032_v1 = vmul.f32 %v4000_v9, %v4000_v9  ;;  %v4153_v24 = vmul.f32 %v4017_v38, %v4017_v38 }
 0xc17   :  { %v3935_v43 = vrot.slane %v3934_v59, 1  ;;  %v4152_v44 = vmul.f32 %v4016_v14, %v4016_v14  ;;  %v3950_v27 = vmul.f32 %v6501_v0, %v3816_v28 }
 0xc18   :  { %v3973_v15 = vmul.f32 0.0078125, %v3965_v35  ;;  %v4067_v8 = vsel %vm104_vm0, %v4033_v5, 0.0  ;;  %v4064_v33 = vsel %vm104_vm0, %v4032_v1, 0.0  ;;  %v4187_v37 = vsel %vm104_vm0, %v4153_v24, 0.0 }
 0xc19   :  { %v3936_v39 = vadd.f32 %v3935_v43, %v3934_v59  ;;  %4068 = vadd.xlane.f32.xlu0 %v4067_v8  ;;  %4065 = vadd.xlane.f32.xlu1 %v4064_v33  ;;  %v4184_v18 = vsel %vm104_vm0, %v4152_v44, 0.0 }
 0xc1a   :  { %v8143_v3 = vsub.f32 %v7963_v63, %v3973_v15  ;;  %v8148_v12 = vsub.f32 %v7968_v20, %v3973_v15 }
 0xc1b   :  { %v3958_v13 = vmul.f32 %v3936_v39, %v6512_v26 }
 0xc1c   :  { %v4003_v53 = vmul.f32 %v6501_v0, %v8143_v3  ;;  %v4002_v16 = vmul.f32 %v6501_v0, %v8148_v12  ;;  %v4019_v63 = vmul.f32 %v8143_v3, %v6512_v26  ;;  %v4018_v20 = vmul.f32 %v8148_v12, %v6512_v26 }
 0xc1d   :  { %v3966_v57 = vadd.f32 %v3958_v13, %v3950_v27  ;;  %4188 = vadd.xlane.f32.xlu0 %v4187_v37  ;;  %4185 = vadd.xlane.f32.xlu1 %v4184_v18 }
 0xc1e   :  { %v4035_v7 = vmul.f32 %v4003_v53, %v4003_v53  ;;  %v4034_v30 = vmul.f32 %v4002_v16, %v4002_v16  ;;  %v4155_v60 = vmul.f32 %v4019_v63, %v4019_v63  ;;  %v4154_v22 = vmul.f32 %v4018_v20, %v4018_v20 }
 0xc1f   :  { %v3974_v47 = vmul.f32 0.0078125, %v3966_v57 }
 0xc20   :  { %v4073_v46 = vsel %vm104_vm0, %v4035_v7, 0.0  ;;  %v4070_v55 = vsel %vm104_vm0, %v4034_v30, 0.0  ;;  %v4193_v36 = vsel %vm104_vm0, %v4155_v60, 0.0 }
 0xc21   :  { %v8163_v19 = vsub.f32 %v7987_v17, %v3974_v47  ;;  %v8166_v54 = vsub.f32 %v7991_v62, %v3974_v47  ;;  %4074 = vadd.xlane.f32.xlu0 %v4073_v46  ;;  %4071 = vadd.xlane.f32.xlu1 %v4070_v55  ;;  %v4190_v62 = vsel %vm104_vm0, %v4154_v22, 0.0 }
 0xc23   :  { %v4005_v11 = vmul.f32 %v6501_v0, %v8163_v19  ;;  %v4004_v25 = vmul.f32 %v6501_v0, %v8166_v54  ;;  %v4021_v17 = vmul.f32 %v8163_v19, %v6512_v26  ;;  %v4020_v40 = vmul.f32 %v8166_v54, %v6512_v26 }
 0xc24   :  { %v3764_v29 = vpop.xlane.xlu1 %3763 }
 0xc25   :  { %v4037_v41 = vmul.f32 %v4005_v11, %v4005_v11  ;;  %v4036_v52 = vmul.f32 %v4004_v25, %v4004_v25  ;;  %4194 = vadd.xlane.f32.xlu0 %v4193_v36  ;;  %4191 = vadd.xlane.f32.xlu1 %v4190_v62  ;;  %v4157_v61 = vmul.f32 %v4021_v17, %v4021_v17 }
 0xc26   :  { %v4156_v59 = vmul.f32 %v4020_v40, %v4020_v40 }
 0xc27   :  { %v4079_v23 = vsel %vm104_vm0, %v4037_v41, 0.0  ;;  %v4076_v21 = vsel %vm104_vm0, %v4036_v52, 0.0  ;;  %v4199_v35 = vsel %vm104_vm0, %v4157_v61, 0.0 }
 0xc28   :  { %v3722_v6 = vpop.xlane.xlu1 %3721  ;;  %v4196_v9 = vsel %vm104_vm0, %v4156_v59, 0.0 }
 0xc29   :  { %4080 = vadd.xlane.f32.xlu0 %v4079_v23  ;;  %4077 = vadd.xlane.f32.xlu1 %v4076_v21 }
 0xc2a   :  { %v3767_v10 = vpop.xlane.xlu0 %3766 }
 0xc2b   :  { %v3817_v33 = vadd.f32 %v3767_v10, %v3764_v29 }
 0xc2c   :  { %v3842_v50 = vpop.xlane.xlu1 %3841 }
 0xc2d   :  { %4200 = vadd.xlane.f32.xlu0 %v4199_v35  ;;  %4197 = vadd.xlane.f32.xlu1 %v4196_v9  ;;  %v3818_v16 = vrot.slane %v3817_v33, 4 }
 0xc2e   :  { %v3725_v38 = vpop.xlane.xlu0 %3724 }
 0xc2f   :  { %v3768_v28 = vadd.f32 %v3725_v38, %v3722_v6  ;;  %v3819_v55 = vadd.f32 %v3818_v16, %v3817_v33 }
 0xc30   :  { %v3728_v14 = vpop.xlane.xlu1 %3727 }
 0xc31   :  { %v3769_v39 = vrot.slane %v3768_v28, 4  ;;  %v3820_v52 = vrot.slane %v3819_v55, 2 }
 0xc32   :  { %v3845_v43 = vpop.xlane.xlu0 %3844 }
 0xc33   :  { %v3888_v5 = vadd.f32 %v3845_v43, %v3842_v50  ;;  %v3770_v44 = vadd.f32 %v3769_v39, %v3768_v28  ;;  %v3821_v50 = vadd.f32 %v3820_v52, %v3819_v55 }
 0xc34   :  { %v3848_v1 = vpop.xlane.xlu1 %3847 }
 0xc35   :  { %v3889_v15 = vrot.slane %v3888_v5, 4  ;;  %v3771_v18 = vrot.slane %v3770_v44, 2 }
 0xc36   :  { %v3731_v8 = vpop.xlane.xlu0 %3730 }
 0xc37   :  { %v3890_v24 = vadd.f32 %v3889_v15, %v3888_v5  ;;  %v3775_v27 = vadd.f32 %v3731_v8, %v3728_v14  ;;  %v3772_v60 = vadd.f32 %v3771_v18, %v3770_v44  ;;  %v3822_v15 = vrot.slane %v3821_v50, 1 }
 0xc38   :  { %v3734_v13 = vpop.xlane.xlu1 %3733 }
 0xc39   :  { %v3891_v37 = vrot.slane %v3890_v24, 2  ;;  %v3776_v7 = vrot.slane %v3775_v27, 4  ;;  %v3773_v17 = vrot.slane %v3772_v60, 1 }
 0xc3a   :  { %v3851_v53 = vpop.xlane.xlu0 %3850 }
 0xc3b   :  { %v3895_v57 = vadd.f32 %v3851_v53, %v3848_v1  ;;  %v3892_v30 = vadd.f32 %v3891_v37, %v3890_v24  ;;  %v3777_v22 = vadd.f32 %v3776_v7, %v3775_v27  ;;  %v3774_v38 = vadd.f32 %v3773_v17, %v3772_v60 }
 0xc3c   :  { %v3854_v46 = vpop.xlane.xlu1 %3853 }
 0xc3d   :  { %v3896_v63 = vrot.slane %v3895_v57, 4  ;;  %v3893_v29 = vrot.slane %v3892_v30, 1  ;;  %v3778_v62 = vrot.slane %v3777_v22, 2  ;;  %v3944_v24 = vmul.f32 %v6501_v0, %v3774_v38 }
 0xc3e   :  { %v3737_v20 = vpop.xlane.xlu0 %3736 }
 0xc3f   :  { %v3897_v47 = vadd.f32 %v3896_v63, %v3895_v57  ;;  %v3782_v25 = vadd.f32 %v3737_v20, %v3734_v13  ;;  %v3894_v10 = vadd.f32 %v3893_v29, %v3892_v30  ;;  %v3779_v14 = vadd.f32 %v3778_v62, %v3777_v22 }
 0xc40   :  { %v3884_v40 = vpop.xlane.xlu1 %3883  ;;  %v3823_v57 = vadd.f32 %v3822_v15, %v3821_v50 }
 0xc41   :  { %v3898_v36 = vrot.slane %v3897_v47, 2  ;;  %v3783_v21 = vrot.slane %v3782_v25, 4  ;;  %v3952_v5 = vmul.f32 %v3894_v10, %v6512_v26  ;;  %v3780_v33 = vrot.slane %v3779_v14, 1 }
 0xc42   :  { %v3857_v11 = vpop.xlane.xlu0 %3856 }
 0xc43   :  { %v3902_v41 = vadd.f32 %v3857_v11, %v3854_v46  ;;  %v3899_v59 = vadd.f32 %v3898_v36, %v3897_v47  ;;  %v3784_v28 = vadd.f32 %v3783_v21, %v3782_v25  ;;  %v3960_v13 = vadd.f32 %v3952_v5, %v3944_v24 }
 0xc44   :  { %v3781_v63 = vadd.f32 %v3780_v33, %v3779_v14  ;;  %v3951_v47 = vmul.f32 %v6501_v0, %v3823_v57 }
 0xc45   :  { %v3903_v23 = vrot.slane %v3902_v41, 4  ;;  %v3900_v1 = vrot.slane %v3899_v59, 1  ;;  %v3785_v44 = vrot.slane %v3784_v28, 2  ;;  %v3968_v30 = vmul.f32 0.0078125, %v3960_v13 }
 0xc46   :  { %v3887_v6 = vpop.xlane.xlu0 %3886  ;;  %v3945_v60 = vmul.f32 %v6501_v0, %v3781_v63 }
 0xc47   :  { %v3937_v61 = vadd.f32 %v3887_v6, %v3884_v40  ;;  %v3904_v35 = vadd.f32 %v3903_v23, %v3902_v41  ;;  %v3901_v53 = vadd.f32 %v3900_v1, %v3899_v59  ;;  %v3786_v18 = vadd.f32 %v3785_v44, %v3784_v28 }
 0xc48   :  { %v8189_v29 = vsub.f32 %v8034_v49, %v3968_v30  ;;  %v8192_v36 = vsub.f32 %v8018_v58, %v3968_v30 }
 0xc49   :  { %v3938_v9 = vrot.slane %v3937_v61, 4  ;;  %v3905_v39 = vrot.slane %v3904_v35, 2  ;;  %v3953_v20 = vmul.f32 %v3901_v53, %v6512_v26  ;;  %v3787_v22 = vrot.slane %v3786_v18, 1 }
 0xc4a   :  { %v3993_v23 = vmul.f32 %v6501_v0, %v8189_v29  ;;  %v3992_v6 = vmul.f32 %v6501_v0, %v8192_v36  ;;  %v4009_v59 = vmul.f32 %v8189_v29, %v6512_v26 }
 0xc4b   :  { %v3939_v43 = vadd.f32 %v3938_v9, %v3937_v61  ;;  %v3906_v37 = vadd.f32 %v3905_v39, %v3904_v35  ;;  %v3961_v25 = vadd.f32 %v3953_v20, %v3945_v60  ;;  %v3788_v17 = vadd.f32 %v3787_v22, %v3786_v18 }
 0xc4c   :  { %v4025_v50 = vmul.f32 %v3993_v23, %v3993_v23  ;;  %v4024_v35 = vmul.f32 %v3992_v6, %v3992_v6  ;;  %v4008_v9 = vmul.f32 %v8192_v36, %v6512_v26  ;;  %v4145_v15 = vmul.f32 %v4009_v59, %v4009_v59 }
 0xc4d   :  { %v3940_v8 = vrot.slane %v3939_v43, 2  ;;  %v3907_v46 = vrot.slane %v3906_v37, 1  ;;  %v3969_v49 = vmul.f32 0.0078125, %v3961_v25 }
 0xc4e   :  { %v4043_v1 = vsel %vm104_vm0, %v4025_v50, 0.0  ;;  %v4144_v39 = vmul.f32 %v4008_v9, %v4008_v9 }
 0xc4f   :  { %v3941_v27 = vadd.f32 %v3940_v8, %v3939_v43  ;;  %v3908_v41 = vadd.f32 %v3907_v46, %v3906_v37  ;;  %v8215_v38 = vsub.f32 %v8060_v48, %v3969_v49  ;;  %v8220_v5 = vsub.f32 %v8045_v2, %v3969_v49 }
 0xc50   :  { %v4040_v8 = vsel %vm104_vm0, %v4024_v35, 0.0  ;;  %v4163_v2 = vsel %vm104_vm0, %v4145_v15, 0.0  ;;  %v4160_v44 = vsel %vm104_vm0, %v4144_v39, 0.0 }
 0xc51   :  { %v3942_v16 = vrot.slane %v3941_v27, 1  ;;  %v3954_v21 = vmul.f32 %v3908_v41, %v6512_v26  ;;  %v3995_v48 = vmul.f32 %v6501_v0, %v8215_v38  ;;  %v3994_v24 = vmul.f32 %v6501_v0, %v8220_v5 }
 0xc52   :  { %v4010_v13 = vmul.f32 %v8220_v5, %v6512_v26 }
 0xc53   :  { %v3943_v7 = vadd.f32 %v3942_v16, %v3941_v27  ;;  %v4011_v27 = vmul.f32 %v8215_v38, %v6512_v26  ;;  %v4027_v53 = vmul.f32 %v3995_v48, %v3995_v48  ;;  %v4026_v57 = vmul.f32 %v3994_v24, %v3994_v24 }
 0xc54   :  { %v4146_v18 = vmul.f32 %v4010_v13, %v4010_v13 }
 0xc55   :  { %v3959_v55 = vmul.f32 %v3943_v7, %v6512_v26  ;;  %v4147_v63 = vmul.f32 %v4011_v27, %v4011_v27  ;;  %v4049_v7 = vsel %vm104_vm0, %v4027_v53, 0.0  ;;  %v4046_v20 = vsel %vm104_vm0, %v4026_v57, 0.0 }
 0xc57   :  { %v3967_v11 = vadd.f32 %v3959_v55, %v3951_v47  ;;  %v4169_v46 = vsel %vm104_vm0, %v4147_v63, 0.0  ;;  %v4166_v55 = vsel %vm104_vm0, %v4146_v18, 0.0 }
 0xc59   :  { %v3975_v52 = vmul.f32 0.0078125, %v3967_v11 }
 0xc5b   :  { %v8195_v62 = vsub.f32 %v8039_v56, %v3975_v52  ;;  %v8198_v40 = vsub.f32 %v8022_v4, %v3975_v52  ;;  %v3946_v56 = vmul.f32 %v6501_v0, %v3788_v17 }
 0xc5d   :  { %v4007_v58 = vmul.f32 %v6501_v0, %v8195_v62  ;;  %v4006_v61 = vmul.f32 %v6501_v0, %v8198_v40  ;;  %v3962_v14 = vadd.f32 %v3954_v21, %v3946_v56  ;;  %v4023_v17 = vmul.f32 %v8195_v62, %v6512_v26 }
 0xc5e   :  { %v4022_v23 = vmul.f32 %v8198_v40, %v6512_v26 }
 0xc5f   :  { %v4039_v10 = vmul.f32 %v4007_v58, %v4007_v58  ;;  %v4038_v4 = vmul.f32 %v4006_v61, %v4006_v61  ;;  %v3970_v33 = vmul.f32 0.0078125, %v3962_v14  ;;  %v4159_v21 = vmul.f32 %v4023_v17, %v4023_v17 }
 0xc60   :  { %v4158_v58 = vmul.f32 %v4022_v23, %v4022_v23 }
 0xc61   :  { %v4085_v28 = vsel %vm104_vm0, %v4039_v10, 0.0  ;;  %v4082_v43 = vsel %vm104_vm0, %v4038_v4, 0.0  ;;  %v8235_v37 = vsub.f32 %v8080_v45, %v3970_v33  ;;  %v8238_v16 = vsub.f32 %v8067_v34, %v3970_v33 }
 0xc62   :  { %4086 = vadd.xlane.f32.xlu0 %v4085_v28  ;;  %4083 = vadd.xlane.f32.xlu1 %v4082_v43  ;;  %v4205_v61 = vsel %vm104_vm0, %v4159_v21, 0.0  ;;  %v4202_v56 = vsel %vm104_vm0, %v4158_v58, 0.0 }
 0xc63   :  { %v3997_v30 = vmul.f32 %v6501_v0, %v8235_v37  ;;  %v3996_v47 = vmul.f32 %v6501_v0, %v8238_v16  ;;  %v4013_v34 = vmul.f32 %v8235_v37, %v6512_v26  ;;  %v4012_v45 = vmul.f32 %v8238_v16, %v6512_v26 }
 0xc65   :  { %v4029_v60 = vmul.f32 %v3997_v30, %v3997_v30  ;;  %v4028_v22 = vmul.f32 %v3996_v47, %v3996_v47  ;;  %v4149_v11 = vmul.f32 %v4013_v34, %v4013_v34  ;;  %v4148_v25 = vmul.f32 %v4012_v45, %v4012_v45 }
 0xc66   :  { %4044 = vadd.xlane.f32.xlu0 %v4043_v1  ;;  %4041 = vadd.xlane.f32.xlu1 %v4040_v8 }
 0xc67   :  { %v4055_v41 = vsel %vm104_vm0, %v4029_v60, 0.0  ;;  %v4052_v52 = vsel %vm104_vm0, %v4028_v22, 0.0  ;;  %v4175_v6 = vsel %vm104_vm0, %v4149_v11, 0.0  ;;  %v4172_v49 = vsel %vm104_vm0, %v4148_v25, 0.0 }
 0xc6a   :  { %4164 = vadd.xlane.f32.xlu0 %v4163_v2  ;;  %4161 = vadd.xlane.f32.xlu1 %v4160_v44 }
 0xc6e   :  { %4050 = vadd.xlane.f32.xlu0 %v4049_v7  ;;  %4047 = vadd.xlane.f32.xlu1 %v4046_v20 }
 0xc72   :  { %4170 = vadd.xlane.f32.xlu0 %v4169_v46  ;;  %4167 = vadd.xlane.f32.xlu1 %v4166_v55 }
 0xc76   :  { %4056 = vadd.xlane.f32.xlu0 %v4055_v41  ;;  %4053 = vadd.xlane.f32.xlu1 %v4052_v52 }
 0xc7a   :  { %4176 = vadd.xlane.f32.xlu0 %v4175_v6  ;;  %4173 = vadd.xlane.f32.xlu1 %v4172_v49 }
 0xc7e   :  { %4206 = vadd.xlane.f32.xlu0 %v4205_v61  ;;  %4203 = vadd.xlane.f32.xlu1 %v4202_v56 }
 0xc99   :  { %v4063_v4 = vpop.xlane.xlu0 %4062 }
 0xc9a   :  { %v4060_v10 = vpop.xlane.xlu1 %4059 }
 0xc9b   :  { %v4109_v59 = vadd.f32 %v4063_v4, %v4060_v10 }
 0xc9d   :  { %v4110_v50 = vrot.slane %v4109_v59, 4  ;;  %v4183_v9 = vpop.xlane.xlu0 %4182 }
 0xc9e   :  { %v4180_v35 = vpop.xlane.xlu1 %4179 }
 0xc9f   :  { %v4111_v14 = vadd.f32 %v4110_v50, %v4109_v59  ;;  %v4229_v28 = vadd.f32 %v4183_v9, %v4180_v35 }
 0xca1   :  { %v4112_v43 = vrot.slane %v4111_v14, 2  ;;  %v4230_v1 = vrot.slane %v4229_v28, 4 }
 0xca2   :  { %v4069_v8 = vpop.xlane.xlu0 %4068  ;;  %v4066_v48 = vpop.xlane.xlu1 %4065 }
 0xca3   :  { %v4113_v15 = vadd.f32 %v4112_v43, %v4111_v14  ;;  %v4231_v39 = vadd.f32 %v4230_v1, %v4229_v28  ;;  %v4116_v2 = vadd.f32 %v4069_v8, %v4066_v48 }
 0xca5   :  { %v4114_v24 = vrot.slane %v4113_v15, 1  ;;  %v4232_v33 = vrot.slane %v4231_v39, 2  ;;  %v4117_v27 = vrot.slane %v4116_v2, 4 }
 0xca6   :  { %v4189_v13 = vpop.xlane.xlu0 %4188  ;;  %v4186_v57 = vpop.xlane.xlu1 %4185 }
 0xca7   :  { %v4233_v44 = vadd.f32 %v4232_v33, %v4231_v39  ;;  %v4115_v53 = vadd.f32 %v4114_v24, %v4113_v15  ;;  %v4118_v18 = vadd.f32 %v4117_v27, %v4116_v2  ;;  %v4236_v7 = vadd.f32 %v4189_v13, %v4186_v57 }
 0xca9   :  { %v4234_v63 = vrot.slane %v4233_v44, 1  ;;  %v4119_v30 = vrot.slane %v4118_v18, 2  ;;  %v4237_v47 = vrot.slane %v4236_v7, 4  ;;  %v4267_v45 = vmul.f32 %v6501_v0, %v4115_v53 }
 0xcaa   :  { %v4075_v34 = vpop.xlane.xlu0 %4074  ;;  %v4072_v46 = vpop.xlane.xlu1 %4071 }
 0xcab   :  { %v4235_v20 = vadd.f32 %v4234_v63, %v4233_v44  ;;  %v4120_v60 = vadd.f32 %v4119_v30, %v4118_v18  ;;  %v4238_v22 = vadd.f32 %v4237_v47, %v4236_v7  ;;  %v4123_v11 = vadd.f32 %v4075_v34, %v4072_v46 }
 0xcad   :  { %v4275_v55 = vmul.f32 %v4235_v20, %v6512_v26  ;;  %v4121_v41 = vrot.slane %v4120_v60, 1  ;;  %v4239_v52 = vrot.slane %v4238_v22, 2  ;;  %v4124_v17 = vrot.slane %v4123_v11, 4 }
 0xcae   :  { %v4195_v23 = vpop.xlane.xlu0 %4194  ;;  %v4192_v6 = vpop.xlane.xlu1 %4191 }
 0xcaf   :  { %v4283_v25 = vadd.f32 %v4275_v55, %v4267_v45  ;;  %v4240_v21 = vadd.f32 %v4239_v52, %v4238_v22  ;;  %v4125_v58 = vadd.f32 %v4124_v17, %v4123_v11  ;;  %v4243_v61 = vadd.f32 %v4195_v23, %v4192_v6  ;;  %v8270_v52 = vld [vmem:[#allocation4 + $0x8] sm:$0xff] }
 0xcb0   :  { %v4122_v10 = vadd.f32 %v4121_v41, %v4120_v60  ;;  %v8268_v41 = vld [vmem:[#allocation4] sm:$0xff] }
 0xcb1   :  { %v4291_v49 = vmul.f32 0.0078125, %v4283_v25  ;;  %v4241_v4 = vrot.slane %v4240_v21, 1  ;;  %v4126_v59 = vrot.slane %v4125_v58, 2  ;;  %v4244_v35 = vrot.slane %v4243_v61, 4 }
 0xcb2   :  { %v4081_v50 = vpop.xlane.xlu0 %4080  ;;  %v4078_v9 = vpop.xlane.xlu1 %4077  ;;  %v4268_v15 = vmul.f32 %v6501_v0, %v4122_v10 }
 0xcb3   :  { %v4299_v56 = vadd.f32 1e-05, %v4291_v49  ;;  %v4242_v14 = vadd.f32 %v4241_v4, %v4240_v21  ;;  %v4127_v28 = vadd.f32 %v4126_v59, %v4125_v58  ;;  %v4130_v43 = vadd.f32 %v4081_v50, %v4078_v9  ;;  %v8274_v58 = vld [vmem:[#allocation4 + $0x10] sm:$0xff] }
 0xcb4   :  { %v4245_v1 = vadd.f32 %v4244_v35, %v4243_v61  ;;  %v8276_v61 = vld [vmem:[#allocation4 + $0x18] sm:$0xff] }
 0xcb5   :  { %5683 = vrsqrt.f32 %v4299_v56  ;;  %v4276_v39 = vmul.f32 %v4242_v14, %v6512_v26  ;;  %v4131_v8 = vrot.slane %v4130_v43, 4  ;;  %v4128_v24 = vrot.slane %v4127_v28, 1 }
 0xcb6   :  { %v4201_v48 = vpop.xlane.xlu0 %4200  ;;  %v4246_v33 = vrot.slane %v4245_v1, 2  ;;  %v4198_v2 = vpop.xlane.xlu1 %4197 }
 0xcb7   :  { %v4284_v44 = vadd.f32 %v4276_v39, %v4268_v15  ;;  %v4132_v27 = vadd.f32 %v4131_v8, %v4130_v43  ;;  %v4250_v13 = vadd.f32 %v4201_v48, %v4198_v2  ;;  %v4129_v7 = vadd.f32 %v4128_v24, %v4127_v28 }
 0xcb8   :  { %v4247_v53 = vadd.f32 %v4246_v33, %v4245_v1 }
 0xcb9   :  { %v4292_v57 = vmul.f32 0.0078125, %v4284_v44  ;;  %v4133_v63 = vrot.slane %v4132_v27, 2  ;;  %v4251_v18 = vrot.slane %v4250_v13, 4  ;;  %v4269_v60 = vmul.f32 %v6501_v0, %v4129_v7 }
 0xcba   :  { %v4248_v20 = vrot.slane %v4247_v53, 1 }
 0xcbb   :  { %v4300_v30 = vadd.f32 1e-05, %v4292_v57  ;;  %v4134_v47 = vadd.f32 %v4133_v63, %v4132_v27  ;;  %v4252_v34 = vadd.f32 %v4251_v18, %v4250_v13 }
 0xcbc   :  { %v4249_v45 = vadd.f32 %v4248_v20, %v4247_v53 }
 0xcbd   :  { %5685 = vrsqrt.f32 %v4300_v30  ;;  %v4135_v46 = vrot.slane %v4134_v47, 1  ;;  %v4253_v55 = vrot.slane %v4252_v34, 2 }
 0xcbe   :  { %v4277_v22 = vmul.f32 %v4249_v45, %v6512_v26 }
 0xcbf   :  { %v4254_v11 = vadd.f32 %v4253_v55, %v4252_v34  ;;  %v4136_v49 = vadd.f32 %v4135_v46, %v4134_v47 }
 0xcc0   :  { %v4285_v17 = vadd.f32 %v4277_v22, %v4269_v60 }
 0xcc1   :  { %v4255_v21 = vrot.slane %v4254_v11, 1 }
 0xcc2   :  { %v5684_v25 = vpop.eup %5683  ;;  %v4293_v56 = vmul.f32 0.0078125, %v4285_v17 }
 0xcc3   :  { %v4318_v23 = vmul.f32 %v5684_v25, %v8109_v32  ;;  %v4319_v6 = vmul.f32 %v5684_v25, %v8105_v51  ;;  %v4256_v59 = vadd.f32 %v4255_v21, %v4254_v11  ;;  %v4270_v32 = vmul.f32 %v6501_v0, %v4136_v49 }
 0xcc4   :  { %v4301_v50 = vadd.f32 1e-05, %v4293_v56 }
 0xcc5   :  { %v4336_v10 = vmul.f32 %v8268_v41, %v4318_v23  ;;  %v4337_v4 = vmul.f32 %v8270_v52, %v4319_v6  ;;  %v4278_v51 = vmul.f32 %v4256_v59, %v6512_v26 }
 0xcc6   :  { %5687 = vrsqrt.f32 %v4301_v50 }
 0xcc7   :  { %v4355_v35 = vadd.f32 %v8274_v58, %v4336_v10  ;;  %v4356_v9 = vadd.f32 %v8276_v61, %v4337_v4  ;;  %v4286_v14 = vadd.f32 %v4278_v51, %v4270_v32 }
 0xcc9   :  { %4371 = vst.msk [vmem:[%s8404_s6 + $0x30] sm:$0xff] %vm104_vm0, %v4355_v35  ;;  %4372 = vst.msk [vmem:[%s8404_s6 + $0x38] sm:$0xff] %vm104_vm0, %v4356_v9  ;;  %v4294_v28 = vmul.f32 0.0078125, %v4286_v14 }
 0xcca   :  { %v5686_v43 = vpop.eup %5685 }
 0xccb   :  { %v4320_v1 = vmul.f32 %v5686_v43, %v8126_v31  ;;  %v4321_v15 = vmul.f32 %v5686_v43, %v8123_v42  ;;  %v4302_v39 = vadd.f32 1e-05, %v4294_v28 }
 0xccd   :  { %v4338_v8 = vmul.f32 %v8268_v41, %v4320_v1  ;;  %v4339_v48 = vmul.f32 %v8270_v52, %v4321_v15  ;;  %5689 = vrsqrt.f32 %v4302_v39 }
 0xccf   :  { %v4357_v24 = vadd.f32 %v8274_v58, %v4338_v8  ;;  %v4358_v33 = vadd.f32 %v8276_v61, %v4339_v48 }
 0xcd1   :  { %4373 = vst.msk [vmem:[%s8404_s6 + $0x40] sm:$0xff] %vm104_vm0, %v4357_v24  ;;  %4374 = vst.msk [vmem:[%s8404_s6 + $0x48] sm:$0xff] %vm104_vm0, %v4358_v33 }
 0xcd3   :  { %v5688_v42 = vpop.eup %5687 }
 0xcd4   :  { %v4322_v31 = vmul.f32 %v5688_v42, %v8148_v12  ;;  %v4323_v2 = vmul.f32 %v5688_v42, %v8143_v3 }
 0xcd6   :  { %v4340_v44 = vmul.f32 %v8268_v41, %v4322_v31  ;;  %v4341_v27 = vmul.f32 %v8270_v52, %v4323_v2 }
 0xcd8   :  { %v4359_v13 = vadd.f32 %v8274_v58, %v4340_v44  ;;  %v4360_v53 = vadd.f32 %v8276_v61, %v4341_v27 }
 0xcda   :  { %v5690_v57 = vpop.eup %5689  ;;  %4375 = vst.msk [vmem:[%s8404_s6 + $0x50] sm:$0xff] %vm104_vm0, %v4359_v13  ;;  %4376 = vst.msk [vmem:[%s8404_s6 + $0x58] sm:$0xff] %vm104_vm0, %v4360_v53 }
 0xcdb   :  { %v4324_v3 = vmul.f32 %v5690_v57, %v8166_v54  ;;  %v4325_v12 = vmul.f32 %v5690_v57, %v8163_v19 }
 0xcdd   :  { %v4342_v63 = vmul.f32 %v8268_v41, %v4324_v3  ;;  %v4343_v18 = vmul.f32 %v8270_v52, %v4325_v12 }
 0xcdf   :  { %v4361_v7 = vadd.f32 %v8274_v58, %v4342_v63  ;;  %v4362_v20 = vadd.f32 %v8276_v61, %v4343_v18 }
 0xce1   :  { %4377 = vst.msk [vmem:[%s8404_s6 + $0x60] sm:$0xff] %vm104_vm0, %v4361_v7  ;;  %4378 = vst.msk [vmem:[%s8404_s6 + $0x68] sm:$0xff] %vm104_vm0, %v4362_v20 }
 0xceb   :  { %v4084_v54 = vpop.xlane.xlu1 %4083  ;;  %v4087_v19 = vpop.xlane.xlu0 %4086 }
 0xcec   :  { %v4137_v56 = vadd.f32 %v4087_v19, %v4084_v54 }
 0xcee   :  { %v4138_v14 = vrot.slane %v4137_v56, 4 }
 0xcef   :  { %v4042_v30 = vpop.xlane.xlu1 %4041  ;;  %v4045_v47 = vpop.xlane.xlu0 %4044 }
 0xcf0   :  { %v4088_v34 = vadd.f32 %v4045_v47, %v4042_v30  ;;  %v4139_v31 = vadd.f32 %v4138_v14, %v4137_v56 }
 0xcf2   :  { %v4089_v45 = vrot.slane %v4088_v34, 4  ;;  %v4140_v7 = vrot.slane %v4139_v31, 2 }
 0xcf3   :  { %v4162_v46 = vpop.xlane.xlu1 %4161  ;;  %v4165_v55 = vpop.xlane.xlu0 %4164 }
 0xcf4   :  { %v4090_v60 = vadd.f32 %v4089_v45, %v4088_v34  ;;  %v4208_v22 = vadd.f32 %v4165_v55, %v4162_v46 }
 0xcf6   :  { %v4091_v11 = vrot.slane %v4090_v60, 2  ;;  %v4209_v25 = vrot.slane %v4208_v22, 4 }
 0xcf7   :  { %v4048_v17 = vpop.xlane.xlu1 %4047  ;;  %v4051_v23 = vpop.xlane.xlu0 %4050 }
 0xcf8   :  { %v4092_v6 = vadd.f32 %v4091_v11, %v4090_v60  ;;  %v4210_v49 = vadd.f32 %v4209_v25, %v4208_v22  ;;  %v4095_v21 = vadd.f32 %v4051_v23, %v4048_v17  ;;  %v4141_v25 = vadd.f32 %v4140_v7, %v4139_v31 }
 0xcfa   :  { %v4093_v10 = vrot.slane %v4092_v6, 1  ;;  %v4211_v4 = vrot.slane %v4210_v49, 2  ;;  %v4096_v59 = vrot.slane %v4095_v21, 4 }
 0xcfb   :  { %v4168_v50 = vpop.xlane.xlu1 %4167  ;;  %v4171_v35 = vpop.xlane.xlu0 %4170 }
 0xcfc   :  { %v4212_v9 = vadd.f32 %v4211_v4, %v4210_v49  ;;  %v4097_v32 = vadd.f32 %v4096_v59, %v4095_v21  ;;  %v4215_v51 = vadd.f32 %v4171_v35, %v4168_v50  ;;  %v4094_v28 = vadd.f32 %v4093_v10, %v4092_v6 }
 0xcfd   :  { %v4142_v50 = vrot.slane %v4141_v25, 1 }
 0xcfe   :  { %v4213_v43 = vrot.slane %v4212_v9, 1  ;;  %v4098_v1 = vrot.slane %v4097_v32, 2  ;;  %v4216_v15 = vrot.slane %v4215_v51, 4  ;;  %v4264_v2 = vmul.f32 %v6501_v0, %v4094_v28 }
 0xcff   :  { %v4054_v39 = vpop.xlane.xlu1 %4053  ;;  %v4057_v8 = vpop.xlane.xlu0 %4056 }
 0xd00   :  { %v4214_v48 = vadd.f32 %v4213_v43, %v4212_v9  ;;  %v4099_v24 = vadd.f32 %v4098_v1, %v4097_v32  ;;  %v4217_v33 = vadd.f32 %v4216_v15, %v4215_v51  ;;  %v4102_v42 = vadd.f32 %v4057_v8, %v4054_v39 }
 0xd01   :  { %v4143_v1 = vadd.f32 %v4142_v50, %v4141_v25 }
 0xd02   :  { %v4272_v44 = vmul.f32 %v4214_v48, %v6512_v26  ;;  %v4100_v27 = vrot.slane %v4099_v24, 1  ;;  %v4218_v13 = vrot.slane %v4217_v33, 2  ;;  %v4103_v53 = vrot.slane %v4102_v42, 4 }
 0xd03   :  { %v4174_v57 = vpop.xlane.xlu1 %4173  ;;  %v4177_v3 = vpop.xlane.xlu0 %4176 }
 0xd04   :  { %v4280_v12 = vadd.f32 %v4272_v44, %v4264_v2  ;;  %v4219_v63 = vadd.f32 %v4218_v13, %v4217_v33  ;;  %v4104_v18 = vadd.f32 %v4103_v53, %v4102_v42  ;;  %v4222_v20 = vadd.f32 %v4177_v3, %v4174_v57 }
 0xd05   :  { %v4101_v19 = vadd.f32 %v4100_v27, %v4099_v24  ;;  %v4271_v33 = vmul.f32 %v6501_v0, %v4143_v1 }
 0xd06   :  { %v4288_v54 = vmul.f32 0.0078125, %v4280_v12  ;;  %v4220_v30 = vrot.slane %v4219_v63, 1  ;;  %v4105_v47 = vrot.slane %v4104_v18, 2  ;;  %v4223_v34 = vrot.slane %v4222_v20, 4 }
 0xd07   :  { %v4204_v45 = vpop.xlane.xlu1 %4203  ;;  %v4207_v46 = vpop.xlane.xlu0 %4206  ;;  %v4265_v23 = vmul.f32 %v6501_v0, %v4101_v19 }
 0xd08   :  { %v4296_v55 = vadd.f32 1e-05, %v4288_v54  ;;  %v4221_v60 = vadd.f32 %v4220_v30, %v4219_v63  ;;  %v4106_v22 = vadd.f32 %v4105_v47, %v4104_v18  ;;  %v4257_v11 = vadd.f32 %v4207_v46, %v4204_v45 }
 0xd09   :  { %v4224_v17 = vadd.f32 %v4223_v34, %v4222_v20 }
 0xd0a   :  { %5691 = vrsqrt.f32 %v4296_v55  ;;  %v4273_v6 = vmul.f32 %v4221_v60, %v6512_v26  ;;  %v4258_v49 = vrot.slane %v4257_v11, 4  ;;  %v4107_v21 = vrot.slane %v4106_v22, 1 }
 0xd0b   :  { %v4225_v56 = vrot.slane %v4224_v17, 2 }
 0xd0c   :  { %v4281_v10 = vadd.f32 %v4273_v6, %v4265_v23  ;;  %v4259_v4 = vadd.f32 %v4258_v49, %v4257_v11  ;;  %v4108_v32 = vadd.f32 %v4107_v21, %v4106_v22 }
 0xd0d   :  { %v4226_v59 = vadd.f32 %v4225_v56, %v4224_v17 }
 0xd0e   :  { %v4289_v35 = vmul.f32 0.0078125, %v4281_v10  ;;  %v4260_v9 = vrot.slane %v4259_v4, 2  ;;  %v4266_v39 = vmul.f32 %v6501_v0, %v4108_v32 }
 0xd0f   :  { %v4227_v51 = vrot.slane %v4226_v59, 1 }
 0xd10   :  { %v4297_v14 = vadd.f32 1e-05, %v4289_v35  ;;  %v4261_v28 = vadd.f32 %v4260_v9, %v4259_v4 }
 0xd11   :  { %v4228_v43 = vadd.f32 %v4227_v51, %v4226_v59 }
 0xd12   :  { %5693 = vrsqrt.f32 %v4297_v14  ;;  %v4262_v15 = vrot.slane %v4261_v28, 1 }
 0xd13   :  { %v4274_v8 = vmul.f32 %v4228_v43, %v6512_v26 }
 0xd14   :  { %v4263_v48 = vadd.f32 %v4262_v15, %v4261_v28 }
 0xd15   :  { %v4282_v24 = vadd.f32 %v4274_v8, %v4266_v39 }
 0xd16   :  { %v4279_v42 = vmul.f32 %v4263_v48, %v6512_v26 }
 0xd17   :  { %v5692_v31 = vpop.eup %5691  ;;  %v4290_v2 = vmul.f32 0.0078125, %v4282_v24 }
 0xd18   :  { %v4312_v44 = vmul.f32 %v5692_v31, %v8192_v36  ;;  %v4313_v27 = vmul.f32 %v5692_v31, %v8189_v29  ;;  %v4287_v13 = vadd.f32 %v4279_v42, %v4271_v33 }
 0xd19   :  { %v4298_v53 = vadd.f32 1e-05, %v4290_v2 }
 0xd1a   :  { %v4330_v57 = vmul.f32 %v8268_v41, %v4312_v44  ;;  %v4331_v3 = vmul.f32 %v8270_v52, %v4313_v27  ;;  %v4295_v12 = vmul.f32 0.0078125, %v4287_v13 }
 0xd1b   :  { %5695 = vrsqrt.f32 %v4298_v53 }
 0xd1c   :  { %v4349_v63 = vadd.f32 %v8274_v58, %v4330_v57  ;;  %v4350_v0 = vadd.f32 %v8276_v61, %v4331_v3  ;;  %v4303_v18 = vadd.f32 1e-05, %v4295_v12 }
 0xd1e   :  { %4365 = vst.msk [vmem:[%s8404_s6] sm:$0xff] %vm104_vm0, %v4349_v63  ;;  %4366 = vst.msk [vmem:[%s8404_s6 + $0x8] sm:$0xff] %vm104_vm0, %v4350_v0  ;;  %5697 = vrsqrt.f32 %v4303_v18 }
 0xd1f   :  { %v5694_v26 = vpop.eup %5693 }
 0xd20   :  { %v4314_v29 = vmul.f32 %v5694_v26, %v8220_v5  ;;  %v4315_v36 = vmul.f32 %v5694_v26, %v8215_v38 }
 0xd22   :  { %v4332_v7 = vmul.f32 %v8268_v41, %v4314_v29  ;;  %v4333_v20 = vmul.f32 %v8270_v52, %v4315_v36 }
 0xd24   :  { %v4351_v54 = vadd.f32 %v8274_v58, %v4332_v7  ;;  %v4352_v19 = vadd.f32 %v8276_v61, %v4333_v20 }
 0xd26   :  { %4367 = vst.msk [vmem:[%s8404_s6 + $0x10] sm:$0xff] %vm104_vm0, %v4351_v54  ;;  %4368 = vst.msk [vmem:[%s8404_s6 + $0x18] sm:$0xff] %vm104_vm0, %v4352_v19 }
 0xd28   :  { %v5696_v5 = vpop.eup %5695 }
 0xd29   :  { %v4316_v38 = vmul.f32 %v5696_v5, %v8238_v16  ;;  %v4317_v30 = vmul.f32 %v5696_v5, %v8235_v37 }
 0xd2b   :  { %v5698_v47 = vpop.eup %5697  ;;  %v4334_v34 = vmul.f32 %v8268_v41, %v4316_v38  ;;  %v4335_v45 = vmul.f32 %v8270_v52, %v4317_v30 }
 0xd2c   :  { %v4326_v46 = vmul.f32 %v5698_v47, %v8198_v40  ;;  %v4327_v55 = vmul.f32 %v5698_v47, %v8195_v62 }
 0xd2d   :  { %v4353_v60 = vadd.f32 %v8274_v58, %v4334_v34  ;;  %v4354_v22 = vadd.f32 %v8276_v61, %v4335_v45 }
 0xd2e   :  { %v4344_v11 = vmul.f32 %v8268_v41, %v4326_v46  ;;  %v4345_v25 = vmul.f32 %v8270_v52, %v4327_v55 }
 0xd2f   :  { %4369 = vst.msk [vmem:[%s8404_s6 + $0x20] sm:$0xff] %vm104_vm0, %v4353_v60  ;;  %4370 = vst.msk [vmem:[%s8404_s6 + $0x28] sm:$0xff] %vm104_vm0, %v4354_v22 }
 0xd30   :  { %v4363_v62 = vadd.f32 %v8274_v58, %v4344_v11  ;;  %v4364_v40 = vadd.f32 %v8276_v61, %v4345_v25 }
 0xd32   :  { %4379 = vst.msk [vmem:[%s8404_s6 + $0x70] sm:$0xff] %vm104_vm0, %v4363_v62  ;;  %4380 = vst.msk [vmem:[%s8404_s6 + $0x78] sm:$0xff] %vm104_vm0, %v4364_v40 }
 0xd33   :  { %4385 = vsyncpa [#allocation3], 1 }
 0xd34   :  { %4386 = vsyncpa [#allocation5], 1 }

</bundles_post_ra>
